<compile_context>
chip_gen: v6e
topology: v6e:2x2x1
jax: 0.10.0
libtpu: 0.0.40
codegen_flags: <defaults>
</compile_context>

<pallas_src>
import functools

import jax
import jax.numpy as jnp
from jax.experimental import pallas as pl
from jax.experimental.pallas import tpu as pltpu

NUM_CHANNELS = 320
TIMESTEP = 10

DIM = 100                    # logical transformer dim (TS-TCC)
DIM_P = 128                  # lane-padded transformer dim
DEPTH = 4
HEADS = 4
HEAD_DIM = DIM // HEADS      # 25 real dims per head
PACK = DIM_P // HEADS        # 32-lane band per head inside the packed slot
MLP_DIM = 64
MLP_P = 128
CH_P = 384                   # 320 padded to 3*128 for the fused Wk / enc
PH1 = NUM_CHANNELS // 2      # 160
PH1_P = 256                  # lane-padded projection hidden
PH2 = NUM_CHANNELS // 4      # 80
LN_EPS = 1e-5
BN_EPS = 1e-5
SCALE = DIM ** -0.5          # TS-TCC scales by model dim, not head dim


# ------------------------------ fused kernel ------------------------------

def _tc_kernel(
    fseq_ref, enc_ref,
    embed_w_ref, embed_b_ref, c_tok_ref,
    ln1_g_ref, ln1_b_ref, qkv_w_ref, out_w_ref, out_b_ref,
    ln2_g_ref, ln2_b_ref, ff1_w_ref, ff1_b_ref, ff2_w_ref, ff2_b_ref,
    wk_w_ref, wk_b_ref,
    ph1_w_ref, ph1_b_ref, bn_g_ref, bn_b_ref, ph2_w_ref, ph2_b_ref,
    nce_ref, proj_ref,
    x_ref,
    *, batch, seq_n):
    B, N = batch, seq_n
    R = B * N
    f32 = jnp.float32
    l = pl.program_id(0)

    def mm_w(a, w):      # activation @ bf16 weight, f32 accumulation on the MXU
        return jax.lax.dot_general(a.astype(w.dtype), w,
                                   (((1,), (0,)), ((), ())),
                                   preferred_element_type=f32)

    def mm_f(a, b):      # f32 (r,k) @ f32 (k,n)
        return jax.lax.dot_general(a, b, (((1,), (0,)), ((), ())),
                                   preferred_element_type=f32)

    def mm_t(a, b):      # f32 (r,k) @ f32 (s,k)^T
        return jax.lax.dot_general(a, b, (((1,), (1,)), ((), ())),
                                   preferred_element_type=f32)

    def layernorm(x, g, b):
        # padding columns [DIM:DIM_P] are exactly zero, so lane-wide sums equal
        # sums over the 100 real dims.
        mean = jnp.sum(x, axis=-1, keepdims=True) * (1.0 / DIM)
        var = jnp.sum(x * x, axis=-1, keepdims=True) * (1.0 / DIM) - mean * mean
        return (x - mean) * jax.lax.rsqrt(var + LN_EPS) * g + b

    inv_n = 1.0 / N      # static; floor((i+0.5)*inv_n) == i // N exactly

    # ---- step 0: patch embedding + c-token into the persistent x scratch ----
    @pl.when(l == 0)
    def _():
        x0 = mm_w(fseq_ref[...], embed_w_ref[...]) + embed_b_ref[...]  # (R, DIM_P)
        row = jax.lax.broadcasted_iota(jnp.int32, (R, DIM_P), 0).astype(f32)
        brow = jnp.floor((row + 0.5) * inv_n)
        is_ctok = row == brow * N                     # row % N == 0, division-free
        x_ref[...] = jnp.where(is_ctok, c_tok_ref[...], x0)

    # block-diagonal same-batch attention mask (O(1) vreg ops, rebuilt per step)
    ri = jax.lax.broadcasted_iota(jnp.int32, (R, R), 0).astype(f32)
    ci = jax.lax.broadcasted_iota(jnp.int32, (R, R), 1).astype(f32)
    same_batch = jnp.floor((ri + 0.5) * inv_n) == jnp.floor((ci + 0.5) * inv_n)

    # ---- transformer layer `l` (pre-norm residual block) ---------------------
    x = x_ref[...]
    xn = layernorm(x, ln1_g_ref[0], ln1_b_ref[0])
    qkv = mm_w(xn, qkv_w_ref[0])                      # (R, 3*DIM_P), no bias
    q = qkv[:, :DIM_P]
    k = qkv[:, DIM_P:2 * DIM_P]
    v = qkv[:, 2 * DIM_P:3 * DIM_P]
    lane = jax.lax.broadcasted_iota(jnp.int32, (R, DIM_P), 1)
    acc = jnp.zeros((R, DIM_P), f32)
    for h in range(HEADS):
        band = (lane >= h * PACK) & (lane < (h + 1) * PACK)
        qh = jnp.where(band, q, 0.0)                  # head h lives in its band
        dots = mm_t(qh, k) * SCALE                    # (R, R)
        dots = jnp.where(same_batch, dots, -1e30)
        dots = dots - jnp.max(dots, axis=-1, keepdims=True)
        p = jnp.exp(dots)
        attn = p * pl.reciprocal(jnp.sum(p, axis=-1, keepdims=True), approx=True)
        acc = acc + jnp.where(band, mm_f(attn, v), 0.0)
    x = x + mm_w(acc, out_w_ref[0]) + out_b_ref[0]    # fused out-projection

    xn = layernorm(x, ln2_g_ref[0], ln2_b_ref[0])
    h1 = mm_w(xn, ff1_w_ref[0]) + ff1_b_ref[0]
    h1 = 0.5 * h1 * (1.0 + jax.lax.erf(h1 * 0.7071067811865476))   # exact GELU
    x = x + mm_w(h1, ff2_w_ref[0]) + ff2_b_ref[0]
    # TODO(synk): transformer dropout layers are identity (eval semantics).
    x_ref[...] = x

    # ---- last step: c-token readout, fused-Wk NCE, projection head -----------
    @pl.when(l == DEPTH - 1)
    def _():
        xf = x_ref[...]
        rs = jax.lax.broadcasted_iota(jnp.int32, (B, R), 0)
        cs = jax.lax.broadcasted_iota(jnp.int32, (B, R), 1)
        sel = (cs == rs * N).astype(f32)              # one-hot rows b*N
        c_t = mm_f(sel, xf)                           # (B, DIM_P)

        # all 10 Wk heads in one weight-streaming matmul
        p_all = mm_w(c_t, wk_w_ref[...]) + wk_b_ref[...]      # (B, T*CH_P)
        nce_rows = jnp.zeros((B, 1), f32)
        for t in range(TIMESTEP):
            p_t = p_all[:, t * CH_P:(t + 1) * CH_P]           # (B, 384), aligned
            e_t = enc_ref[t]                                  # (B, 384), pad = 0
            total = mm_t(e_t, p_t)                            # (B, B) = E_t P_t^T
            m = jnp.max(total, axis=-1, keepdims=True)
            lse = m + jnp.log(jnp.sum(jnp.exp(total - m), axis=-1, keepdims=True))
            diag = jnp.sum(e_t * p_t, axis=-1, keepdims=True)  # diag(E P^T)
            nce_rows = nce_rows + (diag - lse)
        nce = jnp.sum(nce_rows, axis=0, keepdims=True) * (-1.0 / (B * TIMESTEP))
        nce_ref[...] = jnp.broadcast_to(nce, (1, DIM_P))       # lane-dense store

        # projection head: Linear -> BatchNorm1d (batch stats) -> ReLU -> Linear
        hp = mm_w(c_t, ph1_w_ref[...]) + ph1_b_ref[...]        # (B, PH1_P)
        mu = jnp.mean(hp, axis=0, keepdims=True)
        var = jnp.mean(jnp.square(hp - mu), axis=0, keepdims=True)
        hn = (hp - mu) * jax.lax.rsqrt(var + BN_EPS) * bn_g_ref[...] + bn_b_ref[...]
        hn = jnp.maximum(hn, 0.0)
        proj_ref[...] = (mm_w(hn, ph2_w_ref[...]) + ph2_b_ref[...]).astype(
            proj_ref.dtype)


# ------------------------------ parameters --------------------------------

def init_params(key):
    def lin(k, fan_in, fan_out):
        k1, k2 = jax.random.split(k)
        bound = 1.0 / (fan_in ** 0.5)
        w = jax.random.uniform(k1, (fan_in, fan_out), jnp.float32, -bound, bound)
        b = jax.random.uniform(k2, (fan_out,), jnp.float32, -bound, bound)
        return w, b

    bf16 = jnp.bfloat16
    keys = jax.random.split(key, 6 + DEPTH)
    p = {}

    # patch embedding Linear(320, 100), zero-padded to (320, 128), bf16
    w, b = lin(keys[0], NUM_CHANNELS, DIM)
    p["embed_w"] = (jnp.zeros((NUM_CHANNELS, DIM_P), jnp.float32)
                    .at[:, :DIM].set(w).astype(bf16))
    p["embed_b"] = jnp.zeros((1, DIM_P), jnp.float32).at[0, :DIM].set(b)
    p["c_token"] = jnp.zeros((1, DIM_P), jnp.float32).at[0, :DIM].set(
        jax.random.normal(keys[1], (DIM,), jnp.float32))

    ln1_g = jnp.zeros((DEPTH, 1, DIM_P), jnp.float32).at[:, :, :DIM].set(1.0)
    ln1_b = jnp.zeros((DEPTH, 1, DIM_P), jnp.float32)
    ln2_g = jnp.zeros((DEPTH, 1, DIM_P), jnp.float32).at[:, :, :DIM].set(1.0)
    ln2_b = jnp.zeros((DEPTH, 1, DIM_P), jnp.float32)
    qkv_w = jnp.zeros((DEPTH, DIM_P, 3 * DIM_P), jnp.float32)   # packed heads
    out_w = jnp.zeros((DEPTH, DIM_P, DIM_P), jnp.float32)       # fused out-proj
    out_b = jnp.zeros((DEPTH, 1, DIM_P), jnp.float32)
    ff1_w = jnp.zeros((DEPTH, DIM_P, MLP_P), jnp.float32)
    ff1_b = jnp.zeros((DEPTH, 1, MLP_P), jnp.float32)
    ff2_w = jnp.zeros((DEPTH, MLP_P, DIM_P), jnp.float32)
    ff2_b = jnp.zeros((DEPTH, 1, DIM_P), jnp.float32)

    for lyr in range(DEPTH):
        lk = jax.random.split(keys[2 + lyr], 4)
        qw, _ = lin(lk[0], DIM, 3 * DIM)               # to_qkv: bias=False
        ow, ob = lin(lk[1], DIM, DIM)
        f1w, f1b = lin(lk[2], DIM, MLP_DIM)
        f2w, f2b = lin(lk[3], MLP_DIM, DIM)
        for h in range(HEADS):
            cq = qw[:, h * HEAD_DIM:(h + 1) * HEAD_DIM]
            ck = qw[:, DIM + h * HEAD_DIM: DIM + (h + 1) * HEAD_DIM]
            cv = qw[:, 2 * DIM + h * HEAD_DIM: 2 * DIM + (h + 1) * HEAD_DIM]
            qkv_w = qkv_w.at[lyr, :DIM, h * PACK: h * PACK + HEAD_DIM].set(cq)
            qkv_w = qkv_w.at[lyr, :DIM,
                             DIM_P + h * PACK: DIM_P + h * PACK + HEAD_DIM].set(ck)
            qkv_w = qkv_w.at[lyr, :DIM,
                             2 * DIM_P + h * PACK: 2 * DIM_P + h * PACK + HEAD_DIM].set(cv)
            out_w = out_w.at[lyr, h * PACK: h * PACK + HEAD_DIM, :DIM].set(
                ow[h * HEAD_DIM:(h + 1) * HEAD_DIM, :])
        out_b = out_b.at[lyr, 0, :DIM].set(ob)
        ff1_w = ff1_w.at[lyr, :DIM, :MLP_DIM].set(f1w)
        ff1_b = ff1_b.at[lyr, 0, :MLP_DIM].set(f1b)
        ff2_w = ff2_w.at[lyr, :MLP_DIM, :DIM].set(f2w)
        ff2_b = ff2_b.at[lyr, 0, :DIM].set(f2b)

    p.update(ln1_g=ln1_g, ln1_b=ln1_b, qkv_w=qkv_w.astype(bf16),
             out_w=out_w.astype(bf16), out_b=out_b,
             ln2_g=ln2_g, ln2_b=ln2_b, ff1_w=ff1_w.astype(bf16), ff1_b=ff1_b,
             ff2_w=ff2_w.astype(bf16), ff2_b=ff2_b)

    # Wk: 10 x Linear(100 -> 320) fused into a single (128, 10*384) matrix; each
    # 320-wide head padded to a 384-lane block for aligned in-kernel slicing.
    wk_w = jnp.zeros((DIM_P, TIMESTEP * CH_P), jnp.float32)
    wk_b = jnp.zeros((1, TIMESTEP * CH_P), jnp.float32)
    for t in range(TIMESTEP):
        w, b = lin(jax.random.fold_in(keys[2 + DEPTH], t), DIM, NUM_CHANNELS)
        wk_w = wk_w.at[:DIM, t * CH_P: t * CH_P + NUM_CHANNELS].set(w)
        wk_b = wk_b.at[0, t * CH_P: t * CH_P + NUM_CHANNELS].set(b)
    p["wk_w"], p["wk_b"] = wk_w.astype(bf16), wk_b

    # projection head: Linear(100,160) -> BN(160) -> ReLU -> Linear(160,80),
    # lane-padded to 256 / 128 (padding gamma/beta are zero so pads stay zero).
    w, b = lin(keys[3 + DEPTH], DIM, PH1)
    p["ph1_w"] = (jnp.zeros((DIM_P, PH1_P), jnp.float32)
                  .at[:DIM, :PH1].set(w).astype(bf16))
    p["ph1_b"] = jnp.zeros((1, PH1_P), jnp.float32).at[0, :PH1].set(b)
    p["bn_g"] = jnp.zeros((1, PH1_P), jnp.float32).at[0, :PH1].set(1.0)
    p["bn_b"] = jnp.zeros((1, PH1_P), jnp.float32)
    w2, b2 = lin(keys[4 + DEPTH], PH1, PH2)
    p["ph2_w"] = (jnp.zeros((PH1_P, DIM_P), jnp.float32)
                  .at[:PH1, :PH2].set(w2).astype(bf16))
    p["ph2_b"] = jnp.zeros((1, DIM_P), jnp.float32).at[0, :PH2].set(b2)
    return p


# ------------------------------ forward glue ------------------------------

def tc_forward(features_aug1, features_aug2, params, t_samples):
    """features_aug*: (B, 320, L) in NCL layout; t_samples: static python int."""
    z1 = jnp.transpose(features_aug1, (0, 2, 1))        # (B, L, C)
    z2 = jnp.transpose(features_aug2, (0, 2, 1))
    B = z1.shape[0]

    # encode_samples[i-1] = z2[:, t_samples + i, :] for i = 1..TIMESTEP -> (T,B,C)
    enc = jnp.transpose(
        z2[:, t_samples + 1: t_samples + 1 + TIMESTEP, :], (1, 0, 2))
    enc = jnp.pad(enc, ((0, 0), (0, 0), (0, CH_P - NUM_CHANNELS)))   # (T,B,384)

    # forward_seq with one extra leading (zero) row per batch for the c-token slot
    n = t_samples + 1
    N = n + 1
    R = B * N
    fseq = jnp.concatenate(
        [jnp.zeros((B, 1, NUM_CHANNELS), jnp.float32), z1[:, :n, :]], axis=1)
    fseq_rows = fseq.reshape(R, NUM_CHANNELS)           # (R, C), batch-major rows

    kernel = functools.partial(_tc_kernel, batch=B, seq_n=N)

    def full(shape):                 # whole-array resident, DMA'd once (prologue)
        return pl.BlockSpec(shape, lambda l: (0,) * len(shape))

    def per_layer(shape):            # layer l slice, prefetched during layer l-1
        nd = len(shape)
        return pl.BlockSpec((1,) + shape, lambda l: (l,) + (0,) * nd)

    grid_spec = pltpu.PrefetchScalarGridSpec(
        num_scalar_prefetch=0,
        grid=(DEPTH,),
        in_specs=[
            full((R, NUM_CHANNELS)),                 # fseq_rows
            full((TIMESTEP, B, CH_P)),               # enc (padded)
            full((NUM_CHANNELS, DIM_P)),             # embed_w   (bf16)
            full((1, DIM_P)),                        # embed_b
            full((1, DIM_P)),                        # c_token
            per_layer((1, DIM_P)),                   # ln1_g
            per_layer((1, DIM_P)),                   # ln1_b
            per_layer((DIM_P, 3 * DIM_P)),           # qkv_w     (bf16)
            per_layer((DIM_P, DIM_P)),               # out_w     (bf16)
            per_layer((1, DIM_P)),                   # out_b
            per_layer((1, DIM_P)),                   # ln2_g
            per_layer((1, DIM_P)),                   # ln2_b
            per_layer((DIM_P, MLP_P)),               # ff1_w     (bf16)
            per_layer((1, MLP_P)),                   # ff1_b
            per_layer((MLP_P, DIM_P)),               # ff2_w     (bf16)
            per_layer((1, DIM_P)),                   # ff2_b
            full((DIM_P, TIMESTEP * CH_P)),          # wk_w      (bf16)
            full((1, TIMESTEP * CH_P)),              # wk_b
            full((DIM_P, PH1_P)),                    # ph1_w     (bf16)
            full((1, PH1_P)),                        # ph1_b
            full((1, PH1_P)),                        # bn_g
            full((1, PH1_P)),                        # bn_b
            full((PH1_P, DIM_P)),                    # ph2_w     (bf16)
            full((1, DIM_P)),                        # ph2_b
        ],
        out_specs=(
            pl.BlockSpec((1, DIM_P), lambda l: (0, 0)),   # nce  (lane-dense row)
            pl.BlockSpec((B, DIM_P), lambda l: (0, 0)),   # proj (lane-dense)
        ),
        scratch_shapes=[pltpu.VMEM((R, DIM_P), jnp.float32)],   # x persists
    )

    nce, proj = pl.pallas_call(
        kernel,
        grid_spec=grid_spec,
        out_shape=(jax.ShapeDtypeStruct((1, DIM_P), jnp.float32),
                   jax.ShapeDtypeStruct((B, DIM_P), jnp.float32)),
        compiler_params=pltpu.CompilerParams(
            dimension_semantics=("arbitrary",),
            vmem_limit_bytes=32 * 1024 * 1024),
    )(fseq_rows, enc,
      params["embed_w"], params["embed_b"], params["c_token"],
      params["ln1_g"], params["ln1_b"], params["qkv_w"], params["out_w"],
      params["out_b"], params["ln2_g"], params["ln2_b"], params["ff1_w"],
      params["ff1_b"], params["ff2_w"], params["ff2_b"],
      params["wk_w"], params["wk_b"],
      params["ph1_w"], params["ph1_b"], params["bn_g"], params["bn_b"],
      params["ph2_w"], params["ph2_b"])
    return nce[0, 0], proj[:, :PH2]


if __name__ == "__main__":
    key = jax.random.PRNGKey(0)
    k1, k2, k3, kp = jax.random.split(key, 4)

    B, L = 2, 16                                        # small shapes; L > timestep
    features_aug1 = jax.random.normal(k1, (B, NUM_CHANNELS, L), jnp.float32)
    features_aug2 = jax.random.normal(k2, (B, NUM_CHANNELS, L), jnp.float32)
    params = init_params(kp)

    # torch.randint(seq_len - timestep, size=(1,)) equivalent, drawn host-side
    t_samples = int(jax.random.randint(k3, (), 0, L - TIMESTEP))

    nce, proj = tc_forward(features_aug1, features_aug2, params, t_samples)
    jax.block_until_ready((nce, proj))
    assert proj.shape == (B, NUM_CHANNELS // 4)
    assert nce.shape == ()
    print("KERNEL_OK")
</pallas_src>

<mosaic_0001>
module attributes {stable_mosaic.version = 11 : i64} {
  func.func @_tc_kernel(%arg0: i32, %arg1: memref<10x320xf32, #tpu.memory_space<vmem>>, %arg2: memref<10x2x384xf32, #tpu.memory_space<vmem>>, %arg3: memref<320x128xbf16, #tpu.memory_space<vmem>>, %arg4: memref<1x128xf32, #tpu.memory_space<vmem>>, %arg5: memref<1x128xf32, #tpu.memory_space<vmem>>, %arg6: memref<1x1x128xf32, #tpu.memory_space<vmem>>, %arg7: memref<1x1x128xf32, #tpu.memory_space<vmem>>, %arg8: memref<1x128x384xbf16, #tpu.memory_space<vmem>>, %arg9: memref<1x128x128xbf16, #tpu.memory_space<vmem>>, %arg10: memref<1x1x128xf32, #tpu.memory_space<vmem>>, %arg11: memref<1x1x128xf32, #tpu.memory_space<vmem>>, %arg12: memref<1x1x128xf32, #tpu.memory_space<vmem>>, %arg13: memref<1x128x128xbf16, #tpu.memory_space<vmem>>, %arg14: memref<1x1x128xf32, #tpu.memory_space<vmem>>, %arg15: memref<1x128x128xbf16, #tpu.memory_space<vmem>>, %arg16: memref<1x1x128xf32, #tpu.memory_space<vmem>>, %arg17: memref<128x3840xbf16, #tpu.memory_space<vmem>>, %arg18: memref<1x3840xf32, #tpu.memory_space<vmem>>, %arg19: memref<128x256xbf16, #tpu.memory_space<vmem>>, %arg20: memref<1x256xf32, #tpu.memory_space<vmem>>, %arg21: memref<1x256xf32, #tpu.memory_space<vmem>>, %arg22: memref<1x256xf32, #tpu.memory_space<vmem>>, %arg23: memref<256x128xbf16, #tpu.memory_space<vmem>>, %arg24: memref<1x128xf32, #tpu.memory_space<vmem>>, %arg25: memref<1x128xf32, #tpu.memory_space<vmem>>, %arg26: memref<2x128xf32, #tpu.memory_space<vmem>>, %arg27: memref<10x128xf32, #tpu.memory_space<vmem>>) attributes {dimension_semantics = [#tpu.dimension_semantics<arbitrary>], iteration_bounds = array<i64: 4>, scalar_prefetch = 0 : i64, scratch_operands = 1 : i64, tpu.core_type = #tpu.core_type<tc>, window_params = [{pipeline_mode = #tpu.pipeline_mode<synchronous>, transform_indices = @transform_0, window_bounds = array<i64: 10, 320>}, {pipeline_mode = #tpu.pipeline_mode<synchronous>, transform_indices = @transform_1, window_bounds = array<i64: 10, 2, 384>}, {pipeline_mode = #tpu.pipeline_mode<synchronous>, transform_indices = @transform_2, window_bounds = array<i64: 320, 128>}, {pipeline_mode = #tpu.pipeline_mode<synchronous>, transform_indices = @transform_3, window_bounds = array<i64: 1, 128>}, {pipeline_mode = #tpu.pipeline_mode<synchronous>, transform_indices = @transform_4, window_bounds = array<i64: 1, 128>}, {transform_indices = @transform_5, window_bounds = array<i64: 1, 1, 128>}, {transform_indices = @transform_6, window_bounds = array<i64: 1, 1, 128>}, {transform_indices = @transform_7, window_bounds = array<i64: 1, 128, 384>}, {transform_indices = @transform_8, window_bounds = array<i64: 1, 128, 128>}, {transform_indices = @transform_9, window_bounds = array<i64: 1, 1, 128>}, {transform_indices = @transform_10, window_bounds = array<i64: 1, 1, 128>}, {transform_indices = @transform_11, window_bounds = array<i64: 1, 1, 128>}, {transform_indices = @transform_12, window_bounds = array<i64: 1, 128, 128>}, {transform_indices = @transform_13, window_bounds = array<i64: 1, 1, 128>}, {transform_indices = @transform_14, window_bounds = array<i64: 1, 128, 128>}, {transform_indices = @transform_15, window_bounds = array<i64: 1, 1, 128>}, {pipeline_mode = #tpu.pipeline_mode<synchronous>, transform_indices = @transform_16, window_bounds = array<i64: 128, 3840>}, {pipeline_mode = #tpu.pipeline_mode<synchronous>, transform_indices = @transform_17, window_bounds = array<i64: 1, 3840>}, {pipeline_mode = #tpu.pipeline_mode<synchronous>, transform_indices = @transform_18, window_bounds = array<i64: 128, 256>}, {pipeline_mode = #tpu.pipeline_mode<synchronous>, transform_indices = @transform_19, window_bounds = array<i64: 1, 256>}, {pipeline_mode = #tpu.pipeline_mode<synchronous>, transform_indices = @transform_20, window_bounds = array<i64: 1, 256>}, {pipeline_mode = #tpu.pipeline_mode<synchronous>, transform_indices = @transform_21, window_bounds = array<i64: 1, 256>}, {pipeline_mode = #tpu.pipeline_mode<synchronous>, transform_indices = @transform_22, window_bounds = array<i64: 256, 128>}, {pipeline_mode = #tpu.pipeline_mode<synchronous>, transform_indices = @transform_23, window_bounds = array<i64: 1, 128>}, {pipeline_mode = #tpu.pipeline_mode<synchronous>, transform_indices = @transform_24, window_bounds = array<i64: 1, 128>}, {pipeline_mode = #tpu.pipeline_mode<synchronous>, transform_indices = @transform_25, window_bounds = array<i64: 2, 128>}]} {
    %c0_i32 = arith.constant 0 : i32
    %0 = arith.cmpi eq, %arg0, %c0_i32 : i32
    %1 = arith.extui %0 : i1 to i32
    %c0_i32_0 = arith.constant 0 : i32
    %2 = arith.cmpi ne, %1, %c0_i32_0 : i32
    scf.if %2 {
      %c0_95 = arith.constant 0 : index
      %c0_96 = arith.constant 0 : index
      %222 = vector.load %arg1[%c0_95, %c0_96] : memref<10x320xf32, #tpu.memory_space<vmem>>, vector<10x320xf32>
      %c0_97 = arith.constant 0 : index
      %c0_98 = arith.constant 0 : index
      %223 = vector.load %arg3[%c0_97, %c0_98] : memref<320x128xbf16, #tpu.memory_space<vmem>>, vector<320x128xbf16>
      %224 = arith.truncf %222 : vector<10x320xf32> to vector<10x320xbf16>
      %cst_99 = arith.constant dense<0.000000e+00> : vector<10x128xf32>
      %225 = tpu.matmul %224, %223, %cst_99 {dimension_numbers = #tpu.dot_dimension_numbers<[1], [0], [0], [1], [0, 0, 1, 1], [], []>} : vector<10x320xbf16>, vector<320x128xbf16>, vector<10x128xf32> -> vector<10x128xf32>
      %c0_100 = arith.constant 0 : index
      %c0_101 = arith.constant 0 : index
      %226 = vector.load %arg4[%c0_100, %c0_101] : memref<1x128xf32, #tpu.memory_space<vmem>>, vector<1x128xf32>
      %227 = vector.broadcast %226 : vector<1x128xf32> to vector<10x128xf32>
      %228 = arith.addf %225, %227 : vector<10x128xf32>
      %229 = tpu.iota {dimensions = array<i32: 0>} : vector<10x128xi32>
      %230 = arith.sitofp %229 : vector<10x128xi32> to vector<10x128xf32>
      %cst_102 = arith.constant 5.000000e-01 : f32
      %231 = vector.broadcast %cst_102 : f32 to vector<10x128xf32>
      %232 = arith.addf %230, %231 : vector<10x128xf32>
      %cst_103 = arith.constant 2.000000e-01 : f32
      %233 = vector.broadcast %cst_103 : f32 to vector<10x128xf32>
      %234 = arith.mulf %232, %233 : vector<10x128xf32>
      %235 = math.floor %234 : vector<10x128xf32>
      %cst_104 = arith.constant 5.000000e+00 : f32
      %236 = vector.broadcast %cst_104 : f32 to vector<10x128xf32>
      %237 = arith.mulf %235, %236 : vector<10x128xf32>
      %238 = arith.cmpf oeq, %230, %237 : vector<10x128xf32>
      %c0_105 = arith.constant 0 : index
      %c0_106 = arith.constant 0 : index
      %239 = vector.load %arg5[%c0_105, %c0_106] : memref<1x128xf32, #tpu.memory_space<vmem>>, vector<1x128xf32>
      %240 = vector.shape_cast %239 : vector<1x128xf32> to vector<1x128xf32>
      %241 = vector.broadcast %240 : vector<1x128xf32> to vector<10x128xf32>
      %242 = arith.select %238, %241, %228 : vector<10x128xi1>, vector<10x128xf32>
      %c0_107 = arith.constant 0 : index
      %c0_108 = arith.constant 0 : index
      %243 = vector.load %arg27[%c0_107, %c0_108] : memref<10x128xf32, #tpu.memory_space<vmem>>, vector<10x128xf32>
      tpu.vector_store %arg27[%c0_107, %c0_108], %242 {strides = array<i32>} : memref<10x128xf32, #tpu.memory_space<vmem>>, vector<10x128xf32>,
    } else {
    }
    %3 = tpu.iota {dimensions = array<i32: 0>} : vector<10x10xi32>
    %4 = arith.sitofp %3 : vector<10x10xi32> to vector<10x10xf32>
    %5 = tpu.iota {dimensions = array<i32: 1>} : vector<10x10xi32>
    %6 = arith.sitofp %5 : vector<10x10xi32> to vector<10x10xf32>
    %cst = arith.constant 5.000000e-01 : f32
    %7 = vector.broadcast %cst : f32 to vector<10x10xf32>
    %8 = arith.addf %4, %7 : vector<10x10xf32>
    %cst_1 = arith.constant 2.000000e-01 : f32
    %9 = vector.broadcast %cst_1 : f32 to vector<10x10xf32>
    %10 = arith.mulf %8, %9 : vector<10x10xf32>
    %11 = math.floor %10 : vector<10x10xf32>
    %cst_2 = arith.constant 5.000000e-01 : f32
    %12 = vector.broadcast %cst_2 : f32 to vector<10x10xf32>
    %13 = arith.addf %6, %12 : vector<10x10xf32>
    %cst_3 = arith.constant 2.000000e-01 : f32
    %14 = vector.broadcast %cst_3 : f32 to vector<10x10xf32>
    %15 = arith.mulf %13, %14 : vector<10x10xf32>
    %16 = math.floor %15 : vector<10x10xf32>
    %17 = arith.cmpf oeq, %11, %16 : vector<10x10xf32>
    %c0 = arith.constant 0 : index
    %c0_4 = arith.constant 0 : index
    %18 = vector.load %arg27[%c0, %c0_4] : memref<10x128xf32, #tpu.memory_space<vmem>>, vector<10x128xf32>
    %c0_5 = arith.constant 0 : index
    %c0_6 = arith.constant 0 : index
    %c0_7 = arith.constant 0 : index
    %19 = vector.load %arg6[%c0_5, %c0_6, %c0_7] : memref<1x1x128xf32, #tpu.memory_space<vmem>>, vector<1x1x128xf32>
    %20 = vector.shape_cast %19 : vector<1x1x128xf32> to vector<1x128xf32>
    %c0_8 = arith.constant 0 : index
    %c0_9 = arith.constant 0 : index
    %c0_10 = arith.constant 0 : index
    %21 = vector.load %arg7[%c0_8, %c0_9, %c0_10] : memref<1x1x128xf32, #tpu.memory_space<vmem>>, vector<1x1x128xf32>
    %22 = vector.shape_cast %21 : vector<1x1x128xf32> to vector<1x128xf32>
    %cst_11 = arith.constant dense<0.000000e+00> : vector<10xf32>
    %23 = vector.multi_reduction <add>, %18, %cst_11 [1] : vector<10x128xf32> to vector<10xf32>
    %24 = vector.shape_cast %23 : vector<10xf32> to vector<10x1xf32>
    %cst_12 = arith.constant 0.00999999977 : f32
    %25 = vector.broadcast %cst_12 : f32 to vector<10x1xf32>
    %26 = arith.mulf %24, %25 : vector<10x1xf32>
    %27 = arith.mulf %18, %18 : vector<10x128xf32>
    %cst_13 = arith.constant dense<0.000000e+00> : vector<10xf32>
    %28 = vector.multi_reduction <add>, %27, %cst_13 [1] : vector<10x128xf32> to vector<10xf32>
    %29 = vector.shape_cast %28 : vector<10xf32> to vector<10x1xf32>
    %cst_14 = arith.constant 0.00999999977 : f32
    %30 = vector.broadcast %cst_14 : f32 to vector<10x1xf32>
    %31 = arith.mulf %29, %30 : vector<10x1xf32>
    %32 = arith.mulf %26, %26 : vector<10x1xf32>
    %33 = arith.subf %31, %32 : vector<10x1xf32>
    %34 = vector.broadcast %26 : vector<10x1xf32> to vector<10x128xf32>
    %35 = arith.subf %18, %34 : vector<10x128xf32>
    %cst_15 = arith.constant 9.99999974E-6 : f32
    %36 = vector.broadcast %cst_15 : f32 to vector<10x1xf32>
    %37 = arith.addf %33, %36 : vector<10x1xf32>
    %38 = math.rsqrt %37 : vector<10x1xf32>
    %39 = vector.broadcast %38 : vector<10x1xf32> to vector<10x128xf32>
    %40 = arith.mulf %35, %39 : vector<10x128xf32>
    %41 = vector.broadcast %20 : vector<1x128xf32> to vector<10x128xf32>
    %42 = arith.mulf %40, %41 : vector<10x128xf32>
    %43 = vector.broadcast %22 : vector<1x128xf32> to vector<10x128xf32>
    %44 = arith.addf %42, %43 : vector<10x128xf32>
    %c0_16 = arith.constant 0 : index
    %c0_17 = arith.constant 0 : index
    %c0_18 = arith.constant 0 : index
    %45 = vector.load %arg8[%c0_16, %c0_17, %c0_18] : memref<1x128x384xbf16, #tpu.memory_space<vmem>>, vector<1x128x384xbf16>
    %46 = vector.shape_cast %45 : vector<1x128x384xbf16> to vector<128x384xbf16>
    %47 = arith.truncf %44 : vector<10x128xf32> to vector<10x128xbf16>
    %cst_19 = arith.constant dense<0.000000e+00> : vector<10x384xf32>
    %48 = tpu.matmul %47, %46, %cst_19 {dimension_numbers = #tpu.dot_dimension_numbers<[1], [0], [0], [1], [0, 0, 1, 1], [], []>} : vector<10x128xbf16>, vector<128x384xbf16>, vector<10x384xf32> -> vector<10x384xf32>
    %49 = vector.extract_strided_slice %48 {offsets = [0, 0], sizes = [10, 128], strides = [1, 1]} : vector<10x384xf32> to vector<10x128xf32>
    %50 = vector.extract_strided_slice %48 {offsets = [0, 128], sizes = [10, 128], strides = [1, 1]} : vector<10x384xf32> to vector<10x128xf32>
    %51 = vector.extract_strided_slice %48 {offsets = [0, 256], sizes = [10, 128], strides = [1, 1]} : vector<10x384xf32> to vector<10x128xf32>
    %52 = tpu.iota {dimensions = array<i32: 1>} : vector<10x128xi32>
    %cst_20 = arith.constant 0.000000e+00 : f32
    %53 = vector.broadcast %cst_20 : f32 to vector<10x128xf32>
    %c0_i32_21 = arith.constant 0 : i32
    %54 = vector.broadcast %c0_i32_21 : i32 to vector<10x128xi32>
    %55 = arith.cmpi sge, %52, %54 : vector<10x128xi32>
    %c32_i32 = arith.constant 32 : i32
    %56 = vector.broadcast %c32_i32 : i32 to vector<10x128xi32>
    %57 = arith.cmpi slt, %52, %56 : vector<10x128xi32>
    %58 = arith.andi %55, %57 : vector<10x128xi1>
    %cst_22 = arith.constant 0.000000e+00 : f32
    %59 = vector.broadcast %cst_22 : f32 to vector<10x128xf32>
    %60 = arith.select %58, %49, %59 : vector<10x128xi1>, vector<10x128xf32>
    %cst_23 = arith.constant dense<0.000000e+00> : vector<10x10xf32>
    %61 = tpu.matmul %60, %50, %cst_23 {dimension_numbers = #tpu.dot_dimension_numbers<[1], [1], [0], [0], [0, 0, 1, 0], [], []>} : vector<10x128xf32>, vector<10x128xf32>, vector<10x10xf32> -> vector<10x10xf32>
    %cst_24 = arith.constant 1.000000e-01 : f32
    %62 = vector.broadcast %cst_24 : f32 to vector<10x10xf32>
    %63 = arith.mulf %61, %62 : vector<10x10xf32>
    %cst_25 = arith.constant -1.000000e+30 : f32
    %64 = vector.broadcast %cst_25 : f32 to vector<10x10xf32>
    %65 = arith.select %17, %63, %64 : vector<10x10xi1>, vector<10x10xf32>
    %cst_26 = arith.constant dense<0xFF800000> : vector<10xf32>
    %66 = vector.multi_reduction <maximumf>, %65, %cst_26 [1] : vector<10x10xf32> to vector<10xf32>
    %67 = vector.shape_cast %66 : vector<10xf32> to vector<10x1xf32>
    %68 = vector.broadcast %67 : vector<10x1xf32> to vector<10x10xf32>
    %69 = arith.subf %65, %68 : vector<10x10xf32>
    %70 = math.exp %69 : vector<10x10xf32>
    %cst_27 = arith.constant dense<0.000000e+00> : vector<10xf32>
    %71 = vector.multi_reduction <add>, %70, %cst_27 [1] : vector<10x10xf32> to vector<10xf32>
    %72 = vector.shape_cast %71 : vector<10xf32> to vector<10x1xf32>
    %73 = tpu.reciprocal %72 {approx = true} : vector<10x1xf32> -> vector<10x1xf32>
    %74 = vector.broadcast %73 : vector<10x1xf32> to vector<10x10xf32>
    %75 = arith.mulf %70, %74 : vector<10x10xf32>
    %cst_28 = arith.constant dense<0.000000e+00> : vector<10x128xf32>
    %76 = tpu.matmul %75, %51, %cst_28 {dimension_numbers = #tpu.dot_dimension_numbers<[1], [0], [0], [1], [0, 0, 1, 1], [], []>} : vector<10x10xf32>, vector<10x128xf32>, vector<10x128xf32> -> vector<10x128xf32>
    %cst_29 = arith.constant 0.000000e+00 : f32
    %77 = vector.broadcast %cst_29 : f32 to vector<10x128xf32>
    %78 = arith.select %58, %76, %77 : vector<10x128xi1>, vector<10x128xf32>
    %79 = arith.addf %53, %78 : vector<10x128xf32>
    %c32_i32_30 = arith.constant 32 : i32
    %80 = vector.broadcast %c32_i32_30 : i32 to vector<10x128xi32>
    %81 = arith.cmpi sge, %52, %80 : vector<10x128xi32>
    %c64_i32 = arith.constant 64 : i32
    %82 = vector.broadcast %c64_i32 : i32 to vector<10x128xi32>
    %83 = arith.cmpi slt, %52, %82 : vector<10x128xi32>
    %84 = arith.andi %81, %83 : vector<10x128xi1>
    %cst_31 = arith.constant 0.000000e+00 : f32
    %85 = vector.broadcast %cst_31 : f32 to vector<10x128xf32>
    %86 = arith.select %84, %49, %85 : vector<10x128xi1>, vector<10x128xf32>
    %cst_32 = arith.constant dense<0.000000e+00> : vector<10x10xf32>
    %87 = tpu.matmul %86, %50, %cst_32 {dimension_numbers = #tpu.dot_dimension_numbers<[1], [1], [0], [0], [0, 0, 1, 0], [], []>} : vector<10x128xf32>, vector<10x128xf32>, vector<10x10xf32> -> vector<10x10xf32>
    %cst_33 = arith.constant 1.000000e-01 : f32
    %88 = vector.broadcast %cst_33 : f32 to vector<10x10xf32>
    %89 = arith.mulf %87, %88 : vector<10x10xf32>
    %cst_34 = arith.constant -1.000000e+30 : f32
    %90 = vector.broadcast %cst_34 : f32 to vector<10x10xf32>
    %91 = arith.select %17, %89, %90 : vector<10x10xi1>, vector<10x10xf32>
    %cst_35 = arith.constant dense<0xFF800000> : vector<10xf32>
    %92 = vector.multi_reduction <maximumf>, %91, %cst_35 [1] : vector<10x10xf32> to vector<10xf32>
    %93 = vector.shape_cast %92 : vector<10xf32> to vector<10x1xf32>
    %94 = vector.broadcast %93 : vector<10x1xf32> to vector<10x10xf32>
    %95 = arith.subf %91, %94 : vector<10x10xf32>
    %96 = math.exp %95 : vector<10x10xf32>
    %cst_36 = arith.constant dense<0.000000e+00> : vector<10xf32>
    %97 = vector.multi_reduction <add>, %96, %cst_36 [1] : vector<10x10xf32> to vector<10xf32>
    %98 = vector.shape_cast %97 : vector<10xf32> to vector<10x1xf32>
    %99 = tpu.reciprocal %98 {approx = true} : vector<10x1xf32> -> vector<10x1xf32>
    %100 = vector.broadcast %99 : vector<10x1xf32> to vector<10x10xf32>
    %101 = arith.mulf %96, %100 : vector<10x10xf32>
    %cst_37 = arith.constant dense<0.000000e+00> : vector<10x128xf32>
    %102 = tpu.matmul %101, %51, %cst_37 {dimension_numbers = #tpu.dot_dimension_numbers<[1], [0], [0], [1], [0, 0, 1, 1], [], []>} : vector<10x10xf32>, vector<10x128xf32>, vector<10x128xf32> -> vector<10x128xf32>
    %cst_38 = arith.constant 0.000000e+00 : f32
    %103 = vector.broadcast %cst_38 : f32 to vector<10x128xf32>
    %104 = arith.select %84, %102, %103 : vector<10x128xi1>, vector<10x128xf32>
    %105 = arith.addf %79, %104 : vector<10x128xf32>
    %c64_i32_39 = arith.constant 64 : i32
    %106 = vector.broadcast %c64_i32_39 : i32 to vector<10x128xi32>
    %107 = arith.cmpi sge, %52, %106 : vector<10x128xi32>
    %c96_i32 = arith.constant 96 : i32
    %108 = vector.broadcast %c96_i32 : i32 to vector<10x128xi32>
    %109 = arith.cmpi slt, %52, %108 : vector<10x128xi32>
    %110 = arith.andi %107, %109 : vector<10x128xi1>
    %cst_40 = arith.constant 0.000000e+00 : f32
    %111 = vector.broadcast %cst_40 : f32 to vector<10x128xf32>
    %112 = arith.select %110, %49, %111 : vector<10x128xi1>, vector<10x128xf32>
    %cst_41 = arith.constant dense<0.000000e+00> : vector<10x10xf32>
    %113 = tpu.matmul %112, %50, %cst_41 {dimension_numbers = #tpu.dot_dimension_numbers<[1], [1], [0], [0], [0, 0, 1, 0], [], []>} : vector<10x128xf32>, vector<10x128xf32>, vector<10x10xf32> -> vector<10x10xf32>
    %cst_42 = arith.constant 1.000000e-01 : f32
    %114 = vector.broadcast %cst_42 : f32 to vector<10x10xf32>
    %115 = arith.mulf %113, %114 : vector<10x10xf32>
    %cst_43 = arith.constant -1.000000e+30 : f32
    %116 = vector.broadcast %cst_43 : f32 to vector<10x10xf32>
    %117 = arith.select %17, %115, %116 : vector<10x10xi1>, vector<10x10xf32>
    %cst_44 = arith.constant dense<0xFF800000> : vector<10xf32>
    %118 = vector.multi_reduction <maximumf>, %117, %cst_44 [1] : vector<10x10xf32> to vector<10xf32>
    %119 = vector.shape_cast %118 : vector<10xf32> to vector<10x1xf32>
    %120 = vector.broadcast %119 : vector<10x1xf32> to vector<10x10xf32>
    %121 = arith.subf %117, %120 : vector<10x10xf32>
    %122 = math.exp %121 : vector<10x10xf32>
    %cst_45 = arith.constant dense<0.000000e+00> : vector<10xf32>
    %123 = vector.multi_reduction <add>, %122, %cst_45 [1] : vector<10x10xf32> to vector<10xf32>
    %124 = vector.shape_cast %123 : vector<10xf32> to vector<10x1xf32>
    %125 = tpu.reciprocal %124 {approx = true} : vector<10x1xf32> -> vector<10x1xf32>
    %126 = vector.broadcast %125 : vector<10x1xf32> to vector<10x10xf32>
    %127 = arith.mulf %122, %126 : vector<10x10xf32>
    %cst_46 = arith.constant dense<0.000000e+00> : vector<10x128xf32>
    %128 = tpu.matmul %127, %51, %cst_46 {dimension_numbers = #tpu.dot_dimension_numbers<[1], [0], [0], [1], [0, 0, 1, 1], [], []>} : vector<10x10xf32>, vector<10x128xf32>, vector<10x128xf32> -> vector<10x128xf32>
    %cst_47 = arith.constant 0.000000e+00 : f32
    %129 = vector.broadcast %cst_47 : f32 to vector<10x128xf32>
    %130 = arith.select %110, %128, %129 : vector<10x128xi1>, vector<10x128xf32>
    %131 = arith.addf %105, %130 : vector<10x128xf32>
    %c96_i32_48 = arith.constant 96 : i32
    %132 = vector.broadcast %c96_i32_48 : i32 to vector<10x128xi32>
    %133 = arith.cmpi sge, %52, %132 : vector<10x128xi32>
    %c128_i32 = arith.constant 128 : i32
    %134 = vector.broadcast %c128_i32 : i32 to vector<10x128xi32>
    %135 = arith.cmpi slt, %52, %134 : vector<10x128xi32>
    %136 = arith.andi %133, %135 : vector<10x128xi1>
    %cst_49 = arith.constant 0.000000e+00 : f32
    %137 = vector.broadcast %cst_49 : f32 to vector<10x128xf32>
    %138 = arith.select %136, %49, %137 : vector<10x128xi1>, vector<10x128xf32>
    %cst_50 = arith.constant dense<0.000000e+00> : vector<10x10xf32>
    %139 = tpu.matmul %138, %50, %cst_50 {dimension_numbers = #tpu.dot_dimension_numbers<[1], [1], [0], [0], [0, 0, 1, 0], [], []>} : vector<10x128xf32>, vector<10x128xf32>, vector<10x10xf32> -> vector<10x10xf32>
    %cst_51 = arith.constant 1.000000e-01 : f32
    %140 = vector.broadcast %cst_51 : f32 to vector<10x10xf32>
    %141 = arith.mulf %139, %140 : vector<10x10xf32>
    %cst_52 = arith.constant -1.000000e+30 : f32
    %142 = vector.broadcast %cst_52 : f32 to vector<10x10xf32>
    %143 = arith.select %17, %141, %142 : vector<10x10xi1>, vector<10x10xf32>
    %cst_53 = arith.constant dense<0xFF800000> : vector<10xf32>
    %144 = vector.multi_reduction <maximumf>, %143, %cst_53 [1] : vector<10x10xf32> to vector<10xf32>
    %145 = vector.shape_cast %144 : vector<10xf32> to vector<10x1xf32>
    %146 = vector.broadcast %145 : vector<10x1xf32> to vector<10x10xf32>
    %147 = arith.subf %143, %146 : vector<10x10xf32>
    %148 = math.exp %147 : vector<10x10xf32>
    %cst_54 = arith.constant dense<0.000000e+00> : vector<10xf32>
    %149 = vector.multi_reduction <add>, %148, %cst_54 [1] : vector<10x10xf32> to vector<10xf32>
    %150 = vector.shape_cast %149 : vector<10xf32> to vector<10x1xf32>
    %151 = tpu.reciprocal %150 {approx = true} : vector<10x1xf32> -> vector<10x1xf32>
    %152 = vector.broadcast %151 : vector<10x1xf32> to vector<10x10xf32>
    %153 = arith.mulf %148, %152 : vector<10x10xf32>
    %cst_55 = arith.constant dense<0.000000e+00> : vector<10x128xf32>
    %154 = tpu.matmul %153, %51, %cst_55 {dimension_numbers = #tpu.dot_dimension_numbers<[1], [0], [0], [1], [0, 0, 1, 1], [], []>} : vector<10x10xf32>, vector<10x128xf32>, vector<10x128xf32> -> vector<10x128xf32>
    %cst_56 = arith.constant 0.000000e+00 : f32
    %155 = vector.broadcast %cst_56 : f32 to vector<10x128xf32>
    %156 = arith.select %136, %154, %155 : vector<10x128xi1>, vector<10x128xf32>
    %157 = arith.addf %131, %156 : vector<10x128xf32>
    %c0_57 = arith.constant 0 : index
    %c0_58 = arith.constant 0 : index
    %c0_59 = arith.constant 0 : index
    %158 = vector.load %arg9[%c0_57, %c0_58, %c0_59] : memref<1x128x128xbf16, #tpu.memory_space<vmem>>, vector<1x128x128xbf16>
    %159 = vector.shape_cast %158 : vector<1x128x128xbf16> to vector<128x128xbf16>
    %160 = arith.truncf %157 : vector<10x128xf32> to vector<10x128xbf16>
    %cst_60 = arith.constant dense<0.000000e+00> : vector<10x128xf32>
    %161 = tpu.matmul %160, %159, %cst_60 {dimension_numbers = #tpu.dot_dimension_numbers<[1], [0], [0], [1], [0, 0, 1, 1], [], []>} : vector<10x128xbf16>, vector<128x128xbf16>, vector<10x128xf32> -> vector<10x128xf32>
    %162 = arith.addf %18, %161 : vector<10x128xf32>
    %c0_61 = arith.constant 0 : index
    %c0_62 = arith.constant 0 : index
    %c0_63 = arith.constant 0 : index
    %163 = vector.load %arg10[%c0_61, %c0_62, %c0_63] : memref<1x1x128xf32, #tpu.memory_space<vmem>>, vector<1x1x128xf32>
    %164 = vector.shape_cast %163 : vector<1x1x128xf32> to vector<1x128xf32>
    %165 = vector.broadcast %164 : vector<1x128xf32> to vector<10x128xf32>
    %166 = arith.addf %162, %165 : vector<10x128xf32>
    %c0_64 = arith.constant 0 : index
    %c0_65 = arith.constant 0 : index
    %c0_66 = arith.constant 0 : index
    %167 = vector.load %arg11[%c0_64, %c0_65, %c0_66] : memref<1x1x128xf32, #tpu.memory_space<vmem>>, vector<1x1x128xf32>
    %168 = vector.shape_cast %167 : vector<1x1x128xf32> to vector<1x128xf32>
    %c0_67 = arith.constant 0 : index
    %c0_68 = arith.constant 0 : index
    %c0_69 = arith.constant 0 : index
    %169 = vector.load %arg12[%c0_67, %c0_68, %c0_69] : memref<1x1x128xf32, #tpu.memory_space<vmem>>, vector<1x1x128xf32>
    %170 = vector.shape_cast %169 : vector<1x1x128xf32> to vector<1x128xf32>
    %cst_70 = arith.constant dense<0.000000e+00> : vector<10xf32>
    %171 = vector.multi_reduction <add>, %166, %cst_70 [1] : vector<10x128xf32> to vector<10xf32>
    %172 = vector.shape_cast %171 : vector<10xf32> to vector<10x1xf32>
    %cst_71 = arith.constant 0.00999999977 : f32
    %173 = vector.broadcast %cst_71 : f32 to vector<10x1xf32>
    %174 = arith.mulf %172, %173 : vector<10x1xf32>
    %175 = arith.mulf %166, %166 : vector<10x128xf32>
    %cst_72 = arith.constant dense<0.000000e+00> : vector<10xf32>
    %176 = vector.multi_reduction <add>, %175, %cst_72 [1] : vector<10x128xf32> to vector<10xf32>
    %177 = vector.shape_cast %176 : vector<10xf32> to vector<10x1xf32>
    %cst_73 = arith.constant 0.00999999977 : f32
    %178 = vector.broadcast %cst_73 : f32 to vector<10x1xf32>
    %179 = arith.mulf %177, %178 : vector<10x1xf32>
    %180 = arith.mulf %174, %174 : vector<10x1xf32>
    %181 = arith.subf %179, %180 : vector<10x1xf32>
    %182 = vector.broadcast %174 : vector<10x1xf32> to vector<10x128xf32>
    %183 = arith.subf %166, %182 : vector<10x128xf32>
    %cst_74 = arith.constant 9.99999974E-6 : f32
    %184 = vector.broadcast %cst_74 : f32 to vector<10x1xf32>
    %185 = arith.addf %181, %184 : vector<10x1xf32>
    %186 = math.rsqrt %185 : vector<10x1xf32>
    %187 = vector.broadcast %186 : vector<10x1xf32> to vector<10x128xf32>
    %188 = arith.mulf %183, %187 : vector<10x128xf32>
    %189 = vector.broadcast %168 : vector<1x128xf32> to vector<10x128xf32>
    %190 = arith.mulf %188, %189 : vector<10x128xf32>
    %191 = vector.broadcast %170 : vector<1x128xf32> to vector<10x128xf32>
    %192 = arith.addf %190, %191 : vector<10x128xf32>
    %c0_75 = arith.constant 0 : index
    %c0_76 = arith.constant 0 : index
    %c0_77 = arith.constant 0 : index
    %193 = vector.load %arg13[%c0_75, %c0_76, %c0_77] : memref<1x128x128xbf16, #tpu.memory_space<vmem>>, vector<1x128x128xbf16>
    %194 = vector.shape_cast %193 : vector<1x128x128xbf16> to vector<128x128xbf16>
    %195 = arith.truncf %192 : vector<10x128xf32> to vector<10x128xbf16>
    %cst_78 = arith.constant dense<0.000000e+00> : vector<10x128xf32>
    %196 = tpu.matmul %195, %194, %cst_78 {dimension_numbers = #tpu.dot_dimension_numbers<[1], [0], [0], [1], [0, 0, 1, 1], [], []>} : vector<10x128xbf16>, vector<128x128xbf16>, vector<10x128xf32> -> vector<10x128xf32>
    %c0_79 = arith.constant 0 : index
    %c0_80 = arith.constant 0 : index
    %c0_81 = arith.constant 0 : index
    %197 = vector.load %arg14[%c0_79, %c0_80, %c0_81] : memref<1x1x128xf32, #tpu.memory_space<vmem>>, vector<1x1x128xf32>
    %198 = vector.shape_cast %197 : vector<1x1x128xf32> to vector<1x128xf32>
    %199 = vector.broadcast %198 : vector<1x128xf32> to vector<10x128xf32>
    %200 = arith.addf %196, %199 : vector<10x128xf32>
    %cst_82 = arith.constant 5.000000e-01 : f32
    %201 = vector.broadcast %cst_82 : f32 to vector<10x128xf32>
    %202 = arith.mulf %201, %200 : vector<10x128xf32>
    %cst_83 = arith.constant 0.707106769 : f32
    %203 = vector.broadcast %cst_83 : f32 to vector<10x128xf32>
    %204 = arith.mulf %200, %203 : vector<10x128xf32>
    %205 = math.erf %204 : vector<10x128xf32>
    %cst_84 = arith.constant 1.000000e+00 : f32
    %206 = vector.broadcast %cst_84 : f32 to vector<10x128xf32>
    %207 = arith.addf %206, %205 : vector<10x128xf32>
    %208 = arith.mulf %202, %207 : vector<10x128xf32>
    %c0_85 = arith.constant 0 : index
    %c0_86 = arith.constant 0 : index
    %c0_87 = arith.constant 0 : index
    %209 = vector.load %arg15[%c0_85, %c0_86, %c0_87] : memref<1x128x128xbf16, #tpu.memory_space<vmem>>, vector<1x128x128xbf16>
    %210 = vector.shape_cast %209 : vector<1x128x128xbf16> to vector<128x128xbf16>
    %211 = arith.truncf %208 : vector<10x128xf32> to vector<10x128xbf16>
    %cst_88 = arith.constant dense<0.000000e+00> : vector<10x128xf32>
    %212 = tpu.matmul %211, %210, %cst_88 {dimension_numbers = #tpu.dot_dimension_numbers<[1], [0], [0], [1], [0, 0, 1, 1], [], []>} : vector<10x128xbf16>, vector<128x128xbf16>, vector<10x128xf32> -> vector<10x128xf32>
    %213 = arith.addf %166, %212 : vector<10x128xf32>
    %c0_89 = arith.constant 0 : index
    %c0_90 = arith.constant 0 : index
    %c0_91 = arith.constant 0 : index
    %214 = vector.load %arg16[%c0_89, %c0_90, %c0_91] : memref<1x1x128xf32, #tpu.memory_space<vmem>>, vector<1x1x128xf32>
    %215 = vector.shape_cast %214 : vector<1x1x128xf32> to vector<1x128xf32>
    %216 = vector.broadcast %215 : vector<1x128xf32> to vector<10x128xf32>
    %217 = arith.addf %213, %216 : vector<10x128xf32>
    %c0_92 = arith.constant 0 : index
    %c0_93 = arith.constant 0 : index
    %218 = vector.load %arg27[%c0_92, %c0_93] : memref<10x128xf32, #tpu.memory_space<vmem>>, vector<10x128xf32>
    tpu.vector_store %arg27[%c0_92, %c0_93], %217 {strides = array<i32>} : memref<10x128xf32, #tpu.memory_space<vmem>>, vector<10x128xf32>,
    %c3_i32 = arith.constant 3 : i32
    %219 = arith.cmpi eq, %arg0, %c3_i32 : i32
    %220 = arith.extui %219 : i1 to i32
    %c0_i32_94 = arith.constant 0 : i32
    %221 = arith.cmpi ne, %220, %c0_i32_94 : i32
    scf.if %221 {
      %c0_95 = arith.constant 0 : index
      %c0_96 = arith.constant 0 : index
      %222 = vector.load %arg27[%c0_95, %c0_96] : memref<10x128xf32, #tpu.memory_space<vmem>>, vector<10x128xf32>
      %223 = tpu.iota {dimensions = array<i32: 0>} : vector<2x10xi32>
      %224 = tpu.iota {dimensions = array<i32: 1>} : vector<2x10xi32>
      %c5_i32 = arith.constant 5 : i32
      %225 = vector.broadcast %c5_i32 : i32 to vector<2x10xi32>
      %226 = arith.muli %223, %225 : vector<2x10xi32>
      %227 = arith.cmpi eq, %224, %226 : vector<2x10xi32>
      %228 = arith.extui %227 : vector<2x10xi1> to vector<2x10xi32>
      %229 = arith.sitofp %228 : vector<2x10xi32> to vector<2x10xf32>
      %cst_97 = arith.constant dense<0.000000e+00> : vector<2x128xf32>
      %230 = tpu.matmul %229, %222, %cst_97 {dimension_numbers = #tpu.dot_dimension_numbers<[1], [0], [0], [1], [0, 0, 1, 1], [], []>} : vector<2x10xf32>, vector<10x128xf32>, vector<2x128xf32> -> vector<2x128xf32>
      %c0_98 = arith.constant 0 : index
      %c0_99 = arith.constant 0 : index
      %231 = vector.load %arg17[%c0_98, %c0_99] : memref<128x3840xbf16, #tpu.memory_space<vmem>>, vector<128x3840xbf16>
      %232 = arith.truncf %230 : vector<2x128xf32> to vector<2x128xbf16>
      %cst_100 = arith.constant dense<0.000000e+00> : vector<2x3840xf32>
      %233 = tpu.matmul %232, %231, %cst_100 {dimension_numbers = #tpu.dot_dimension_numbers<[1], [0], [0], [1], [0, 0, 1, 1], [], []>} : vector<2x128xbf16>, vector<128x3840xbf16>, vector<2x3840xf32> -> vector<2x3840xf32>
      %c0_101 = arith.constant 0 : index
      %c0_102 = arith.constant 0 : index
      %234 = vector.load %arg18[%c0_101, %c0_102] : memref<1x3840xf32, #tpu.memory_space<vmem>>, vector<1x3840xf32>
      %235 = vector.broadcast %234 : vector<1x3840xf32> to vector<2x3840xf32>
      %236 = arith.addf %233, %235 : vector<2x3840xf32>
      %cst_103 = arith.constant 0.000000e+00 : f32
      %237 = vector.broadcast %cst_103 : f32 to vector<2x1xf32>
      %238 = vector.extract_strided_slice %236 {offsets = [0, 0], sizes = [2, 384], strides = [1, 1]} : vector<2x3840xf32> to vector<2x384xf32>
      %c0_104 = arith.constant 0 : index
      %c0_105 = arith.constant 0 : index
      %c0_106 = arith.constant 0 : index
      %239 = vector.load %arg2[%c0_104, %c0_105, %c0_106] : memref<10x2x384xf32, #tpu.memory_space<vmem>>, vector<1x2x384xf32>
      %240 = vector.shape_cast %239 : vector<1x2x384xf32> to vector<2x384xf32>
      %cst_107 = arith.constant dense<0.000000e+00> : vector<2x2xf32>
      %241 = tpu.matmul %240, %238, %cst_107 {dimension_numbers = #tpu.dot_dimension_numbers<[1], [1], [0], [0], [0, 0, 1, 0], [], []>} : vector<2x384xf32>, vector<2x384xf32>, vector<2x2xf32> -> vector<2x2xf32>
      %cst_108 = arith.constant dense<0xFF800000> : vector<2xf32>
      %242 = vector.multi_reduction <maximumf>, %241, %cst_108 [1] : vector<2x2xf32> to vector<2xf32>
      %243 = vector.shape_cast %242 : vector<2xf32> to vector<2x1xf32>
      %244 = vector.broadcast %243 : vector<2x1xf32> to vector<2x2xf32>
      %245 = arith.subf %241, %244 : vector<2x2xf32>
      %246 = math.exp %245 : vector<2x2xf32>
      %cst_109 = arith.constant dense<0.000000e+00> : vector<2xf32>
      %247 = vector.multi_reduction <add>, %246, %cst_109 [1] : vector<2x2xf32> to vector<2xf32>
      %248 = vector.shape_cast %247 : vector<2xf32> to vector<2x1xf32>
      %249 = math.log %248 : vector<2x1xf32>
      %250 = arith.addf %243, %249 : vector<2x1xf32>
      %251 = arith.mulf %240, %238 : vector<2x384xf32>
      %cst_110 = arith.constant dense<0.000000e+00> : vector<2xf32>
      %252 = vector.multi_reduction <add>, %251, %cst_110 [1] : vector<2x384xf32> to vector<2xf32>
      %253 = vector.shape_cast %252 : vector<2xf32> to vector<2x1xf32>
      %254 = arith.subf %253, %250 : vector<2x1xf32>
      %255 = arith.addf %237, %254 : vector<2x1xf32>
      %256 = vector.extract_strided_slice %236 {offsets = [0, 384], sizes = [2, 384], strides = [1, 1]} : vector<2x3840xf32> to vector<2x384xf32>
      %c1 = arith.constant 1 : index
      %c0_111 = arith.constant 0 : index
      %c0_112 = arith.constant 0 : index
      %257 = vector.load %arg2[%c1, %c0_111, %c0_112] : memref<10x2x384xf32, #tpu.memory_space<vmem>>, vector<1x2x384xf32>
      %258 = vector.shape_cast %257 : vector<1x2x384xf32> to vector<2x384xf32>
      %cst_113 = arith.constant dense<0.000000e+00> : vector<2x2xf32>
      %259 = tpu.matmul %258, %256, %cst_113 {dimension_numbers = #tpu.dot_dimension_numbers<[1], [1], [0], [0], [0, 0, 1, 0], [], []>} : vector<2x384xf32>, vector<2x384xf32>, vector<2x2xf32> -> vector<2x2xf32>
      %cst_114 = arith.constant dense<0xFF800000> : vector<2xf32>
      %260 = vector.multi_reduction <maximumf>, %259, %cst_114 [1] : vector<2x2xf32> to vector<2xf32>
      %261 = vector.shape_cast %260 : vector<2xf32> to vector<2x1xf32>
      %262 = vector.broadcast %261 : vector<2x1xf32> to vector<2x2xf32>
      %263 = arith.subf %259, %262 : vector<2x2xf32>
      %264 = math.exp %263 : vector<2x2xf32>
      %cst_115 = arith.constant dense<0.000000e+00> : vector<2xf32>
      %265 = vector.multi_reduction <add>, %264, %cst_115 [1] : vector<2x2xf32> to vector<2xf32>
      %266 = vector.shape_cast %265 : vector<2xf32> to vector<2x1xf32>
      %267 = math.log %266 : vector<2x1xf32>
      %268 = arith.addf %261, %267 : vector<2x1xf32>
      %269 = arith.mulf %258, %256 : vector<2x384xf32>
      %cst_116 = arith.constant dense<0.000000e+00> : vector<2xf32>
      %270 = vector.multi_reduction <add>, %269, %cst_116 [1] : vector<2x384xf32> to vector<2xf32>
      %271 = vector.shape_cast %270 : vector<2xf32> to vector<2x1xf32>
      %272 = arith.subf %271, %268 : vector<2x1xf32>
      %273 = arith.addf %255, %272 : vector<2x1xf32>
      %274 = vector.extract_strided_slice %236 {offsets = [0, 768], sizes = [2, 384], strides = [1, 1]} : vector<2x3840xf32> to vector<2x384xf32>
      %c2 = arith.constant 2 : index
      %c0_117 = arith.constant 0 : index
      %c0_118 = arith.constant 0 : index
      %275 = vector.load %arg2[%c2, %c0_117, %c0_118] : memref<10x2x384xf32, #tpu.memory_space<vmem>>, vector<1x2x384xf32>
      %276 = vector.shape_cast %275 : vector<1x2x384xf32> to vector<2x384xf32>
      %cst_119 = arith.constant dense<0.000000e+00> : vector<2x2xf32>
      %277 = tpu.matmul %276, %274, %cst_119 {dimension_numbers = #tpu.dot_dimension_numbers<[1], [1], [0], [0], [0, 0, 1, 0], [], []>} : vector<2x384xf32>, vector<2x384xf32>, vector<2x2xf32> -> vector<2x2xf32>
      %cst_120 = arith.constant dense<0xFF800000> : vector<2xf32>
      %278 = vector.multi_reduction <maximumf>, %277, %cst_120 [1] : vector<2x2xf32> to vector<2xf32>
      %279 = vector.shape_cast %278 : vector<2xf32> to vector<2x1xf32>
      %280 = vector.broadcast %279 : vector<2x1xf32> to vector<2x2xf32>
      %281 = arith.subf %277, %280 : vector<2x2xf32>
      %282 = math.exp %281 : vector<2x2xf32>
      %cst_121 = arith.constant dense<0.000000e+00> : vector<2xf32>
      %283 = vector.multi_reduction <add>, %282, %cst_121 [1] : vector<2x2xf32> to vector<2xf32>
      %284 = vector.shape_cast %283 : vector<2xf32> to vector<2x1xf32>
      %285 = math.log %284 : vector<2x1xf32>
      %286 = arith.addf %279, %285 : vector<2x1xf32>
      %287 = arith.mulf %276, %274 : vector<2x384xf32>
      %cst_122 = arith.constant dense<0.000000e+00> : vector<2xf32>
      %288 = vector.multi_reduction <add>, %287, %cst_122 [1] : vector<2x384xf32> to vector<2xf32>
      %289 = vector.shape_cast %288 : vector<2xf32> to vector<2x1xf32>
      %290 = arith.subf %289, %286 : vector<2x1xf32>
      %291 = arith.addf %273, %290 : vector<2x1xf32>
      %292 = vector.extract_strided_slice %236 {offsets = [0, 1152], sizes = [2, 384], strides = [1, 1]} : vector<2x3840xf32> to vector<2x384xf32>
      %c3 = arith.constant 3 : index
      %c0_123 = arith.constant 0 : index
      %c0_124 = arith.constant 0 : index
      %293 = vector.load %arg2[%c3, %c0_123, %c0_124] : memref<10x2x384xf32, #tpu.memory_space<vmem>>, vector<1x2x384xf32>
      %294 = vector.shape_cast %293 : vector<1x2x384xf32> to vector<2x384xf32>
      %cst_125 = arith.constant dense<0.000000e+00> : vector<2x2xf32>
      %295 = tpu.matmul %294, %292, %cst_125 {dimension_numbers = #tpu.dot_dimension_numbers<[1], [1], [0], [0], [0, 0, 1, 0], [], []>} : vector<2x384xf32>, vector<2x384xf32>, vector<2x2xf32> -> vector<2x2xf32>
      %cst_126 = arith.constant dense<0xFF800000> : vector<2xf32>
      %296 = vector.multi_reduction <maximumf>, %295, %cst_126 [1] : vector<2x2xf32> to vector<2xf32>
      %297 = vector.shape_cast %296 : vector<2xf32> to vector<2x1xf32>
      %298 = vector.broadcast %297 : vector<2x1xf32> to vector<2x2xf32>
      %299 = arith.subf %295, %298 : vector<2x2xf32>
      %300 = math.exp %299 : vector<2x2xf32>
      %cst_127 = arith.constant dense<0.000000e+00> : vector<2xf32>
      %301 = vector.multi_reduction <add>, %300, %cst_127 [1] : vector<2x2xf32> to vector<2xf32>
      %302 = vector.shape_cast %301 : vector<2xf32> to vector<2x1xf32>
      %303 = math.log %302 : vector<2x1xf32>
      %304 = arith.addf %297, %303 : vector<2x1xf32>
      %305 = arith.mulf %294, %292 : vector<2x384xf32>
      %cst_128 = arith.constant dense<0.000000e+00> : vector<2xf32>
      %306 = vector.multi_reduction <add>, %305, %cst_128 [1] : vector<2x384xf32> to vector<2xf32>
      %307 = vector.shape_cast %306 : vector<2xf32> to vector<2x1xf32>
      %308 = arith.subf %307, %304 : vector<2x1xf32>
      %309 = arith.addf %291, %308 : vector<2x1xf32>
      %310 = vector.extract_strided_slice %236 {offsets = [0, 1536], sizes = [2, 384], strides = [1, 1]} : vector<2x3840xf32> to vector<2x384xf32>
      %c4 = arith.constant 4 : index
      %c0_129 = arith.constant 0 : index
      %c0_130 = arith.constant 0 : index
      %311 = vector.load %arg2[%c4, %c0_129, %c0_130] : memref<10x2x384xf32, #tpu.memory_space<vmem>>, vector<1x2x384xf32>
      %312 = vector.shape_cast %311 : vector<1x2x384xf32> to vector<2x384xf32>
      %cst_131 = arith.constant dense<0.000000e+00> : vector<2x2xf32>
      %313 = tpu.matmul %312, %310, %cst_131 {dimension_numbers = #tpu.dot_dimension_numbers<[1], [1], [0], [0], [0, 0, 1, 0], [], []>} : vector<2x384xf32>, vector<2x384xf32>, vector<2x2xf32> -> vector<2x2xf32>
      %cst_132 = arith.constant dense<0xFF800000> : vector<2xf32>
      %314 = vector.multi_reduction <maximumf>, %313, %cst_132 [1] : vector<2x2xf32> to vector<2xf32>
      %315 = vector.shape_cast %314 : vector<2xf32> to vector<2x1xf32>
      %316 = vector.broadcast %315 : vector<2x1xf32> to vector<2x2xf32>
      %317 = arith.subf %313, %316 : vector<2x2xf32>
      %318 = math.exp %317 : vector<2x2xf32>
      %cst_133 = arith.constant dense<0.000000e+00> : vector<2xf32>
      %319 = vector.multi_reduction <add>, %318, %cst_133 [1] : vector<2x2xf32> to vector<2xf32>
      %320 = vector.shape_cast %319 : vector<2xf32> to vector<2x1xf32>
      %321 = math.log %320 : vector<2x1xf32>
      %322 = arith.addf %315, %321 : vector<2x1xf32>
      %323 = arith.mulf %312, %310 : vector<2x384xf32>
      %cst_134 = arith.constant dense<0.000000e+00> : vector<2xf32>
      %324 = vector.multi_reduction <add>, %323, %cst_134 [1] : vector<2x384xf32> to vector<2xf32>
      %325 = vector.shape_cast %324 : vector<2xf32> to vector<2x1xf32>
      %326 = arith.subf %325, %322 : vector<2x1xf32>
      %327 = arith.addf %309, %326 : vector<2x1xf32>
      %328 = vector.extract_strided_slice %236 {offsets = [0, 1920], sizes = [2, 384], strides = [1, 1]} : vector<2x3840xf32> to vector<2x384xf32>
      %c5 = arith.constant 5 : index
      %c0_135 = arith.constant 0 : index
      %c0_136 = arith.constant 0 : index
      %329 = vector.load %arg2[%c5, %c0_135, %c0_136] : memref<10x2x384xf32, #tpu.memory_space<vmem>>, vector<1x2x384xf32>
      %330 = vector.shape_cast %329 : vector<1x2x384xf32> to vector<2x384xf32>
      %cst_137 = arith.constant dense<0.000000e+00> : vector<2x2xf32>
      %331 = tpu.matmul %330, %328, %cst_137 {dimension_numbers = #tpu.dot_dimension_numbers<[1], [1], [0], [0], [0, 0, 1, 0], [], []>} : vector<2x384xf32>, vector<2x384xf32>, vector<2x2xf32> -> vector<2x2xf32>
      %cst_138 = arith.constant dense<0xFF800000> : vector<2xf32>
      %332 = vector.multi_reduction <maximumf>, %331, %cst_138 [1] : vector<2x2xf32> to vector<2xf32>
      %333 = vector.shape_cast %332 : vector<2xf32> to vector<2x1xf32>
      %334 = vector.broadcast %333 : vector<2x1xf32> to vector<2x2xf32>
      %335 = arith.subf %331, %334 : vector<2x2xf32>
      %336 = math.exp %335 : vector<2x2xf32>
      %cst_139 = arith.constant dense<0.000000e+00> : vector<2xf32>
      %337 = vector.multi_reduction <add>, %336, %cst_139 [1] : vector<2x2xf32> to vector<2xf32>
      %338 = vector.shape_cast %337 : vector<2xf32> to vector<2x1xf32>
      %339 = math.log %338 : vector<2x1xf32>
      %340 = arith.addf %333, %339 : vector<2x1xf32>
      %341 = arith.mulf %330, %328 : vector<2x384xf32>
      %cst_140 = arith.constant dense<0.000000e+00> : vector<2xf32>
      %342 = vector.multi_reduction <add>, %341, %cst_140 [1] : vector<2x384xf32> to vector<2xf32>
      %343 = vector.shape_cast %342 : vector<2xf32> to vector<2x1xf32>
      %344 = arith.subf %343, %340 : vector<2x1xf32>
      %345 = arith.addf %327, %344 : vector<2x1xf32>
      %346 = vector.extract_strided_slice %236 {offsets = [0, 2304], sizes = [2, 384], strides = [1, 1]} : vector<2x3840xf32> to vector<2x384xf32>
      %c6 = arith.constant 6 : index
      %c0_141 = arith.constant 0 : index
      %c0_142 = arith.constant 0 : index
      %347 = vector.load %arg2[%c6, %c0_141, %c0_142] : memref<10x2x384xf32, #tpu.memory_space<vmem>>, vector<1x2x384xf32>
      %348 = vector.shape_cast %347 : vector<1x2x384xf32> to vector<2x384xf32>
      %cst_143 = arith.constant dense<0.000000e+00> : vector<2x2xf32>
      %349 = tpu.matmul %348, %346, %cst_143 {dimension_numbers = #tpu.dot_dimension_numbers<[1], [1], [0], [0], [0, 0, 1, 0], [], []>} : vector<2x384xf32>, vector<2x384xf32>, vector<2x2xf32> -> vector<2x2xf32>
      %cst_144 = arith.constant dense<0xFF800000> : vector<2xf32>
      %350 = vector.multi_reduction <maximumf>, %349, %cst_144 [1] : vector<2x2xf32> to vector<2xf32>
      %351 = vector.shape_cast %350 : vector<2xf32> to vector<2x1xf32>
      %352 = vector.broadcast %351 : vector<2x1xf32> to vector<2x2xf32>
      %353 = arith.subf %349, %352 : vector<2x2xf32>
      %354 = math.exp %353 : vector<2x2xf32>
      %cst_145 = arith.constant dense<0.000000e+00> : vector<2xf32>
      %355 = vector.multi_reduction <add>, %354, %cst_145 [1] : vector<2x2xf32> to vector<2xf32>
      %356 = vector.shape_cast %355 : vector<2xf32> to vector<2x1xf32>
      %357 = math.log %356 : vector<2x1xf32>
      %358 = arith.addf %351, %357 : vector<2x1xf32>
      %359 = arith.mulf %348, %346 : vector<2x384xf32>
      %cst_146 = arith.constant dense<0.000000e+00> : vector<2xf32>
      %360 = vector.multi_reduction <add>, %359, %cst_146 [1] : vector<2x384xf32> to vector<2xf32>
      %361 = vector.shape_cast %360 : vector<2xf32> to vector<2x1xf32>
      %362 = arith.subf %361, %358 : vector<2x1xf32>
      %363 = arith.addf %345, %362 : vector<2x1xf32>
      %364 = vector.extract_strided_slice %236 {offsets = [0, 2688], sizes = [2, 384], strides = [1, 1]} : vector<2x3840xf32> to vector<2x384xf32>
      %c7 = arith.constant 7 : index
      %c0_147 = arith.constant 0 : index
      %c0_148 = arith.constant 0 : index
      %365 = vector.load %arg2[%c7, %c0_147, %c0_148] : memref<10x2x384xf32, #tpu.memory_space<vmem>>, vector<1x2x384xf32>
      %366 = vector.shape_cast %365 : vector<1x2x384xf32> to vector<2x384xf32>
      %cst_149 = arith.constant dense<0.000000e+00> : vector<2x2xf32>
      %367 = tpu.matmul %366, %364, %cst_149 {dimension_numbers = #tpu.dot_dimension_numbers<[1], [1], [0], [0], [0, 0, 1, 0], [], []>} : vector<2x384xf32>, vector<2x384xf32>, vector<2x2xf32> -> vector<2x2xf32>
      %cst_150 = arith.constant dense<0xFF800000> : vector<2xf32>
      %368 = vector.multi_reduction <maximumf>, %367, %cst_150 [1] : vector<2x2xf32> to vector<2xf32>
      %369 = vector.shape_cast %368 : vector<2xf32> to vector<2x1xf32>
      %370 = vector.broadcast %369 : vector<2x1xf32> to vector<2x2xf32>
      %371 = arith.subf %367, %370 : vector<2x2xf32>
      %372 = math.exp %371 : vector<2x2xf32>
      %cst_151 = arith.constant dense<0.000000e+00> : vector<2xf32>
      %373 = vector.multi_reduction <add>, %372, %cst_151 [1] : vector<2x2xf32> to vector<2xf32>
      %374 = vector.shape_cast %373 : vector<2xf32> to vector<2x1xf32>
      %375 = math.log %374 : vector<2x1xf32>
      %376 = arith.addf %369, %375 : vector<2x1xf32>
      %377 = arith.mulf %366, %364 : vector<2x384xf32>
      %cst_152 = arith.constant dense<0.000000e+00> : vector<2xf32>
      %378 = vector.multi_reduction <add>, %377, %cst_152 [1] : vector<2x384xf32> to vector<2xf32>
      %379 = vector.shape_cast %378 : vector<2xf32> to vector<2x1xf32>
      %380 = arith.subf %379, %376 : vector<2x1xf32>
      %381 = arith.addf %363, %380 : vector<2x1xf32>
      %382 = vector.extract_strided_slice %236 {offsets = [0, 3072], sizes = [2, 384], strides = [1, 1]} : vector<2x3840xf32> to vector<2x384xf32>
      %c8 = arith.constant 8 : index
      %c0_153 = arith.constant 0 : index
      %c0_154 = arith.constant 0 : index
      %383 = vector.load %arg2[%c8, %c0_153, %c0_154] : memref<10x2x384xf32, #tpu.memory_space<vmem>>, vector<1x2x384xf32>
      %384 = vector.shape_cast %383 : vector<1x2x384xf32> to vector<2x384xf32>
      %cst_155 = arith.constant dense<0.000000e+00> : vector<2x2xf32>
      %385 = tpu.matmul %384, %382, %cst_155 {dimension_numbers = #tpu.dot_dimension_numbers<[1], [1], [0], [0], [0, 0, 1, 0], [], []>} : vector<2x384xf32>, vector<2x384xf32>, vector<2x2xf32> -> vector<2x2xf32>
      %cst_156 = arith.constant dense<0xFF800000> : vector<2xf32>
      %386 = vector.multi_reduction <maximumf>, %385, %cst_156 [1] : vector<2x2xf32> to vector<2xf32>
      %387 = vector.shape_cast %386 : vector<2xf32> to vector<2x1xf32>
      %388 = vector.broadcast %387 : vector<2x1xf32> to vector<2x2xf32>
      %389 = arith.subf %385, %388 : vector<2x2xf32>
      %390 = math.exp %389 : vector<2x2xf32>
      %cst_157 = arith.constant dense<0.000000e+00> : vector<2xf32>
      %391 = vector.multi_reduction <add>, %390, %cst_157 [1] : vector<2x2xf32> to vector<2xf32>
      %392 = vector.shape_cast %391 : vector<2xf32> to vector<2x1xf32>
      %393 = math.log %392 : vector<2x1xf32>
      %394 = arith.addf %387, %393 : vector<2x1xf32>
      %395 = arith.mulf %384, %382 : vector<2x384xf32>
      %cst_158 = arith.constant dense<0.000000e+00> : vector<2xf32>
      %396 = vector.multi_reduction <add>, %395, %cst_158 [1] : vector<2x384xf32> to vector<2xf32>
      %397 = vector.shape_cast %396 : vector<2xf32> to vector<2x1xf32>
      %398 = arith.subf %397, %394 : vector<2x1xf32>
      %399 = arith.addf %381, %398 : vector<2x1xf32>
      %400 = vector.extract_strided_slice %236 {offsets = [0, 3456], sizes = [2, 384], strides = [1, 1]} : vector<2x3840xf32> to vector<2x384xf32>
      %c9 = arith.constant 9 : index
      %c0_159 = arith.constant 0 : index
      %c0_160 = arith.constant 0 : index
      %401 = vector.load %arg2[%c9, %c0_159, %c0_160] : memref<10x2x384xf32, #tpu.memory_space<vmem>>, vector<1x2x384xf32>
      %402 = vector.shape_cast %401 : vector<1x2x384xf32> to vector<2x384xf32>
      %cst_161 = arith.constant dense<0.000000e+00> : vector<2x2xf32>
      %403 = tpu.matmul %402, %400, %cst_161 {dimension_numbers = #tpu.dot_dimension_numbers<[1], [1], [0], [0], [0, 0, 1, 0], [], []>} : vector<2x384xf32>, vector<2x384xf32>, vector<2x2xf32> -> vector<2x2xf32>
      %cst_162 = arith.constant dense<0xFF800000> : vector<2xf32>
      %404 = vector.multi_reduction <maximumf>, %403, %cst_162 [1] : vector<2x2xf32> to vector<2xf32>
      %405 = vector.shape_cast %404 : vector<2xf32> to vector<2x1xf32>
      %406 = vector.broadcast %405 : vector<2x1xf32> to vector<2x2xf32>
      %407 = arith.subf %403, %406 : vector<2x2xf32>
      %408 = math.exp %407 : vector<2x2xf32>
      %cst_163 = arith.constant dense<0.000000e+00> : vector<2xf32>
      %409 = vector.multi_reduction <add>, %408, %cst_163 [1] : vector<2x2xf32> to vector<2xf32>
      %410 = vector.shape_cast %409 : vector<2xf32> to vector<2x1xf32>
      %411 = math.log %410 : vector<2x1xf32>
      %412 = arith.addf %405, %411 : vector<2x1xf32>
      %413 = arith.mulf %402, %400 : vector<2x384xf32>
      %cst_164 = arith.constant dense<0.000000e+00> : vector<2xf32>
      %414 = vector.multi_reduction <add>, %413, %cst_164 [1] : vector<2x384xf32> to vector<2xf32>
      %415 = vector.shape_cast %414 : vector<2xf32> to vector<2x1xf32>
      %416 = arith.subf %415, %412 : vector<2x1xf32>
      %417 = arith.addf %399, %416 : vector<2x1xf32>
      %cst_165 = arith.constant dense<0.000000e+00> : vector<1xf32>
      %418 = vector.multi_reduction <add>, %417, %cst_165 [0] : vector<2x1xf32> to vector<1xf32>
      %419 = vector.shape_cast %418 : vector<1xf32> to vector<1x1xf32>
      %cst_166 = arith.constant -5.000000e-02 : f32
      %420 = vector.broadcast %cst_166 : f32 to vector<1x1xf32>
      %421 = arith.mulf %419, %420 : vector<1x1xf32>
      %422 = vector.shape_cast %421 : vector<1x1xf32> to vector<1x1xf32>
      %423 = vector.broadcast %422 : vector<1x1xf32> to vector<1x128xf32>
      %c0_167 = arith.constant 0 : index
      %c0_168 = arith.constant 0 : index
      %424 = vector.load %arg25[%c0_167, %c0_168] : memref<1x128xf32, #tpu.memory_space<vmem>>, vector<1x128xf32>
      tpu.vector_store %arg25[%c0_167, %c0_168], %423 {strides = array<i32>} : memref<1x128xf32, #tpu.memory_space<vmem>>, vector<1x128xf32>,
      %c0_169 = arith.constant 0 : index
      %c0_170 = arith.constant 0 : index
      %425 = vector.load %arg19[%c0_169, %c0_170] : memref<128x256xbf16, #tpu.memory_space<vmem>>, vector<128x256xbf16>
      %426 = arith.truncf %230 : vector<2x128xf32> to vector<2x128xbf16>
      %cst_171 = arith.constant dense<0.000000e+00> : vector<2x256xf32>
      %427 = tpu.matmul %426, %425, %cst_171 {dimension_numbers = #tpu.dot_dimension_numbers<[1], [0], [0], [1], [0, 0, 1, 1], [], []>} : vector<2x128xbf16>, vector<128x256xbf16>, vector<2x256xf32> -> vector<2x256xf32>
      %c0_172 = arith.constant 0 : index
      %c0_173 = arith.constant 0 : index
      %428 = vector.load %arg20[%c0_172, %c0_173] : memref<1x256xf32, #tpu.memory_space<vmem>>, vector<1x256xf32>
      %429 = vector.broadcast %428 : vector<1x256xf32> to vector<2x256xf32>
      %430 = arith.addf %427, %429 : vector<2x256xf32>
      %cst_174 = arith.constant dense<0.000000e+00> : vector<256xf32>
      %431 = vector.multi_reduction <add>, %430, %cst_174 [0] : vector<2x256xf32> to vector<256xf32>
      %432 = vector.shape_cast %431 : vector<256xf32> to vector<1x256xf32>
      %cst_175 = arith.constant 2.000000e+00 : f32
      %433 = vector.broadcast %cst_175 : f32 to vector<1x256xf32>
      %434 = arith.divf %432, %433 : vector<1x256xf32>
      %435 = vector.broadcast %434 : vector<1x256xf32> to vector<2x256xf32>
      %436 = arith.subf %430, %435 : vector<2x256xf32>
      %437 = arith.mulf %436, %436 : vector<2x256xf32>
      %cst_176 = arith.constant dense<0.000000e+00> : vector<256xf32>
      %438 = vector.multi_reduction <add>, %437, %cst_176 [0] : vector<2x256xf32> to vector<256xf32>
      %439 = vector.shape_cast %438 : vector<256xf32> to vector<1x256xf32>
      %cst_177 = arith.constant 2.000000e+00 : f32
      %440 = vector.broadcast %cst_177 : f32 to vector<1x256xf32>
      %441 = arith.divf %439, %440 : vector<1x256xf32>
      %442 = vector.broadcast %434 : vector<1x256xf32> to vector<2x256xf32>
      %443 = arith.subf %430, %442 : vector<2x256xf32>
      %cst_178 = arith.constant 9.99999974E-6 : f32
      %444 = vector.broadcast %cst_178 : f32 to vector<1x256xf32>
      %445 = arith.addf %441, %444 : vector<1x256xf32>
      %446 = math.rsqrt %445 : vector<1x256xf32>
      %447 = vector.broadcast %446 : vector<1x256xf32> to vector<2x256xf32>
      %448 = arith.mulf %443, %447 : vector<2x256xf32>
      %c0_179 = arith.constant 0 : index
      %c0_180 = arith.constant 0 : index
      %449 = vector.load %arg21[%c0_179, %c0_180] : memref<1x256xf32, #tpu.memory_space<vmem>>, vector<1x256xf32>
      %450 = vector.broadcast %449 : vector<1x256xf32> to vector<2x256xf32>
      %451 = arith.mulf %448, %450 : vector<2x256xf32>
      %c0_181 = arith.constant 0 : index
      %c0_182 = arith.constant 0 : index
      %452 = vector.load %arg22[%c0_181, %c0_182] : memref<1x256xf32, #tpu.memory_space<vmem>>, vector<1x256xf32>
      %453 = vector.broadcast %452 : vector<1x256xf32> to vector<2x256xf32>
      %454 = arith.addf %451, %453 : vector<2x256xf32>
      %cst_183 = arith.constant 0.000000e+00 : f32
      %455 = vector.broadcast %cst_183 : f32 to vector<2x256xf32>
      %456 = arith.maximumf %454, %455 : vector<2x256xf32>
      %c0_184 = arith.constant 0 : index
      %c0_185 = arith.constant 0 : index
      %457 = vector.load %arg23[%c0_184, %c0_185] : memref<256x128xbf16, #tpu.memory_space<vmem>>, vector<256x128xbf16>
      %458 = arith.truncf %456 : vector<2x256xf32> to vector<2x256xbf16>
      %cst_186 = arith.constant dense<0.000000e+00> : vector<2x128xf32>
      %459 = tpu.matmul %458, %457, %cst_186 {dimension_numbers = #tpu.dot_dimension_numbers<[1], [0], [0], [1], [0, 0, 1, 1], [], []>} : vector<2x256xbf16>, vector<256x128xbf16>, vector<2x128xf32> -> vector<2x128xf32>
      %c0_187 = arith.constant 0 : index
      %c0_188 = arith.constant 0 : index
      %460 = vector.load %arg24[%c0_187, %c0_188] : memref<1x128xf32, #tpu.memory_space<vmem>>, vector<1x128xf32>
      %461 = vector.broadcast %460 : vector<1x128xf32> to vector<2x128xf32>
      %462 = arith.addf %459, %461 : vector<2x128xf32>
      %c0_189 = arith.constant 0 : index
      %c0_190 = arith.constant 0 : index
      %463 = vector.load %arg26[%c0_189, %c0_190] : memref<2x128xf32, #tpu.memory_space<vmem>>, vector<2x128xf32>
      tpu.vector_store %arg26[%c0_189, %c0_190], %462 {strides = array<i32>} : memref<2x128xf32, #tpu.memory_space<vmem>>, vector<2x128xf32>,
    } else {
    }
    return
  }
  func.func @transform_0(%arg0: i32) -> (i32, i32) {
    %c0_i32 = arith.constant 0 : i32
    %c0_i32_0 = arith.constant 0 : i32
    %c0_i32_1 = arith.constant 0 : i32
    return %c0_i32, %c0_i32_0 : i32, i32
  }
  func.func @transform_1(%arg0: i32) -> (i32, i32, i32) {
    %c0_i32 = arith.constant 0 : i32
    %c0_i32_0 = arith.constant 0 : i32
    %c0_i32_1 = arith.constant 0 : i32
    %c0_i32_2 = arith.constant 0 : i32
    return %c0_i32, %c0_i32_0, %c0_i32_1 : i32, i32, i32
  }
  func.func @transform_2(%arg0: i32) -> (i32, i32) {
    %c0_i32 = arith.constant 0 : i32
    %c0_i32_0 = arith.constant 0 : i32
    %c0_i32_1 = arith.constant 0 : i32
    return %c0_i32, %c0_i32_0 : i32, i32
  }
  func.func @transform_3(%arg0: i32) -> (i32, i32) {
    %c0_i32 = arith.constant 0 : i32
    %c0_i32_0 = arith.constant 0 : i32
    %c0_i32_1 = arith.constant 0 : i32
    return %c0_i32, %c0_i32_0 : i32, i32
  }
  func.func @transform_4(%arg0: i32) -> (i32, i32) {
    %c0_i32 = arith.constant 0 : i32
    %c0_i32_0 = arith.constant 0 : i32
    %c0_i32_1 = arith.constant 0 : i32
    return %c0_i32, %c0_i32_0 : i32, i32
  }
  func.func @transform_5(%arg0: i32) -> (i32, i32, i32) {
    %c0_i32 = arith.constant 0 : i32
    %c0_i32_0 = arith.constant 0 : i32
    %c0_i32_1 = arith.constant 0 : i32
    return %arg0, %c0_i32, %c0_i32_0 : i32, i32, i32
  }
  func.func @transform_6(%arg0: i32) -> (i32, i32, i32) {
    %c0_i32 = arith.constant 0 : i32
    %c0_i32_0 = arith.constant 0 : i32
    %c0_i32_1 = arith.constant 0 : i32
    return %arg0, %c0_i32, %c0_i32_0 : i32, i32, i32
  }
  func.func @transform_7(%arg0: i32) -> (i32, i32, i32) {
    %c0_i32 = arith.constant 0 : i32
    %c0_i32_0 = arith.constant 0 : i32
    %c0_i32_1 = arith.constant 0 : i32
    return %arg0, %c0_i32, %c0_i32_0 : i32, i32, i32
  }
  func.func @transform_8(%arg0: i32) -> (i32, i32, i32) {
    %c0_i32 = arith.constant 0 : i32
    %c0_i32_0 = arith.constant 0 : i32
    %c0_i32_1 = arith.constant 0 : i32
    return %arg0, %c0_i32, %c0_i32_0 : i32, i32, i32
  }
  func.func @transform_9(%arg0: i32) -> (i32, i32, i32) {
    %c0_i32 = arith.constant 0 : i32
    %c0_i32_0 = arith.constant 0 : i32
    %c0_i32_1 = arith.constant 0 : i32
    return %arg0, %c0_i32, %c0_i32_0 : i32, i32, i32
  }
  func.func @transform_10(%arg0: i32) -> (i32, i32, i32) {
    %c0_i32 = arith.constant 0 : i32
    %c0_i32_0 = arith.constant 0 : i32
    %c0_i32_1 = arith.constant 0 : i32
    return %arg0, %c0_i32, %c0_i32_0 : i32, i32, i32
  }
  func.func @transform_11(%arg0: i32) -> (i32, i32, i32) {
    %c0_i32 = arith.constant 0 : i32
    %c0_i32_0 = arith.constant 0 : i32
    %c0_i32_1 = arith.constant 0 : i32
    return %arg0, %c0_i32, %c0_i32_0 : i32, i32, i32
  }
  func.func @transform_12(%arg0: i32) -> (i32, i32, i32) {
    %c0_i32 = arith.constant 0 : i32
    %c0_i32_0 = arith.constant 0 : i32
    %c0_i32_1 = arith.constant 0 : i32
    return %arg0, %c0_i32, %c0_i32_0 : i32, i32, i32
  }
  func.func @transform_13(%arg0: i32) -> (i32, i32, i32) {
    %c0_i32 = arith.constant 0 : i32
    %c0_i32_0 = arith.constant 0 : i32
    %c0_i32_1 = arith.constant 0 : i32
    return %arg0, %c0_i32, %c0_i32_0 : i32, i32, i32
  }
  func.func @transform_14(%arg0: i32) -> (i32, i32, i32) {
    %c0_i32 = arith.constant 0 : i32
    %c0_i32_0 = arith.constant 0 : i32
    %c0_i32_1 = arith.constant 0 : i32
    return %arg0, %c0_i32, %c0_i32_0 : i32, i32, i32
  }
  func.func @transform_15(%arg0: i32) -> (i32, i32, i32) {
    %c0_i32 = arith.constant 0 : i32
    %c0_i32_0 = arith.constant 0 : i32
    %c0_i32_1 = arith.constant 0 : i32
    return %arg0, %c0_i32, %c0_i32_0 : i32, i32, i32
  }
  func.func @transform_16(%arg0: i32) -> (i32, i32) {
    %c0_i32 = arith.constant 0 : i32
    %c0_i32_0 = arith.constant 0 : i32
    %c0_i32_1 = arith.constant 0 : i32
    return %c0_i32, %c0_i32_0 : i32, i32
  }
  func.func @transform_17(%arg0: i32) -> (i32, i32) {
    %c0_i32 = arith.constant 0 : i32
    %c0_i32_0 = arith.constant 0 : i32
    %c0_i32_1 = arith.constant 0 : i32
    return %c0_i32, %c0_i32_0 : i32, i32
  }
  func.func @transform_18(%arg0: i32) -> (i32, i32) {
    %c0_i32 = arith.constant 0 : i32
    %c0_i32_0 = arith.constant 0 : i32
    %c0_i32_1 = arith.constant 0 : i32
    return %c0_i32, %c0_i32_0 : i32, i32
  }
  func.func @transform_19(%arg0: i32) -> (i32, i32) {
    %c0_i32 = arith.constant 0 : i32
    %c0_i32_0 = arith.constant 0 : i32
    %c0_i32_1 = arith.constant 0 : i32
    return %c0_i32, %c0_i32_0 : i32, i32
  }
  func.func @transform_20(%arg0: i32) -> (i32, i32) {
    %c0_i32 = arith.constant 0 : i32
    %c0_i32_0 = arith.constant 0 : i32
    %c0_i32_1 = arith.constant 0 : i32
    return %c0_i32, %c0_i32_0 : i32, i32
  }
  func.func @transform_21(%arg0: i32) -> (i32, i32) {
    %c0_i32 = arith.constant 0 : i32
    %c0_i32_0 = arith.constant 0 : i32
    %c0_i32_1 = arith.constant 0 : i32
    return %c0_i32, %c0_i32_0 : i32, i32
  }
  func.func @transform_22(%arg0: i32) -> (i32, i32) {
    %c0_i32 = arith.constant 0 : i32
    %c0_i32_0 = arith.constant 0 : i32
    %c0_i32_1 = arith.constant 0 : i32
    return %c0_i32, %c0_i32_0 : i32, i32
  }
  func.func @transform_23(%arg0: i32) -> (i32, i32) {
    %c0_i32 = arith.constant 0 : i32
    %c0_i32_0 = arith.constant 0 : i32
    %c0_i32_1 = arith.constant 0 : i32
    return %c0_i32, %c0_i32_0 : i32, i32
  }
  func.func @transform_24(%arg0: i32) -> (i32, i32) {
    %c0_i32 = arith.constant 0 : i32
    %c0_i32_0 = arith.constant 0 : i32
    %c0_i32_1 = arith.constant 0 : i32
    return %c0_i32, %c0_i32_0 : i32, i32
  }
  func.func @transform_25(%arg0: i32) -> (i32, i32) {
    %c0_i32 = arith.constant 0 : i32
    %c0_i32_0 = arith.constant 0 : i32
    %c0_i32_1 = arith.constant 0 : i32
    return %c0_i32, %c0_i32_0 : i32, i32
  }
}

</mosaic_0001>

<bundles_post_ra>
// kernel: tpu_custom_call.1
= control target key start
LH: loop header
LB: loop body
LE: loop exit
PB: predicated region body
PF: predicated region fallthrough
CT: control target
= control target key end

     0   :  { %s12039_s0 = inlined_call_operand.hbm [shape: f32[10,320], index: 0, kind: input, shape index: {}]   ;;  %s12040_s1 = inlined_call_operand.hbm [shape: f32[10,2,384], index: 1, kind: input, shape index: {}]   ;;  %s12041_s2 = inlined_call_operand.hbm [shape: bf16[320,128], index: 2, kind: input, shape index: {}]   ;;  %s12042_s3 = inlined_call_operand.hbm [shape: f32[1,128], index: 3, kind: input, shape index: {}]   ;;  %s12043_s4 = inlined_call_operand.hbm [shape: f32[1,128], index: 4, kind: input, shape index: {}]   ;;  %s12044_s5 = inlined_call_operand.hbm [shape: f32[4,1,128], index: 5, kind: input, shape index: {}]   ;;  %s12045_s6 = inlined_call_operand.hbm [shape: f32[4,1,128], index: 6, kind: input, shape index: {}]   ;;  %s12046_s7 = inlined_call_operand.hbm [shape: bf16[4,128,384], index: 7, kind: input, shape index: {}]   ;;  %s12047_s8 = inlined_call_operand.hbm [shape: bf16[4,128,128], index: 8, kind: input, shape index: {}]   ;;  %s12048_s9 = inlined_call_operand.hbm [shape: f32[4,1,128], index: 9, kind: input, shape index: {}]   ;;  %s12049_s10 = inlined_call_operand.hbm [shape: f32[4,1,128], index: 10, kind: input, shape index: {}]   ;;  %s12050_s11 = inlined_call_operand.hbm [shape: f32[4,1,128], index: 11, kind: input, shape index: {}]   ;;  %s12051_s12 = inlined_call_operand.hbm [shape: bf16[4,128,128], index: 12, kind: input, shape index: {}]   ;;  %s12052_s13 = inlined_call_operand.hbm [shape: f32[4,1,128], index: 13, kind: input, shape index: {}]   ;;  %s12053_s14 = inlined_call_operand.hbm [shape: bf16[4,128,128], index: 14, kind: input, shape index: {}]   ;;  %s12054_s15 = inlined_call_operand.hbm [shape: f32[4,1,128], index: 15, kind: input, shape index: {}]   ;;  %s12055_s16 = inlined_call_operand.hbm [shape: bf16[128,3840], index: 16, kind: input, shape index: {}]   ;;  %s12056_s17 = inlined_call_operand.vmem [shape: f32[1,3840], index: 17, kind: input, shape index: {}]   ;;  %s12057_s18 = inlined_call_operand.hbm [shape: bf16[128,256], index: 18, kind: input, shape index: {}]   ;;  %s12058_s19 = inlined_call_operand.vmem [shape: f32[1,256], index: 19, kind: input, shape index: {}]   ;;  %s12059_s20 = inlined_call_operand.vmem [shape: f32[1,256], index: 20, kind: input, shape index: {}]   ;;  %s12060_s21 = inlined_call_operand.vmem [shape: f32[1,256], index: 21, kind: input, shape index: {}]   ;;  %s12061_s22 = inlined_call_operand.hbm [shape: bf16[256,128], index: 22, kind: input, shape index: {}]   ;;  %s12062_s23 = inlined_call_operand.vmem [shape: f32[1,128], index: 23, kind: input, shape index: {}]   ;;  %s12063_s24 = inlined_call_operand.hbm [shape: f32[1,128], index: 24, kind: output, shape index: {0}]   ;;  %s12064_s25 = inlined_call_operand.hbm [shape: f32[2,128], index: 25, kind: output, shape index: {1}]  }
   0x1   :  { %12102 = sst [smem:[#allocation56_spill]] %s12039_s0 }
   0x2   :  { %12103 = sst [smem:[#allocation57_spill]] %s12040_s1 }
   0x3   :  { %12104 = sst [smem:[#allocation58_spill]] %s12041_s2 }
   0x4   :  { %12105 = sst [smem:[#allocation59_spill]] %s12042_s3 }
   0x5   :  { %12106 = sst [smem:[#allocation60_spill]] %s12043_s4 }
   0x6   :  { %12107 = sst [smem:[#allocation61_spill]] %s12044_s5 }
   0x7   :  { %12108 = sst [smem:[#allocation62_spill]] %s12045_s6 }
   0x8   :  { %12109 = sst [smem:[#allocation63_spill]] %s12046_s7 }
   0x9   :  { %12110 = sst [smem:[#allocation64_spill]] %s12047_s8 }
   0xa   :  { %12111 = sst [smem:[#allocation65_spill]] %s12048_s9 }
   0xb   :  { %12112 = sst [smem:[#allocation66_spill]] %s12055_s16 }
   0xc   :  { %12113 = sst [smem:[#allocation67_spill]] %s12056_s17 }
   0xd   :  { %12114 = sst [smem:[#allocation68_spill]] %s12057_s18 }
   0xe   :  { %12115 = sst [smem:[#allocation69_spill]] %s12058_s19 }
   0xf   :  { %12116 = sst [smem:[#allocation70_spill]] %s12059_s20 }
  0x10   :  { %12117 = sst [smem:[#allocation71_spill]] %s12060_s21 }
  0x11   :  { %12118 = sst [smem:[#allocation72_spill]] %s12062_s23 }
  0x12   :  { %12119 = sst [smem:[#allocation73_spill]] %s12063_s24 }
  0x13   :  { %12120 = sst [smem:[#allocation74_spill]] %s12064_s25 }
  0x14   :  { %31 = vsyncpa [#allocation4], 0 }
  0x15   :  { %32 = vsyncpa [#allocation7], 0 }
  0x16   :  { %33 = vsyncpa [#allocation10], 0 }
  0x17   :  { %34 = vsyncpa [#allocation13], 0 }
  0x18   :  { %36 = vsyncpa [#allocation13 + $0x1], 0 }
  0x19   :  { %37 = vsyncpa [#allocation16], 0 }
  0x1a   :  { %39 = vsyncpa [#allocation16 + $0x1], 0 }
  0x1b   :  { %40 = vsyncpa [#allocation19], 0 }
  0x1c   :  { %42 = vsyncpa [#allocation19 + $0x1], 0 }
  0x1d   :  { %43 = vsyncpa [#allocation22], 0 }
  0x1e   :  { %45 = vsyncpa [#allocation22 + $0x1], 0 }
  0x1f   :  { %46 = vsyncpa [#allocation25], 0 }
  0x20   :  { %48 = vsyncpa [#allocation25 + $0x1], 0 }
  0x21   :  { %49 = vsyncpa [#allocation28], 0 }
  0x22   :  { %51 = vsyncpa [#allocation28 + $0x1], 0 }
  0x23   :  { %52 = vsyncpa [#allocation31], 0 }
  0x24   :  { %53 = vsyncpa [#allocation5], 0 }
  0x25   :  { %54 = vsyncpa [#allocation35], 0  ;;  %s10682_s29 = smov 0   ;;  %s10684_s2 = smov 0  }
  0x26   :  { %s10686_s6 = smov 0   ;;  %s10688_s30 = smov 0  }
  0x27 LB: > { %12121 = sst [smem:[#allocation49_spill]] %s10500_s2  ;;  %s10510_s7 = smov [#allocation6]   ;;  %s10508_s30 = sphi %s10688_s30, %s12196_s30   ;;  %s10504_s6 = sphi %s10686_s6, %s12199_s6   ;;  %s10500_s2 = sphi %s10684_s2, %s12198_s2   ;;  %s10496_s29 = sphi %s10682_s29, %s12197_s29  }
  0x28   : > { %12122 = sst [smem:[#allocation50_spill]] %s10504_s6  ;;  %s691_s3 = sshll.u32 %s10510_s7, 4  ;;  %s692_s3 = int_to_ptr.vmem [resolvable:$true] %s691_s3 }
  0x29   : > { %s10703_s26 = sadd.s32 4294967295, %s10508_s30   ;;  %p8306_p0 = scmp.ge.s32.totalorder %s10508_s30, 1 }
  0x2a   : > { %12123 = sst [smem:[#allocation51_spill]] %s10703_s26  ;;  %p12074_p1 = scmp.eq.s32.totalorder %s10703_s26, 0 }
  0x2b   : > { %p666_p2 = scmp.lt.s32.totalorder %s10508_s30, 5  ;;  %s10511_s8 = smov [#allocation9]  }
  0x2c   : > { %s718_s27 = sshll.u32 %s10511_s8, 4  ;;  %s10512_s28 = smov [#allocation29]   ;;  %s719_s27 = int_to_ptr.vmem [resolvable:$true] %s718_s27 }
  0x2d   : > { %p10709_p4 = pnand %p8306_p0, %p666_p2  ;;  %s739_s9 = sshll.u32 %s10512_s28, 4  ;;  %s10721_s9 = int_to_ptr.vmem [resolvable:$true] %s739_s9 }
  0x2e   : > { %s9873_s0 = scalar_lea.vmem %s692_s3, 960  ;;  %p9881_p11 = scmp.lt.s32.totalorder %s692_s3, %s692_s3 }
  0x2f   : > { %s12124_s1 = scalar_select %p10709_p4, 1, 0 }
  0x30   : > { %p9140_p5 = pneg %p10709_p4  ;;  %p9874_p8 = scmp.ne.s32.totalorder %s692_s3, %s9873_s0 }
  0x31   : > { %12125 = sst [smem:[#allocation52_spill]] %s12124_s1  ;;  %p9882_p12 = scmp.lt.s32.totalorder %s9873_s0, %s9873_s0 }
  0x32   : > { %p10717_p6 = pnand %p9140_p5, %p12074_p1 }
  0x33   : > { %p9883_p13 = por %p9882_p12, %p9881_p11 }
  0x34   : > { %s12126_s4 = scalar_select %p10717_p6, 1, 0 }
  0x35   : > { %p10725_p7 = pneg %p10717_p6 }
  0x37   : > { %s12127_s5 = scalar_select %p10725_p7, 1, 0 }
  0x38   : > { %p9876_p9 = pnand %p9874_p8, %p10725_p7 }
  0x3a   : > { %p9877_p10 = pneg %p9876_p9 }
  0x3c   : > { %p9884_p0 = pnand %p9883_p13, %p9877_p10 }
  0x3e   : > { %9887 = shalt.err (!%p9884_p0)
}
  0x3f   : > { %s10513_s7 = smov 96   ;;  %s10514_s8 = smov 6  }
  0x40   : > { %s12128_s24 = sld [smem:[#allocation57_spill]]  ;;  %s9899_s23 = scalar_lea.vmem %s719_s27, 16 }
  0x41   : > { %p9900_p2 = scmp.ne.s32.totalorder %s719_s27, %s9899_s23  ;;  %s9906_s21 = scalar_lea.vmem %s719_s27, 32 }
  0x42   : > { %p9907_p9 = scmp.lt.s32.totalorder %s719_s27, %s719_s27  ;;  %p9908_p3 = scmp.lt.s32.totalorder %s9906_s21, %s9899_s23 }
  0x43   : > { %p9902_p5 = pnand %p9900_p2, %p10725_p7 }
  0x44   : > { %p9909_p11 = por %p9908_p3, %p9907_p9 }
  0x45   : > { %p9903_p8 = pneg %p9902_p5 }
  0x46   : > { %9146 = dma.hbm_to_vmem [thread:$0]  (!%p10717_p6), %s12128_s24, 960, %s692_s3, [#allocation7], %s10513_s7, %s10513_s7, %s10514_s8  }
  0x47   : > { %p9910_p10 = pnand %p9909_p11, %p9903_p8 }
  0x49   : > { %9913 = shalt.err (!%p9910_p10)
}
  0x4a   : > { %s12129_s19 = sld [smem:[#allocation59_spill]]  ;;  %s9925_s24 = scalar_lea.vmem %s10721_s9, 30720 }
  0x4b   : > { %p9926_p12 = scmp.ne.s32.totalorder %s10721_s9, %s9925_s24  ;;  %p9933_p2 = scmp.lt.s32.totalorder %s10721_s9, %s10721_s9 }
  0x4c   : > { %p9934_p3 = scmp.lt.s32.totalorder %s9925_s24, %s9925_s24 }
  0x4d   : > { %p9928_p13 = pnand %p9926_p12, %p10725_p7 }
  0x4e   : > { %p9935_p5 = por %p9934_p3, %p9933_p2 }
  0x4f   : > { %p9929_p0 = pneg %p9928_p13 }
  0x50   : > { %9152 = dma.hbm_to_vmem [thread:$0]  (!%p10717_p6), %s12129_s19, 16, %s719_s27, [#allocation10]  }
  0x51   : > { %p9936_p8 = pnand %p9935_p5, %p9929_p0 }
  0x53   : > { %9939 = shalt.err (!%p9936_p8)
}
  0x54   : > { %s10515_s21 = smov 1920   ;;  %s10516_s20 = smov 120  }
  0x55   : > { %s12130_s16 = sld [smem:[#allocation66_spill]]  ;;  %s10517_s19 = smov [#allocation30]  }
  0x56   : > { %s755_s3 = sshll.u32 %s10517_s19, 4  ;;  %s756_s3 = int_to_ptr.vmem [resolvable:$true] %s755_s3 }
  0x57   : > { %s9951_s27 = scalar_lea.vmem %s756_s3, 2048  ;;  %p9959_p12 = scmp.lt.s32.totalorder %s756_s3, %s756_s3 }
  0x58   : > { %p9952_p9 = scmp.ne.s32.totalorder %s756_s3, %s9951_s27  ;;  %p9960_p13 = scmp.lt.s32.totalorder %s9951_s27, %s9951_s27 }
  0x5a   : > { %p9954_p11 = pnand %p9952_p9, %p10725_p7  ;;  %p9961_p0 = por %p9960_p13, %p9959_p12 }
  0x5b   : > { %9158 = dma.hbm_to_vmem [thread:$0]  (!%p10717_p6), %s12130_s16, 30720, %s10721_s9, [#allocation28], %s10515_s21, %s10515_s21, %s10516_s20  }
  0x5c   : > { %p9955_p10 = pneg %p9954_p11 }
  0x5e   : > { %p9962_p2 = pnand %p9961_p0, %p9955_p10 }
  0x60   : > { %9965 = shalt.err (!%p9962_p2)
}
  0x61   : > { %s10518_s7 = smov 128   ;;  %s10519_s9 = smov 8  }
  0x62   : > { %s12131_s18 = sld [smem:[#allocation68_spill]]  ;;  %s10763_s0 = sadd.s32 1, %s10508_s30  }
  0x63   : > { %12132 = sst [smem:[#allocation53_spill]] %s10763_s0  ;;  %s172_s24 = sadd.s32 1, %s10504_s6 }
  0x64   : > { %s169_s21 = ssub.s32 %s10508_s30, %s10763_s0  ;;  %p179_p3 = scmp.ne.s32.totalorder %s10504_s6, %s10500_s2 }
  0x65   : > { %p170_p5 = scmp.eq.s32.totalorder %s169_s21, 0  ;;  %p180_p8 = scmp.eq.s32.totalorder %s10508_s30, 0 }
  0x66   : > { %p185_p9 = scmp.ne.s32.totalorder %s10500_s2, %s10496_s29  ;;  %p9207_p11 = scmp.lt.s32.totalorder %s10508_s30, 4 }
  0x67   : > { %s10775_s20 = scalar_select %p170_p5, %s10504_s6, %s172_s24  }
  0x68   : > { %9161 = dma.hbm_to_vmem [thread:$0]  (!%p10717_p6), %s12131_s18, 2048, %s756_s3, [#allocation31], %s10518_s7, %s10518_s7, %s10519_s9  }
  0x69   : > { %12133 = sst [smem:[#allocation54_spill]] %s10775_s20  ;;  %p181_p10 = por %p180_p8, %p179_p3 }
  0x6a   : > { %p10779_p12 = por %p12074_p1, %p185_p9  ;;  %s10784_s25 = sand.u32 1, %s10508_s30  }
  0x6b   : > { %s10787_s19 = sand.u32 1, %s10504_s6   ;;  %s10790_s3 = sshll.u32 %s10508_s30, 4 }
  0x6c   : > { %s12134_s23 = scalar_select %p10779_p12, 1, 0 }
  0x6d   : > { %s797_s29 = scalar_lea.vmem [#allocation12], %s10787_s19  ;;  %s12136_s8 = sld [smem:[#allocation61_spill]] }
  0x6e   : > { %12135 = sst [smem:[#allocation55_spill]] %s12134_s23  ;;  %s804_s27 = sshll.u32 %s797_s29, 4  ;;  %s10799_s27 = int_to_ptr.vmem [resolvable:$true] %s804_s27 }
  0x6f   : > { %p10801_p13 = pnand %p9207_p11, %p181_p10  ;;  %s9076_s16 = smul.u32 3072, %s10508_s30 }
  0x71   : > { %s12137_s24 = scalar_select %p10801_p13, 1, 0 }
  0x72   : > { %p10812_p2 = pneg %p10801_p13 }
  0x73   : > { %s10797_s28 = scalar_lea.hbm %s12136_s8, %s10790_s3  ;;  %s9971_s6 = scalar_lea.hbm %s12136_s8, 64 }
  0x74   : > { %s9966_s20 = scalar_lea.hbm %s10797_s28, 16  ;;  %p9972_p8 = scmp.lt.s32.totalorder %s10797_s28, %s12136_s8 }
  0x75   : > { %p9967_p0 = scmp.ne.s32.totalorder %s10797_s28, %s9966_s20  ;;  %p9973_p9 = scmp.lt.s32.totalorder %s9971_s6, %s9966_s20 }
  0x76   : > { %s12138_s29 = scalar_select %p10812_p2, 1, 0 }
  0x77   : > { %p9969_p3 = pnand %p10812_p2, %p9967_p0  ;;  %p9974_p11 = por %p9973_p9, %p9972_p8 }
  0x79   : > { %p9970_p5 = pneg %p9969_p3 }
  0x7b   : > { %p9975_p10 = pnand %p9974_p11, %p9970_p5 }
  0x7d   : > { %9978 = shalt.err (!%p9975_p10)
}
  0x7e   : > { %s9979_s21 = scalar_lea.vmem %s10799_s27, 16  ;;  %s10520_s18 = smov [#allocation12]  }
  0x7f   : > { %p9980_p1 = scmp.ne.s32.totalorder %s10799_s27, %s9979_s21  ;;  %s9984_s7 = sshll.u32 %s10520_s18, 4  ;;  %s9985_s7 = int_to_ptr.vmem [resolvable:$false] %s9984_s7 }
  0x80   : > { %s9986_s9 = scalar_lea.vmem %s9985_s7, 32  ;;  %p9987_p12 = scmp.lt.s32.totalorder %s10799_s27, %s9985_s7 }
  0x81   : > { %p9982_p0 = pnand %p9980_p1, %p10812_p2  ;;  %p9988_p4 = scmp.lt.s32.totalorder %s9986_s9, %s9979_s21 }
  0x83   : > { %p9983_p3 = pneg %p9982_p0  ;;  %p9989_p6 = por %p9988_p4, %p9987_p12 }
  0x85   : > { %p9990_p7 = pnand %p9989_p6, %p9983_p3 }
  0x87   : > { %9993 = shalt.err (!%p9990_p7)
}
  0x88   : > { %s12139_s17 = scalar_lea.sflag [#allocation13], %s10784_s25  ;;  %s12140_s18 = sld [smem:[#allocation63_spill]] }
  0x89   : > { %9168 = dma.hbm_to_vmem [thread:$0]  (!%p10801_p13), %s10797_s28, 16, %s10799_s27, %s12139_s17  }
  0x8a   : > { %s12141_s7 = smul.u32 192, %s10787_s19  ;;  %s12097_s8 = scalar_lea.sflag [#allocation16], %s10784_s25 }
  0x8c   : > { %s832_s21 = scalar_lea.vmem [#allocation15], %s12141_s7 }
  0x8d   : > { %s839_s9 = sshll.u32 %s832_s21, 4  ;;  %s10843_s9 = int_to_ptr.vmem [resolvable:$true] %s839_s9 }
  0x8e   : > { %s10839_s20 = scalar_lea.hbm %s12140_s18, %s9076_s16  ;;  %s9999_s17 = scalar_lea.hbm %s12140_s18, 12288 }
  0x8f   : > { %s9994_s23 = scalar_lea.hbm %s10839_s20, 3072  ;;  %p10000_p7 = scmp.lt.s32.totalorder %s10839_s20, %s12140_s18 }
  0x90   : > { %p9995_p1 = scmp.ne.s32.totalorder %s10839_s20, %s9994_s23  ;;  %p10001_p12 = scmp.lt.s32.totalorder %s9999_s17, %s9994_s23 }
  0x92   : > { %p9997_p4 = pnand %p9995_p1, %p10812_p2  ;;  %p10002_p5 = por %p10001_p12, %p10000_p7 }
  0x94   : > { %p9998_p6 = pneg %p9997_p4 }
  0x96   : > { %p10003_p8 = pnand %p10002_p5, %p9998_p6 }
  0x98   : > { %10006 = shalt.err (!%p10003_p8)
}
  0x99   : > { %s10007_s0 = scalar_lea.vmem %s10843_s9, 3072  ;;  %s10521_s7 = smov [#allocation15]  }
  0x9a   : > { %p10008_p9 = scmp.ne.s32.totalorder %s10843_s9, %s10007_s0  ;;  %s10012_s21 = sshll.u32 %s10521_s7, 4  ;;  %s10013_s21 = int_to_ptr.vmem [resolvable:$false] %s10012_s21 }
  0x9b   : > { %s10014_s27 = scalar_lea.vmem %s10013_s21, 6144  ;;  %p10015_p0 = scmp.lt.s32.totalorder %s10843_s9, %s10013_s21 }
  0x9c   : > { %p10010_p11 = pnand %p10008_p9, %p10812_p2  ;;  %p10016_p3 = scmp.lt.s32.totalorder %s10014_s27, %s10007_s0 }
  0x9e   : > { %p10011_p10 = pneg %p10010_p11  ;;  %p10017_p1 = por %p10016_p3, %p10015_p0 }
  0xa0   : > { %p10018_p4 = pnand %p10017_p1, %p10011_p10 }
  0xa2   : > { %10021 = shalt.err (!%p10018_p4)
}
  0xa3   : > { %s10522_s23 = smov 192   ;;  %s10523_s28 = smov 12  }
  0xa4   : > { %9174 = dma.hbm_to_vmem [thread:$0]  (!%p10801_p13), %s10839_s20, 3072, %s10843_s9, %s12097_s8, %s10522_s23, %s10522_s23, %s10523_s28  }
  0xa5   : > { %s12142_s6 = sld [smem:[#allocation65_spill]]  ;;  %s873_s21 = scalar_lea.vmem [#allocation18], %s10787_s19 }
  0xa6   : > { %s880_s27 = sshll.u32 %s873_s21, 4  ;;  %s12091_s18 = scalar_lea.sflag [#allocation19], %s10784_s25  ;;  %s881_s27 = int_to_ptr.vmem [resolvable:$true] %s880_s27 }
  0xab   : > { %s12143_s7 = smov %s12142_s6  ;;  %s10872_s0 = scalar_lea.hbm %s12142_s6, %s10790_s3 }
  0xac   : > { %s10022_s2 = scalar_lea.hbm %s10872_s0, 16  ;;  %s10027_s20 = scalar_lea.hbm %s12143_s7, 64 }
  0xad   : > { %p10023_p6 = scmp.ne.s32.totalorder %s10872_s0, %s10022_s2  ;;  %p10028_p5 = scmp.lt.s32.totalorder %s10872_s0, %s12143_s7 }
  0xae   : > { %p10029_p8 = scmp.lt.s32.totalorder %s10027_s20, %s10022_s2 }
  0xaf   : > { %p10025_p7 = pnand %p10023_p6, %p10812_p2 }
  0xb0   : > { %p10030_p9 = por %p10029_p8, %p10028_p5 }
  0xb1   : > { %p10026_p12 = pneg %p10025_p7 }
  0xb3   : > { %p10031_p11 = pnand %p10030_p9, %p10026_p12 }
  0xb5   : > { %10034 = shalt.err (!%p10031_p11)
}
  0xb6   : > { %s10035_s28 = scalar_lea.vmem %s881_s27, 16  ;;  %s10524_s17 = smov [#allocation18]  }
  0xb7   : > { %p10036_p10 = scmp.ne.s32.totalorder %s881_s27, %s10035_s28  ;;  %s10040_s16 = sshll.u32 %s10524_s17, 4  ;;  %s10041_s16 = int_to_ptr.vmem [resolvable:$false] %s10040_s16 }
  0xb8   : > { %s10042_s6 = scalar_lea.vmem %s10041_s16, 32  ;;  %p10043_p1 = scmp.lt.s32.totalorder %s881_s27, %s10041_s16 }
  0xb9   : > { %p10038_p0 = pnand %p10036_p10, %p10812_p2  ;;  %p10044_p4 = scmp.lt.s32.totalorder %s10042_s6, %s10035_s28 }
  0xbb   : > { %p10039_p3 = pneg %p10038_p0  ;;  %p10045_p6 = por %p10044_p4, %p10043_p1 }
  0xbd   : > { %p10046_p7 = pnand %p10045_p6, %p10039_p3 }
  0xbf   : > { %10049 = shalt.err (!%p10046_p7)
}
  0xc0   : > { %9180 = dma.hbm_to_vmem [thread:$0]  (!%p10801_p13), %s10872_s0, 16, %s881_s27, %s12091_s18  }
  0xc1   : > { %s10898_s1 = scalar_lea.hbm %s12050_s11, %s10790_s3  ;;  %s907_s21 = scalar_lea.vmem [#allocation21], %s10787_s19 }
  0xc2   : > { %s914_s20 = sshll.u32 %s907_s21, 4  ;;  %s12090_s9 = scalar_lea.sflag [#allocation22], %s10784_s25  ;;  %s915_s20 = int_to_ptr.vmem [resolvable:$true] %s914_s20 }
  0xc3   : > { %s10050_s23 = scalar_lea.hbm %s10898_s1, 16  ;;  %s10055_s0 = scalar_lea.hbm %s12050_s11, 64 }
  0xc4   : > { %p10051_p12 = scmp.ne.s32.totalorder %s10898_s1, %s10050_s23  ;;  %p10056_p9 = scmp.lt.s32.totalorder %s10898_s1, %s12050_s11 }
  0xc5   : > { %p10057_p11 = scmp.lt.s32.totalorder %s10055_s0, %s10050_s23 }
  0xc6   : > { %p10053_p5 = pnand %p10051_p12, %p10812_p2 }
  0xc7   : > { %p10058_p10 = por %p10057_p11, %p10056_p9 }
  0xc8   : > { %p10054_p8 = pneg %p10053_p5 }
  0xca   : > { %p10059_p0 = pnand %p10058_p10, %p10054_p8 }
  0xcc   : > { %10062 = shalt.err (!%p10059_p0)
}
  0xcd   : > { %s10063_s6 = scalar_lea.vmem %s915_s20, 16  ;;  %s10525_s2 = smov [#allocation21]  }
  0xce   : > { %p10064_p3 = scmp.ne.s32.totalorder %s915_s20, %s10063_s6  ;;  %s10068_s26 = sshll.u32 %s10525_s2, 4  ;;  %s10069_s26 = int_to_ptr.vmem [resolvable:$false] %s10068_s26 }
  0xcf   : > { %s10070_s21 = scalar_lea.vmem %s10069_s26, 32  ;;  %p10071_p6 = scmp.lt.s32.totalorder %s915_s20, %s10069_s26 }
  0xd0   : > { %p10066_p1 = pnand %p10064_p3, %p10812_p2  ;;  %p10072_p7 = scmp.lt.s32.totalorder %s10070_s21, %s10063_s6 }
  0xd2   : > { %p10067_p4 = pneg %p10066_p1  ;;  %p10073_p12 = por %p10072_p7, %p10071_p6 }
  0xd4   : > { %p10074_p5 = pnand %p10073_p12, %p10067_p4 }
  0xd6   : > { %10077 = shalt.err (!%p10074_p5)
}
  0xd7   : > { %9186 = dma.hbm_to_vmem [thread:$0]  (!%p10801_p13), %s10898_s1, 16, %s915_s20, %s12090_s9  }
  0xd8   : > { %s10924_s17 = scalar_lea.hbm %s12052_s13, %s10790_s3  ;;  %s945_s0 = scalar_lea.vmem [#allocation24], %s10787_s19 }
  0xd9   : > { %s952_s27 = sshll.u32 %s945_s0, 4  ;;  %s10526_s16 = smov [#allocation3]   ;;  %s953_s27 = int_to_ptr.vmem [resolvable:$true] %s952_s27 }
  0xda   : > { %s678_s6 = sshll.u32 %s10526_s16, 4  ;;  %s12096_s2 = scalar_lea.sflag [#allocation25], %s10784_s25  ;;  %s679_s6 = int_to_ptr.vmem [resolvable:$true] %s678_s6 }
  0xdb   : > { %s10078_s26 = scalar_lea.hbm %s10924_s17, 16  ;;  %s10083_s21 = scalar_lea.hbm %s12052_s13, 64 }
  0xdc   : > { %p10079_p8 = scmp.ne.s32.totalorder %s10924_s17, %s10078_s26  ;;  %p10084_p10 = scmp.lt.s32.totalorder %s10924_s17, %s12052_s13 }
  0xdd   : > { %p10085_p0 = scmp.lt.s32.totalorder %s10083_s21, %s10078_s26 }
  0xde   : > { %p10081_p9 = pnand %p10079_p8, %p10812_p2 }
  0xdf   : > { %p10086_p3 = por %p10085_p0, %p10084_p10 }
  0xe0   : > { %p10082_p11 = pneg %p10081_p9 }
  0xe2   : > { %p10087_p1 = pnand %p10086_p3, %p10082_p11 }
  0xe4   : > { %10090 = shalt.err (!%p10087_p1)
}
  0xe5   : > { %s10091_s0 = scalar_lea.vmem %s953_s27, 16  ;;  %s10527_s16 = smov [#allocation24]  }
  0xe6   : > { %p10092_p4 = scmp.ne.s32.totalorder %s953_s27, %s10091_s0  ;;  %s10096_s9 = sshll.u32 %s10527_s16, 4  ;;  %s10097_s9 = int_to_ptr.vmem [resolvable:$false] %s10096_s9 }
  0xe7   : > { %s10098_s18 = scalar_lea.vmem %s10097_s9, 32  ;;  %p10099_p12 = scmp.lt.s32.totalorder %s953_s27, %s10097_s9 }
  0xe8   : > { %p10094_p6 = pnand %p10092_p4, %p10812_p2  ;;  %p10100_p5 = scmp.lt.s32.totalorder %s10098_s18, %s10091_s0 }
  0xea   : > { %p10095_p7 = pneg %p10094_p6  ;;  %p10101_p8 = por %p10100_p5, %p10099_p12 }
  0xec   : > { %p10102_p9 = pnand %p10101_p8, %p10095_p7 }
  0xee   : > { %10105 = shalt.err (!%p10102_p9)
}
  0xef   : > { %9192 = dma.hbm_to_vmem [thread:$0]  (!%p10801_p13), %s10924_s17, 16, %s953_s27, %s12096_s2  }
  0xf0   : > { %s10117_s26 = scalar_lea.vmem %s679_s6, 768  ;;  %p12144_p10 = scmp.ne.s32.totalorder %s12127_s5, 0 }
  0xf1   : > { %p10118_p11 = scmp.ne.s32.totalorder %s679_s6, %s10117_s26  ;;  %p10125_p1 = scmp.lt.s32.totalorder %s679_s6, %s679_s6 }
  0xf2   : > { %p10126_p4 = scmp.lt.s32.totalorder %s10117_s26, %s10117_s26 }
  0xf3   : > { %p10120_p0 = pnand %p10118_p11, %p12144_p10 }
  0xf4   : > { %p10127_p6 = por %p10126_p4, %p10125_p1 }
  0xf5   : > { %p10121_p3 = pneg %p10120_p0 }
  0xf7   : > { %p10128_p2 = pnand %p10127_p6, %p10121_p3 }
  0xf9   : > { %10131 = shalt.err (!%p10128_p2)
}
  0xfa   : > { %s10528_s18 = smov 384   ;;  %s10529_s9 = smov 24  }
  0xfb   : > { %p12145_p7 = scmp.ne.s32.totalorder %s12126_s4, 0  ;;  %s12146_s21 = sld [smem:[#allocation56_spill]] }
  0xfc   : > { %s10530_s17 = smov [#allocation8]  }
  0xfd   : > { %s704_s27 = sshll.u32 %s10530_s17, 4  ;;  %s705_s27 = int_to_ptr.vmem [resolvable:$true] %s704_s27 }
  0xfe   : > { %s10143_s23 = scalar_lea.vmem %s705_s27, 2560  ;;  %p10151_p9 = scmp.lt.s32.totalorder %s705_s27, %s705_s27 }
  0xff   : > { %p10144_p12 = scmp.ne.s32.totalorder %s705_s27, %s10143_s23  ;;  %p10152_p11 = scmp.lt.s32.totalorder %s10143_s23, %s10143_s23 }
 0x101   : > { %9143 = dma.hbm_to_vmem [thread:$0]  (!%p12145_p7), %s12146_s21, 768, %s679_s6, [#allocation4], %s10528_s18, %s10528_s18, %s10529_s9  }
 0x102   : > { %p10146_p5 = pnand %p10144_p12, %p12144_p10  ;;  %p10153_p2 = por %p10152_p11, %p10151_p9 }
 0x104   : > { %p10147_p8 = pneg %p10146_p5 }
 0x106   : > { %p10154_p0 = pnand %p10153_p2, %p10147_p8 }
 0x108   : > { %10157 = shalt.err (!%p10154_p0)
}
 0x109   : > { %s12098_s28 = smov 64   ;;  %s12100_s0 = smov 4  }
 0x10a   : > { %s12147_s26 = sld [smem:[#allocation58_spill]]  ;;  %s10533_s18 = smov [#allocation11]  }
 0x10b   : > { %s729_s9 = sshll.u32 %s10533_s18, 4  ;;  %s10534_s1 = smov [#allocation32]   ;;  %s730_s9 = int_to_ptr.vmem [resolvable:$true] %s729_s9 }
 0x10c   : > { %s777_s20 = sshll.u32 %s10534_s1, 4  ;;  %s10169_s21 = scalar_lea.vmem %s730_s9, 16  ;;  %s778_s20 = int_to_ptr.vmem [resolvable:$true] %s777_s20 }
 0x10d   : > { %p10170_p3 = scmp.ne.s32.totalorder %s730_s9, %s10169_s21  ;;  %s10176_s17 = scalar_lea.vmem %s730_s9, 32 }
 0x10e   : > { %p10177_p6 = scmp.lt.s32.totalorder %s730_s9, %s730_s9  ;;  %p10178_p12 = scmp.lt.s32.totalorder %s10176_s17, %s10169_s21 }
 0x10f   : > { %p10172_p1 = pnand %p10170_p3, %p12144_p10 }
 0x110   : > { %9149 = dma.hbm_to_vmem [thread:$0]  (!%p12145_p7), %s12147_s26, 2560, %s705_s27, [#allocation7], %s12098_s28, %s12098_s28, %s12100_s0  }
 0x111   : > { %p10173_p4 = pneg %p10172_p1  ;;  %p10179_p5 = por %p10178_p12, %p10177_p6 }
 0x113   : > { %p10180_p8 = pnand %p10179_p5, %p10173_p4 }
 0x115   : > { %10183 = shalt.err (!%p10180_p8)
}
 0x116   : > { %s12148_s6 = sld [smem:[#allocation60_spill]]  ;;  %s10195_s16 = scalar_lea.vmem %s778_s20, 2048 }
 0x117   : > { %p10196_p9 = scmp.ne.s32.totalorder %s778_s20, %s10195_s16  ;;  %p10203_p0 = scmp.lt.s32.totalorder %s778_s20, %s778_s20 }
 0x118   : > { %p10204_p3 = scmp.lt.s32.totalorder %s10195_s16, %s10195_s16 }
 0x119   : > { %p10198_p11 = pnand %p10196_p9, %p12144_p10 }
 0x11a   : > { %p10205_p1 = por %p10204_p3, %p10203_p0 }
 0x11b   : > { %p10199_p2 = pneg %p10198_p11 }
 0x11c   : > { %9155 = dma.hbm_to_vmem [thread:$0]  (!%p12145_p7), %s12148_s6, 16, %s730_s9, [#allocation10]  }
 0x11d   : > { %p10206_p13 = pnand %p10205_p1, %p10199_p2 }
 0x11f   : > { %10209 = shalt.err (!%p10206_p13)
}
 0x120   : > { %9164 = dma.hbm_to_vmem [thread:$0]  (!%p12145_p7), %s12061_s22, 2048, %s778_s20, [#allocation31], %s12098_s28, %s12098_s28, %s12100_s0  }
 0x121   : > { %s12149_s1 = sld [smem:[#allocation62_spill]]  ;;  %s814_s4 = scalar_lea.vmem [#allocation14], %s10787_s19 }
 0x122   : > { %s821_s17 = sshll.u32 %s814_s4, 4  ;;  %s10988_s27 = sshll.u32 %s10787_s19, 6  ;;  %s822_s17 = int_to_ptr.vmem [resolvable:$true] %s821_s17 }
 0x123   : > { %p12150_p10 = scmp.ne.s32.totalorder %s12138_s29, 0 }
 0x127   : > { %s10984_s21 = scalar_lea.hbm %s12149_s1, %s10790_s3  ;;  %s10215_s16 = scalar_lea.hbm %s12149_s1, 64 }
 0x128   : > { %s10210_s23 = scalar_lea.hbm %s10984_s21, 16  ;;  %p10216_p7 = scmp.lt.s32.totalorder %s10984_s21, %s12149_s1 }
 0x129   : > { %p10211_p13 = scmp.ne.s32.totalorder %s10984_s21, %s10210_s23  ;;  %p10217_p12 = scmp.lt.s32.totalorder %s10215_s16, %s10210_s23 }
 0x12b   : > { %p10213_p4 = pnand %p10211_p13, %p12150_p10  ;;  %p10218_p5 = por %p10217_p12, %p10216_p7 }
 0x12d   : > { %p10214_p6 = pneg %p10213_p4 }
 0x12f   : > { %p10219_p8 = pnand %p10218_p5, %p10214_p6 }
 0x131   : > { %10222 = shalt.err (!%p10219_p8)
}
 0x132   : > { %s10223_s5 = scalar_lea.vmem %s822_s17, 16  ;;  %s10535_s9 = smov [#allocation14]  }
 0x133   : > { %p10224_p9 = scmp.ne.s32.totalorder %s822_s17, %s10223_s5  ;;  %s10228_s4 = sshll.u32 %s10535_s9, 4  ;;  %s10229_s4 = int_to_ptr.vmem [resolvable:$false] %s10228_s4 }
 0x134   : > { %s10230_s2 = scalar_lea.vmem %s10229_s4, 32  ;;  %p10231_p0 = scmp.lt.s32.totalorder %s822_s17, %s10229_s4 }
 0x135   : > { %p10226_p11 = pnand %p10224_p9, %p12150_p10  ;;  %p10232_p3 = scmp.lt.s32.totalorder %s10230_s2, %s10223_s5 }
 0x137   : > { %p10227_p2 = pneg %p10226_p11  ;;  %p10233_p1 = por %p10232_p3, %p10231_p0 }
 0x139   : > { %p10234_p13 = pnand %p10233_p1, %p10227_p2 }
 0x13b   : > { %10237 = shalt.err (!%p10234_p13)
}
 0x13c   : > { %p12151_p4 = scmp.ne.s32.totalorder %s12137_s24, 0  ;;  %s12152_s23 = scalar_lea.sflag [#allocation13], %s10784_s25 }
 0x13d   : > { %s11009_s6 = sshll.u32 %s10508_s30, 10  ;;  %s853_s20 = scalar_lea.vmem [#allocation17], %s10988_s27 }
 0x13e   : > { %9171 = dma.hbm_to_vmem [thread:$0]  (!%p12151_p4), %s10984_s21, 16, %s822_s17, %s12152_s23  }
 0x13f   : > { %s860_s16 = sshll.u32 %s853_s20, 4  ;;  %s12153_s2 = sld [smem:[#allocation64_spill]]  ;;  %s861_s16 = int_to_ptr.vmem [resolvable:$true] %s860_s16 }
 0x145   : > { %s12154_s5 = smov %s12153_s2  ;;  %s11016_s9 = scalar_lea.hbm %s12153_s2, %s11009_s6 }
 0x146   : > { %s10238_s4 = scalar_lea.hbm %s11016_s9, 1024  ;;  %s10243_s17 = scalar_lea.hbm %s12154_s5, 4096 }
 0x147   : > { %p10239_p6 = scmp.ne.s32.totalorder %s11016_s9, %s10238_s4  ;;  %p10244_p5 = scmp.lt.s32.totalorder %s11016_s9, %s12154_s5 }
 0x148   : > { %p10245_p8 = scmp.lt.s32.totalorder %s10243_s17, %s10238_s4 }
 0x149   : > { %p10241_p7 = pnand %p10239_p6, %p12150_p10 }
 0x14a   : > { %p10246_p9 = por %p10245_p8, %p10244_p5 }
 0x14b   : > { %p10242_p12 = pneg %p10241_p7 }
 0x14d   : > { %p10247_p11 = pnand %p10246_p9, %p10242_p12 }
 0x14f   : > { %10250 = shalt.err (!%p10247_p11)
}
 0x150   : > { %s10251_s26 = scalar_lea.vmem %s861_s16, 1024  ;;  %s10536_s18 = smov [#allocation17]  }
 0x151   : > { %p10252_p2 = scmp.ne.s32.totalorder %s861_s16, %s10251_s26  ;;  %s10256_s2 = sshll.u32 %s10536_s18, 4  ;;  %s10257_s2 = int_to_ptr.vmem [resolvable:$false] %s10256_s2 }
 0x152   : > { %s10258_s8 = scalar_lea.vmem %s10257_s2, 2048  ;;  %p10259_p1 = scmp.lt.s32.totalorder %s861_s16, %s10257_s2 }
 0x153   : > { %p10254_p0 = pnand %p10252_p2, %p12150_p10  ;;  %p10260_p13 = scmp.lt.s32.totalorder %s10258_s8, %s10251_s26 }
 0x155   : > { %p10255_p3 = pneg %p10254_p0  ;;  %p10261_p6 = por %p10260_p13, %p10259_p1 }
 0x157   : > { %p10262_p7 = pnand %p10261_p6, %p10255_p3 }
 0x159   : > { %10265 = shalt.err (!%p10262_p7)
}
 0x15a   : > { %s12155_s4 = scalar_lea.sflag [#allocation16], %s10784_s25  ;;  %s11043_s8 = scalar_lea.hbm %s12049_s10, %s10790_s3 }
 0x15b   : > { %9177 = dma.hbm_to_vmem [thread:$0]  (!%p12151_p4), %s11016_s9, 1024, %s861_s16, %s12155_s4, %s12098_s28, %s12098_s28, %s12100_s0  }
 0x15c   : > { %s890_s17 = scalar_lea.vmem [#allocation20], %s10787_s19  ;;  %s11050_s18 = scalar_lea.hbm %s12051_s12, %s11009_s6 }
 0x15d   : > { %s897_s23 = sshll.u32 %s890_s17, 4  ;;  %s10266_s2 = scalar_lea.hbm %s11043_s8, 16  ;;  %s898_s23 = int_to_ptr.vmem [resolvable:$true] %s897_s23 }
 0x15e   : > { %p10267_p12 = scmp.ne.s32.totalorder %s11043_s8, %s10266_s2  ;;  %s10271_s4 = scalar_lea.hbm %s12049_s10, 64 }
 0x15f   : > { %p10272_p9 = scmp.lt.s32.totalorder %s11043_s8, %s12049_s10  ;;  %p10273_p11 = scmp.lt.s32.totalorder %s10271_s4, %s10266_s2 }
 0x160   : > { %p10269_p5 = pnand %p10267_p12, %p12150_p10 }
 0x161   : > { %p10274_p2 = por %p10273_p11, %p10272_p9 }
 0x162   : > { %p10270_p8 = pneg %p10269_p5 }
 0x164   : > { %p10275_p0 = pnand %p10274_p2, %p10270_p8 }
 0x166   : > { %10278 = shalt.err (!%p10275_p0)
}
 0x167   : > { %s10279_s17 = scalar_lea.vmem %s898_s23, 16  ;;  %s10537_s20 = smov [#allocation20]  }
 0x168   : > { %p10280_p3 = scmp.ne.s32.totalorder %s898_s23, %s10279_s17  ;;  %s10284_s26 = sshll.u32 %s10537_s20, 4  ;;  %s10285_s26 = int_to_ptr.vmem [resolvable:$false] %s10284_s26 }
 0x169   : > { %s10286_s28 = scalar_lea.vmem %s10285_s26, 32  ;;  %p10287_p6 = scmp.lt.s32.totalorder %s898_s23, %s10285_s26 }
 0x16a   : > { %p10282_p1 = pnand %p10280_p3, %p12150_p10  ;;  %p10288_p7 = scmp.lt.s32.totalorder %s10286_s28, %s10279_s17 }
 0x16c   : > { %p10283_p13 = pneg %p10282_p1  ;;  %p10289_p12 = por %p10288_p7, %p10287_p6 }
 0x16e   : > { %p10290_p5 = pnand %p10289_p12, %p10283_p13 }
 0x170   : > { %10293 = shalt.err (!%p10290_p5)
}
 0x171   : > { %s12156_s2 = scalar_lea.sflag [#allocation19], %s10784_s25  ;;  %s925_s16 = scalar_lea.vmem [#allocation23], %s10988_s27 }
 0x172   : > { %9183 = dma.hbm_to_vmem [thread:$0]  (!%p12151_p4), %s11043_s8, 16, %s898_s23, %s12156_s2  }
 0x173   : > { %s932_s9 = sshll.u32 %s925_s16, 4  ;;  %s11077_s21 = scalar_lea.hbm %s12053_s14, %s11009_s6  ;;  %s11071_s9 = int_to_ptr.vmem [resolvable:$true] %s932_s9 }
 0x174   : > { %s10294_s30 = scalar_lea.hbm %s11050_s18, 1024  ;;  %s10299_s26 = scalar_lea.hbm %s12051_s12, 4096 }
 0x175   : > { %p10295_p8 = scmp.ne.s32.totalorder %s11050_s18, %s10294_s30  ;;  %p10300_p2 = scmp.lt.s32.totalorder %s11050_s18, %s12051_s12 }
 0x176   : > { %p10301_p0 = scmp.lt.s32.totalorder %s10299_s26, %s10294_s30 }
 0x177   : > { %p10297_p9 = pnand %p10295_p8, %p12150_p10 }
 0x178   : > { %p10302_p3 = por %p10301_p0, %p10300_p2 }
 0x179   : > { %p10298_p11 = pneg %p10297_p9 }
 0x17b   : > { %p10303_p1 = pnand %p10302_p3, %p10298_p11 }
 0x17d   : > { %10306 = shalt.err (!%p10303_p1)
}
 0x17e   : > { %s10307_s6 = scalar_lea.vmem %s11071_s9, 1024  ;;  %s10538_s23 = smov [#allocation23]  }
 0x17f   : > { %p10308_p13 = scmp.ne.s32.totalorder %s11071_s9, %s10307_s6  ;;  %s10312_s2 = sshll.u32 %s10538_s23, 4  ;;  %s10313_s2 = int_to_ptr.vmem [resolvable:$false] %s10312_s2 }
 0x180   : > { %s10314_s16 = scalar_lea.vmem %s10313_s2, 2048  ;;  %p10315_p12 = scmp.lt.s32.totalorder %s11071_s9, %s10313_s2 }
 0x181   : > { %p10310_p6 = pnand %p10308_p13, %p12150_p10  ;;  %p10316_p5 = scmp.lt.s32.totalorder %s10314_s16, %s10307_s6 }
 0x183   : > { %p10311_p7 = pneg %p10310_p6  ;;  %p10317_p8 = por %p10316_p5, %p10315_p12 }
 0x185   : > { %p10318_p9 = pnand %p10317_p8, %p10311_p7 }
 0x187   : > { %10321 = shalt.err (!%p10318_p9)
}
 0x188   : > { %s12157_s0 = smov 4   ;;  %s12158_s28 = smov 64  }
 0x189   : > { %s12159_s4 = scalar_lea.sflag [#allocation22], %s10784_s25  ;;  %s963_s30 = scalar_lea.vmem [#allocation26], %s10988_s27 }
 0x18a   : > { %9189 = dma.hbm_to_vmem [thread:$0]  (!%p12151_p4), %s11050_s18, 1024, %s11071_s9, %s12159_s4, %s12158_s28, %s12158_s28, %s12157_s0  }
 0x18b   : > { %s970_s17 = sshll.u32 %s963_s30, 4  ;;  %s10322_s20 = scalar_lea.hbm %s11077_s21, 1024  ;;  %s971_s17 = int_to_ptr.vmem [resolvable:$true] %s970_s17 }
 0x18c   : > { %p10323_p11 = scmp.ne.s32.totalorder %s11077_s21, %s10322_s20  ;;  %s10327_s6 = scalar_lea.hbm %s12053_s14, 4096 }
 0x18d   : > { %p10328_p3 = scmp.lt.s32.totalorder %s11077_s21, %s12053_s14  ;;  %p10329_p1 = scmp.lt.s32.totalorder %s10327_s6, %s10322_s20 }
 0x18e   : > { %p10325_p2 = pnand %p10323_p11, %p12150_p10 }
 0x18f   : > { %p10330_p13 = por %p10329_p1, %p10328_p3 }
 0x190   : > { %p10326_p0 = pneg %p10325_p2 }
 0x192   : > { %p10331_p6 = pnand %p10330_p13, %p10326_p0 }
 0x194   : > { %10334 = shalt.err (!%p10331_p6)
}
 0x195   : > { %s10335_s27 = scalar_lea.vmem %s971_s17, 1024  ;;  %s10539_s18 = smov [#allocation26]  }
 0x196   : > { %p10336_p7 = scmp.ne.s32.totalorder %s971_s17, %s10335_s27  ;;  %s10340_s9 = sshll.u32 %s10539_s18, 4  ;;  %s10341_s9 = int_to_ptr.vmem [resolvable:$false] %s10340_s9 }
 0x197   : > { %s10342_s16 = scalar_lea.vmem %s10341_s9, 2048  ;;  %p10343_p8 = scmp.lt.s32.totalorder %s971_s17, %s10341_s9 }
 0x198   : > { %p10338_p12 = pnand %p10336_p7, %p12150_p10  ;;  %p10344_p9 = scmp.lt.s32.totalorder %s10342_s16, %s10335_s27 }
 0x19a   : > { %p10339_p5 = pneg %p10338_p12  ;;  %p10345_p11 = por %p10344_p9, %p10343_p8 }
 0x19c   : > { %p10346_p2 = pnand %p10345_p11, %p10339_p5 }
 0x19e   : > { %10349 = shalt.err (!%p10346_p2)
}
 0x19f   : > { %s12160_s4 = scalar_lea.sflag [#allocation25], %s10784_s25  ;;  %s11130_s26 = scalar_lea.hbm %s12054_s15, %s10790_s3 }
 0x1a0   : > { %9195 = dma.hbm_to_vmem [thread:$0]  (!%p12151_p4), %s11077_s21, 1024, %s971_s17, %s12160_s4, %s12158_s28, %s12158_s28, %s12157_s0  }
 0x1a1   : > { %s983_s8 = scalar_lea.vmem [#allocation27], %s10787_s19  ;;  %s981_s23 = scalar_lea.sflag [#allocation28], %s10784_s25 }
 0x1a2   : > { %s990_s6 = sshll.u32 %s983_s8, 4  ;;  %s10350_s2 = scalar_lea.hbm %s11130_s26, 16  ;;  %s991_s6 = int_to_ptr.vmem [resolvable:$true] %s990_s6 }
 0x1a3   : > { %p10351_p0 = scmp.ne.s32.totalorder %s11130_s26, %s10350_s2  ;;  %s10355_s21 = scalar_lea.hbm %s12054_s15, 64 }
 0x1a4   : > { %p10356_p13 = scmp.lt.s32.totalorder %s11130_s26, %s12054_s15  ;;  %p10357_p6 = scmp.lt.s32.totalorder %s10355_s21, %s10350_s2 }
 0x1a5   : > { %p10353_p3 = pnand %p10351_p0, %p12150_p10 }
 0x1a6   : > { %p10358_p7 = por %p10357_p6, %p10356_p13 }
 0x1a7   : > { %p10354_p1 = pneg %p10353_p3 }
 0x1a9   : > { %p10359_p12 = pnand %p10358_p7, %p10354_p1 }
 0x1ab   : > { %10362 = shalt.err (!%p10359_p12)
}
 0x1ac   : > { %s10363_s19 = scalar_lea.vmem %s991_s6, 16  ;;  %s10540_s25 = smov [#allocation27]  }
 0x1ad   : > { %p10364_p5 = scmp.ne.s32.totalorder %s991_s6, %s10363_s19  ;;  %s10368_s3 = sshll.u32 %s10540_s25, 4  ;;  %s10369_s3 = int_to_ptr.vmem [resolvable:$false] %s10368_s3 }
 0x1ae   : > { %s10370_s17 = scalar_lea.vmem %s10369_s3, 32  ;;  %p10371_p11 = scmp.lt.s32.totalorder %s991_s6, %s10369_s3 }
 0x1af   : > { %p10366_p8 = pnand %p10364_p5, %p12150_p10  ;;  %p10372_p2 = scmp.lt.s32.totalorder %s10370_s17, %s10363_s19 }
 0x1b1   : > { %p10367_p9 = pneg %p10366_p8  ;;  %p10373_p0 = por %p10372_p2, %p10371_p11 }
 0x1b3   : > { %p10374_p3 = pnand %p10373_p0, %p10367_p9 }
 0x1b5   : > { %10377 = shalt.err (!%p10374_p3)
}
 0x1b6   : > { %9198 = dma.hbm_to_vmem [thread:$0]  (!%p12151_p4), %s11130_s26, 16, %s991_s6, %s981_s23  }
 0x1b7   : > { %s12161_s9 = sld [smem:[#allocation52_spill]] }
 0x1bd   : > { %p12162_p1 = scmp.ne.s32.totalorder %s12161_s9, 0 }
 0x1be   : > { %s12163_s16 = sld [smem:[#allocation51_spill]] (!%p12162_p1) }
 0x1bf   : > { %999 = sbr.rel (%p12162_p1) target bundleno = 4872 (0x1308), region = 116 }
 0x1c4   : > { %p12164_p13 = scmp.eq.s32.totalorder %s12163_s16, 0 }
 0x1c6   : > { %10443 = dma.done.wait (%p12164_p13), [#allocation4], 768   ;;  %p12165_p10 = pmov %p12164_p13 }
 0x1c8   : > { %10445 = vsyncadd (%p12165_p10), [#allocation4], 4294966528  ;;  %p12166_p6 = pmov %p12165_p10 }
 0x1ca   : > { %10447 = dma.done.wait (%p12166_p6), [#allocation7], 3520   ;;  %p12167_p7 = pmov %p12166_p6 }
 0x1cb   : > { %p12168_p12 = pmov %p12166_p6 }
 0x1cc   : > { %10449 = vsyncadd (%p12167_p7), [#allocation7], 4294963776 }
 0x1cd   : > { %10451 = dma.done.wait (%p12168_p12), [#allocation10], 32   ;;  %p12169_p4 = pmov %p12166_p6 }
 0x1ce   : > { %s12170_s24 = sld [smem:[#allocation49_spill]]  ;;  %s11165_s4 = sand.u32 1, %s12163_s16  }
 0x1cf   : > { %10453 = vsyncadd (%p12169_p4), [#allocation10], 4294967264  ;;  %s12171_s29 = sld [smem:[#allocation55_spill]]  ;;  %s1022_s20 = scalar_lea.sflag [#allocation13], %s11165_s4 }
 0x1d4   : > { %s11168_s30 = sand.u32 1, %s12170_s24  }
 0x1d5   : > { %s1024_s26 = scalar_lea.vmem [#allocation12], %s11168_s30  ;;  %p12172_p5 = scmp.ne.s32.totalorder %s12171_s29, 0 }
 0x1d7   : > { %10455 = dma.done.wait (%p12172_p5), %s1022_s20, 32  }
 0x1d8   : > { %10457 = vsyncadd (%p12172_p5), %s1022_s20, 4294967264  ;;  %s9077_s8 = smul.u32 192, %s11168_s30  ;;  %s1032_s6 = scalar_lea.vmem [#allocation14], %s11168_s30 }
 0x1d9   : > { %s1038_s23 = scalar_lea.sflag [#allocation16], %s11165_s4 }
 0x1da   : > { %s11179_s2 = scalar_lea.vmem [#allocation15], %s9077_s8 }
 0x1db   : > { %10459 = dma.done.wait (%p12172_p5), %s1038_s23, 4096  }
 0x1dc   : > { %10461 = vsyncadd (%p12172_p5), %s1038_s23, 4294963200  ;;  %s8339_s27 = sshll.u32 %s11168_s30, 6  ;;  %s1056_s21 = scalar_lea.sflag [#allocation19], %s11165_s4 }
 0x1dd   : > { %s11186_s18 = scalar_lea.vmem [#allocation17], %s8339_s27  ;;  %s1058_s0 = scalar_lea.vmem [#allocation18], %s11168_s30 }
 0x1de   : > { %10463 = dma.done.wait (%p12172_p5), %s1056_s21, 32  }
 0x1df   : > { %10465 = vsyncadd (%p12172_p5), %s1056_s21, 4294967264  ;;  %s1066_s28 = scalar_lea.vmem [#allocation20], %s11168_s30  ;;  %s1072_s19 = scalar_lea.sflag [#allocation22], %s11165_s4 }
 0x1e0   : > { %s1074_s25 = scalar_lea.vmem [#allocation21], %s11168_s30 }
 0x1e1   : > { %10467 = dma.done.wait (%p12172_p5), %s1072_s19, 1040  }
 0x1e2   : > { %10469 = vsyncadd (%p12172_p5), %s1072_s19, 4294966256  ;;  %s11201_s3 = scalar_lea.vmem [#allocation23], %s8339_s27  ;;  %s1089_s17 = scalar_lea.sflag [#allocation25], %s11165_s4 }
 0x1e3   : > { %s1091_s9 = scalar_lea.vmem [#allocation24], %s11168_s30 }
 0x1e4   : > { %10471 = dma.done.wait (%p12172_p5), %s1089_s17, 1040  }
 0x1e5   : > { %10473 = vsyncadd (%p12172_p5), %s1089_s17, 4294966256  ;;  %s11209_s24 = scalar_lea.vmem [#allocation26], %s8339_s27  ;;  %s1106_s20 = scalar_lea.sflag [#allocation28], %s11165_s4 }
 0x1e6   : > { %s1108_s8 = scalar_lea.vmem [#allocation27], %s11168_s30 }
 0x1e7   : > { %10475 = dma.done.wait (%p12172_p5), %s1106_s20, 16  }
 0x1e8   : > { %10477 = vsyncadd (%p12172_p5), %s1106_s20, 4294967280  ;;  %p12173_p8 = pmov %p12169_p4 }
 0x1e9   : > { %p12174_p9 = pmov %p12169_p4 }
 0x1ea   : > { %10479 = dma.done.wait (%p12173_p8), [#allocation28], 30720  }
 0x1eb   : > { %10481 = vsyncadd (%p12174_p9), [#allocation28], 4294936576  ;;  %p12175_p11 = pmov %p12169_p4 }
 0x1ec   : > { %p12176_p2 = pmov %p12169_p4 }
 0x1ed   : > { %10483 = dma.done.wait (%p12175_p11), [#allocation31], 4096  }
 0x1ee   : > { %10485 = vsyncadd (%p12176_p2), [#allocation31], 4294963200  ;;  %p12177_p0 = scmp.ne.s32.totalorder %s12163_s16, 0 }
 0x1f0   : > { %1229 = sbr.rel (%p12177_p0) target bundleno = 741 (0x2e5), region = 196 }
 0x1f5   : > { %v9283_v0 = vld [vmem:[#allocation8 + $0x78] sm:$0xff]   ;;  %v10541_v2 = vmov 0.0   ;;  %v9285_v3 = vld [vmem:[#allocation8 + $0x70] sm:$0xff]   ;;  %vm10542_vm0 = vmmov 0   ;;  %v9287_v5 = vld [vmem:[#allocation8 + $0x68] sm:$0xff]   ;;  %vm1406_vm1 = vcmask 523264   ;;  %v1492_v30 = vlaneseq }
 0x1f6   : > { %v9284_v1 = vld [vmem:[#allocation8 + $0x38] sm:$0xff]   ;;  %8870 = vmatprep.subr.bf16.mxu1 %v10541_v2  ;;  %8730 = vmatprep.subr.bf16.mxu0 %v9283_v0  ;;  %v9286_v4 = vld [vmem:[#allocation8 + $0x30] sm:$0xff]   ;;  %v9288_v6 = vld [vmem:[#allocation8 + $0x28] sm:$0xff]  }
 0x1f7   : > { %8878 = vmatprep.mubr.msk.bf16.mxu1 %vm10542_vm0, %v10541_v2  ;;  %8731 = vmatpush3.bf16.msra.mxu0 %v9284_v1  ;;  %v9289_v7 = vld [vmem:[#allocation8 + $0x60] sm:$0xff]   ;;  %v9293_v8 = vld [vmem:[#allocation8 + $0x98] sm:$0xff]   ;;  %v9296_v11 = vld [vmem:[#allocation8 + $0x90] sm:$0xff]   ;;  %v1493_v31 = vshrl.u32 %v1492_v30, 7 }
 0x1f8   : > { %8732 = vmatprep.subr.bf16.mxu0 %v9285_v3  ;;  %v9290_v9 = vld [vmem:[#allocation8 + $0x20] sm:$0xff]   ;;  %v9291_v10 = vld [vmem:[#allocation8 + $0x58] sm:$0xff]   ;;  %8871 = vmatpush3.bf16.msra.mxu1 %v9293_v8  ;;  %v9294_v13 = vld [vmem:[#allocation8 + $0x50] sm:$0xff]  }
 0x1f9   : > { %8872 = vmatprep.subr.bf16.mxu1 %v10541_v2  ;;  %v9292_v12 = vld [vmem:[#allocation8 + $0x18] sm:$0xff]   ;;  %v9299_v14 = vld [vmem:[#allocation8 + $0x88] sm:$0xff]   ;;  %v9295_v15 = vld [vmem:[#allocation8 + $0x10] sm:$0xff]   ;;  %v1495_v32 = vcvt.s32.f32 %v1493_v31  ;;  %v1494_v33 = vadd.s32 8, %v1493_v31 }
 0x1fa   : > { %v9297_v16 = vld [vmem:[#allocation8 + $0x48] sm:$0xff]   ;;  %v9302_v17 = vld [vmem:[#allocation8 + $0x80] sm:$0xff]   ;;  %v1234_v19 = vld [vmem:[#allocation3 + $0x20] sm:$0x3] }
 0x1fb   : > { %8733 = vmatpush3.bf16.msra.mxu0 %v9286_v4  ;;  %v1231_v18 = vld [vmem:[#allocation3 + $0x8] sm:$0xff]  ;;  %v1232_v21 = vld [vmem:[#allocation3 + $0x10] sm:$0xff]  ;;  %v1230_v27 = vld [vmem:[#allocation3] sm:$0xff]  ;;  %v1497_v34 = vadd.f32 0.5, %v1495_v32  ;;  %v1496_v35 = vcvt.s32.f32 %v1494_v33 }
 0x1fc   : > { %8734 = vmatprep.subr.bf16.mxu0 %v9287_v5  ;;  %8873 = vmatpush3.bf16.msra.mxu1 %v9296_v11  ;;  %v1277_v20 = vpack.c.bf16 %v1234_v19, %v1231_v18  ;;  %v1235_v22 = vld [vmem:[#allocation3 + $0x28] sm:$0x3]  ;;  %v9298_v23 = vld [vmem:[#allocation8 + $0x8] sm:$0xff]   ;;  %v9300_v25 = vld [vmem:[#allocation8 + $0x40] sm:$0xff]  }
 0x1fd   : > { %8874 = vmatprep.subr.bf16.mxu1 %v10541_v2  ;;  %v1278_v24 = vpack.c.bf16 %v1235_v22, %v1232_v21  ;;  %v9301_v26 = vld [vmem:[#allocation8] sm:$0xff]   ;;  %v1233_v28 = vld [vmem:[#allocation3 + $0x18] sm:$0x3]  ;;  %v1499_v37 = vmul.f32 0.2, %v1497_v34  ;;  %v1498_v38 = vadd.f32 0.5, %v1496_v35 }
 0x1fe   : > { %1442 = vmatprep.mubr.bf16.mxu0 %v1277_v20  ;;  %v1276_v29 = vpack.c.bf16 %v1233_v28, %v1230_v27  ;;  %v8346_v45 = vld [vmem:[#allocation9] ss:$0 sm:$0xff]  ;;  %v8368_v52 = vld [vmem:[#allocation11] ss:$0 sm:$0xff] }
 0x1ff   : > { %8735 = vmatpush3.bf16.msra.mxu0 %v9288_v6  ;;  %v1501_v41 = vfloor.f32 %v1499_v37  ;;  %v1500_v42 = vmul.f32 0.2, %v1498_v38 }
 0x200   : > { %8736 = vmatprep.subr.bf16.mxu0 %v9289_v7  ;;  %8875 = vmatpush3.bf16.msra.mxu1 %v9299_v14 }
 0x201   : > { %8876 = vmatprep.subr.bf16.mxu1 %v10541_v2  ;;  %v1503_v47 = vmul.f32 5.0, %v1501_v41  ;;  %v1502_v48 = vfloor.f32 %v1500_v42 }
 0x203   : > { %8737 = vmatpush3.bf16.msra.mxu0 %v9290_v9  ;;  %vm1505_vm2 = vcmp.eq.f32.partialorder %v1495_v32, %v1503_v47  ;;  %v1504_v54 = vmul.f32 5.0, %v1502_v48 }
 0x204   : > { %8738 = vmatprep.subr.bf16.mxu0 %v9291_v10  ;;  %8877 = vmatpush3.bf16.msra.mxu1 %v9302_v17 }
 0x205   : > { %vm1506_vm3 = vcmp.eq.f32.partialorder %v1496_v35, %v1504_v54 }
 0x207   : > { %8739 = vmatpush3.bf16.msra.mxu0 %v9292_v12  ;;  %8879 = vmatmul.mubr.msk.bf16.vlgmr.msra.gmra.mxu1 %vm1406_vm1, %v1278_v24 }
 0x208   : > { %8740 = vmatprep.subr.bf16.mxu0 %v9294_v13 }
 0x20b   : > { %8741 = vmatpush3.bf16.msra.mxu0 %v9295_v15 }
 0x20c   : > { %8742 = vmatprep.subr.bf16.mxu0 %v9297_v16 }
 0x20f   : > { %8743 = vmatpush3.bf16.msra.mxu0 %v9298_v23 }
 0x210   : > { %8744 = vmatprep.subr.bf16.mxu0 %v9300_v25 }
 0x213   : > { %8745 = vmatpush3.bf16.msra.mxu0 %v9301_v26 }
 0x216   : > { %1443 = vmatmul.mubr.bf16.vlgmr.msra.gmra.mxu0 %v1276_v29 }
 0x2c7   : > { %v1485_v36 = vpop.f32.mrf.mxu1 }
 0x2c9   : > { %v8880_v39 = vpop.f32.mrf.mxu1 }
 0x2cb   : > { %v1488_v40 = vpop.f32.mrf.mxu1 }
 0x2cd   : > { %v8881_v43 = vpop.f32.mrf.mxu1 }
 0x2d6   : > { %v8746_v44 = vpop.f32.mrf.mxu0 }
 0x2d8   : > { %v8747_v46 = vpop.f32.mrf.mxu0 }
 0x2d9   : > { %v8748_v49 = vadd.f32 %v8747_v46, %v8746_v44 }
 0x2da   : > { %v8749_v50 = vpop.f32.mrf.mxu0 }
 0x2db   : > { %v1445_v51 = vadd.f32 %v8748_v49, %v8346_v45 }
 0x2dc   : > { %v8750_v53 = vpop.f32.mrf.mxu0 }
 0x2dd   : > { %v1486_v55 = vadd.f32 %v1485_v36, %v1445_v51  ;;  %v8751_v56 = vadd.f32 %v8750_v53, %v8749_v50 }
 0x2df   : > { %v1514_v57 = vsel %vm1505_vm2, %v8368_v52, %v1486_v55  ;;  %v1448_v58 = vadd.f32 %v8751_v56, %v8346_v45 }
 0x2e0   : > { %1516 = vst [vmem:[#allocation2] sm:$0xff] %v1514_v57 }
 0x2e1   : > { %v1489_v59 = vadd.f32 %v1488_v40, %v1448_v58 }
 0x2e3   : > { %v1515_v60 = vsel %vm1506_vm3, %v8368_v52, %v1489_v59 }
 0x2e4   : > { %1517 = vst [vmem:[#allocation2 + $0x8] sm:$0x3] %v1515_v60 }
 0x2e5 PF: > { %vm1543_vm4 = vcmask 1041408   ;;  %v9303_v3 = vld [vmem:[%s11179_s2 + $0xac] ss:$12 sps:$4 sm:$0xff]   ;;  %v9305_v4 = vld [vmem:[%s11179_s2 + $0xa8] ss:$12 sps:$4 sm:$0xff]   ;;  %v10543_v6 = vmov 0.0   ;;  %v1518_v56 = vlaneseq }
 0x2e6   : > { %v9306_v5 = vld [vmem:[%s11179_s2 + $0xb0] ss:$12 sps:$4 sm:$0xff]   ;;  %1747 = vmatprep.subr.bf16.mxu0 %v9303_v3  ;;  %8882 = vmatprep.subr.bf16.mxu1 %v10543_v6  ;;  %v9307_v7 = vld [vmem:[%s11179_s2 + $0x94] ss:$12 sps:$4 sm:$0xff]   ;;  %v9310_v9 = vld [vmem:[%s11179_s2 + $0x98] ss:$12 sps:$4 sm:$0xff]  }
 0x2e7   : > { %v11227_v61 = vld [vmem:[#allocation2] sm:$0xff]  ;;  %1748 = vmatpush1.bf16.msra.mxu0 %v9305_v4  ;;  %8883 = vmatpush3.bf16.msra.mxu1 %v9306_v5  ;;  %v9313_v11 = vld [vmem:[%s11179_s2 + $0x78] ss:$12 sps:$4 sm:$0xff]   ;;  %v9318_v15 = vld [vmem:[%s11179_s2 + $0x68] ss:$12 sps:$4 sm:$0xff]   ;;  %v10544_v23 = vmov 0  }
 0x2e8   : > { %1541 = vadd.xlane.f32.xlu0 %v11227_v61  ;;  %v1549_v63 = vmul.f32 %v11227_v61, %v11227_v61  ;;  %8884 = vmatprep.subr.bf16.mxu1 %v10543_v6  ;;  %v9309_v8 = vld [vmem:[%s11179_s2 + $0x90] ss:$12 sps:$4 sm:$0xff]   ;;  %v9314_v12 = vld [vmem:[%s11179_s2 + $0x80] ss:$12 sps:$4 sm:$0xff]   ;;  %v9321_v17 = vld [vmem:[%s11179_s2 + $0x48] ss:$12 sps:$4 sm:$0xff]  }
 0x2e9   : > { %1749 = vmatprep.subr.bf16.mxu0 %v9307_v7  ;;  %v9311_v10 = vld [vmem:[%s11179_s2 + $0x7c] ss:$12 sps:$4 sm:$0xff]   ;;  %v9315_v13 = vld [vmem:[%s11179_s2 + $0x64] ss:$12 sps:$4 sm:$0xff]   ;;  %v9317_v14 = vld [vmem:[%s11179_s2 + $0x60] ss:$12 sps:$4 sm:$0xff]   ;;  %1779 = vmatprep.mubr.bf16.mxu0 %v10544_v23 }
 0x2ea   : > { %1551 = vadd.xlane.f32.xlu1 %v1549_v63  ;;  %v9319_v16 = vld [vmem:[%s11179_s2 + $0x4c] ss:$12 sps:$4 sm:$0xff]   ;;  %v9322_v18 = vld [vmem:[%s11179_s2 + $0x50] ss:$12 sps:$4 sm:$0xff]   ;;  %v9323_v19 = vld [vmem:[%s11179_s2 + $0x34] ss:$12 sps:$4 sm:$0xff]  }
 0x2eb   : > { %v11229_v62 = vld [vmem:[#allocation2 + $0x8] sm:$0x3]  ;;  %1750 = vmatpush1.bf16.msra.mxu0 %v9309_v8  ;;  %8885 = vmatpush3.bf16.msra.mxu1 %v9310_v9  ;;  %v9325_v20 = vld [vmem:[%s11179_s2 + $0x30] ss:$12 sps:$4 sm:$0xff]   ;;  %vm10545_vm5 = vmmov 0   ;;  %v11279_v57 = vand.u32 127, %v1518_v56 }
 0x2ec   : > { %v1550_v0 = vmul.f32 %v11229_v62, %v11229_v62  ;;  %v1544_v1 = vsel %vm1543_vm4, %v11229_v62, 0.0  ;;  %8886 = vmatprep.subr.bf16.mxu1 %v10543_v6  ;;  %1751 = vmatprep.subr.bf16.mxu0 %v9311_v10  ;;  %v9326_v21 = vld [vmem:[%s11179_s2 + $0x38] ss:$12 sps:$4 sm:$0xff]   ;;  %v9327_v22 = vld [vmem:[%s11179_s2 + $0x1c] ss:$12 sps:$4 sm:$0xff]   ;;  %v11319_v4 = vshrl.u32 %v1518_v56, 7 }
 0x2ed   : > { %1545 = vadd.xlane.f32.xlu0 %v1544_v1  ;;  %8898 = vmatprep.mubr.msk.bf16.mxu1 %vm10545_vm5, %v10543_v6  ;;  %v9329_v24 = vld [vmem:[%s11179_s2 + $0x18] ss:$12 sps:$4 sm:$0xff]   ;;  %v9330_v25 = vld [vmem:[%s11179_s2 + $0x20] ss:$12 sps:$4 sm:$0xff]   ;;  %v9334_v28 = vld [vmem:[%s11179_s2 + $0x8] ss:$12 sps:$4 sm:$0xff]   ;;  %v1525_v8 = vcvt.s32.f32 %v11279_v57 }
 0x2ee   : > { %v1553_v2 = vsel %vm1543_vm4, %v1550_v0, 0.0  ;;  %v9331_v26 = vld [vmem:[%s11179_s2 + $0x4] ss:$12 sps:$4 sm:$0xff]   ;;  %v9333_v27 = vld [vmem:[%s11179_s2] ss:$12 sps:$4 sm:$0xff]   ;;  %vm1832_vm6 = vcmp.lt.s32.totalorder %v11279_v57, 32  ;;  %v1521_v9 = vcvt.s32.f32 %v11319_v4 }
 0x2ef   : > { %1554 = vadd.xlane.f32.xlu1 %v1553_v2  ;;  %1752 = vmatpush1.bf16.msra.mxu0 %v9313_v11  ;;  %v8369_v46 = vld [vmem:[%s1024_s26] ss:$0 sm:$0xff]  ;;  %v1520_v5 = vadd.s32 8, %v11319_v4  ;;  %v1532_v11 = vadd.f32 0.5, %v1525_v8  ;;  %vm1919_vm8 = vcmask 74752   ;;  %vm1915_vm10 = vcmask 80896  }
 0x2f0   : > { %8887 = vmatpush3.bf16.msra.mxu1 %v9314_v12  ;;  %1753 = vmatprep.subr.bf16.mxu0 %v9315_v13  ;;  %v8370_v51 = vld [vmem:[%s1032_s6] ss:$0 sm:$0xff]  ;;  %v1526_v12 = vadd.f32 0.5, %v1521_v9  ;;  %vm2027_vm11 = vcmp.ge.s32.totalorder %v11279_v57, 32  ;;  %vm2028_vm12 = vcmp.lt.s32.totalorder %v11279_v57, 64  ;;  %vm2218_vm14 = vcmp.ge.s32.totalorder %v11279_v57, 64 }
 0x2f1   : > { %8888 = vmatprep.subr.bf16.mxu1 %v10543_v6  ;;  %v1522_v7 = vcvt.s32.f32 %v1520_v5  ;;  %vm11342_vm13 = vmand %vm2027_vm11, %vm2028_vm12  ;;  %vm2219_vm15 = vcmp.lt.s32.totalorder %v11279_v57, 96  ;;  %vm2409_vm1 = vcmp.ge.s32.totalorder %v11279_v57, 96  ;;  %s12186_s16 = sld [smem:[#allocation51_spill]] }
 0x2f2   : > { %vm11357_vm0 = vmand %vm2218_vm14, %vm2219_vm15 }
 0x2f3   : > { %1754 = vmatpush1.bf16.msra.mxu0 %v9317_v14  ;;  %v1527_v10 = vadd.f32 0.5, %v1522_v7  ;;  %v1533_v14 = vmul.f32 0.2, %v1532_v11 }
 0x2f4   : > { %8889 = vmatpush3.bf16.msra.mxu1 %v9318_v15  ;;  %1755 = vmatprep.subr.bf16.mxu0 %v9319_v16  ;;  %v1528_v15 = vmul.f32 0.2, %v1526_v12 }
 0x2f5   : > { %8890 = vmatprep.subr.bf16.mxu1 %v10543_v6  ;;  %v1529_v13 = vmul.f32 0.2, %v1527_v10 }
 0x2f7   : > { %1756 = vmatpush1.bf16.msra.mxu0 %v9321_v17  ;;  %v1531_v16 = vfloor.f32 %v1529_v13  ;;  %v1534_v17 = vfloor.f32 %v1533_v14  ;;  %p8444_p3 = scmp.ne.s32.totalorder %s12186_s16, 3 }
 0x2f8   : > { %8891 = vmatpush3.bf16.msra.mxu1 %v9322_v18  ;;  %1757 = vmatprep.subr.bf16.mxu0 %v9323_v19  ;;  %v1530_v18 = vfloor.f32 %v1528_v15  ;;  %s12187_s30 = sld [smem:[#allocation67_spill]] (!%p8444_p3) }
 0x2f9   : > { %8892 = vmatprep.subr.bf16.mxu1 %v10543_v6  ;;  %vm11324_vm7 = vcmp.eq.f32.partialorder %v1531_v16, %v1534_v17  ;;  %s12189_s19 = sld [smem:[#allocation69_spill]] (!%p8444_p3) }
 0x2fa   : > { %vm11328_vm9 = vcmp.eq.f32.partialorder %v1530_v18, %v1534_v17  ;;  %s12190_s17 = sld [smem:[#allocation70_spill]] (!%p8444_p3) }
 0x2fb   : > { %1758 = vmatpush1.bf16.msra.mxu0 %v9325_v20  ;;  %s12191_s20 = sld [smem:[#allocation71_spill]] (!%p8444_p3) }
 0x2fc   : > { %8893 = vmatpush3.bf16.msra.mxu1 %v9326_v21  ;;  %1759 = vmatprep.subr.bf16.mxu0 %v9327_v22  ;;  %s12192_s29 = sld [smem:[#allocation72_spill]] (!%p8444_p3) }
 0x2fd   : > { %8894 = vmatprep.subr.bf16.mxu1 %v10543_v6 }
 0x2fe   : > { %s12188_s26 = smov (!%p8444_p3), %s12187_s30 }
 0x2ff   : > { %1760 = vmatpush1.bf16.msra.mxu0 %v9329_v24 }
 0x300   : > { %8895 = vmatpush3.bf16.msra.mxu1 %v9330_v25  ;;  %1761 = vmatprep.subr.bf16.mxu0 %v9331_v26 }
 0x301   : > { %8896 = vmatprep.subr.bf16.mxu1 %v10543_v6 }
 0x303   : > { %1762 = vmatpush1.bf16.msra.mxu0 %v9333_v27 }
 0x304   : > { %8897 = vmatpush3.bf16.msra.mxu1 %v9334_v28 }
 0x371   : > { %v1542_v29 = vpop.xlane.xlu0 %1541 }
 0x372   : > { %v1547_v30 = vmul.f32 0.01, %v1542_v29 }
 0x373   : > { %v1552_v31 = vpop.xlane.xlu1 %1551 }
 0x374   : > { %v1558_v32 = vmul.f32 %v1547_v30, %v1547_v30  ;;  %v1556_v33 = vmul.f32 0.01, %v1552_v31  ;;  %v1562_v43 = vsub.f32 %v11227_v61, %v1547_v30 }
 0x376   : > { %v1546_v34 = vpop.xlane.xlu0 %1545  ;;  %v1560_v35 = vsub.f32 %v1556_v33, %v1558_v32 }
 0x377   : > { %v1548_v36 = vmul.f32 0.01, %v1546_v34 }
 0x378   : > { %v1555_v37 = vpop.xlane.xlu1 %1554  ;;  %v1564_v38 = vadd.f32 1e-05, %v1560_v35 }
 0x379   : > { %v1559_v39 = vmul.f32 %v1548_v36, %v1548_v36  ;;  %v1557_v40 = vmul.f32 0.01, %v1555_v37  ;;  %v1563_v47 = vsub.f32 %v11229_v62, %v1548_v36 }
 0x37a   : > { %9359 = vrsqrt.f32 %v1564_v38 }
 0x37b   : > { %v1561_v41 = vsub.f32 %v1557_v40, %v1559_v39 }
 0x37d   : > { %v1565_v42 = vadd.f32 1e-05, %v1561_v41 }
 0x37f   : > { %9361 = vrsqrt.f32 %v1565_v42 }
 0x387   : > { %v9360_v44 = vpop.eup %9359 }
 0x388   : > { %v1568_v45 = vmul.f32 %v9360_v44, %v1562_v43 }
 0x38a   : > { %v1576_v50 = vmul.f32 %v8369_v46, %v1568_v45 }
 0x38c   : > { %v9362_v48 = vpop.eup %9361  ;;  %v1584_v53 = vadd.f32 %v8370_v51, %v1576_v50 }
 0x38d   : > { %v1569_v49 = vmul.f32 %v9362_v48, %v1563_v47 }
 0x38f   : > { %v1577_v52 = vmul.f32 %v8369_v46, %v1569_v49 }
 0x391   : > { %v1585_v54 = vadd.f32 %v8370_v51, %v1577_v52 }
 0x393   : > { %v1618_v55 = vpack.c.bf16 %v1585_v54, %v1584_v53 }
 0x395   : > { %1780 = vmatmul.mubr.bf16.vlgmr.msra.gmra.mxu0 %v1618_v55  ;;  %8899 = vmatmul.mubr.bf16.vlgmr.msra.gmra.mxu1 %v1618_v55 }
 0x455   : > { %v11282_v58 = vpop.f32.mrf.mxu0  ;;  %v11284_v59 = vpop.f32.mrf.mxu1 }
 0x456   : > { %8906 = vmatprep.mubr.msk.f32.mxu0 %vm1832_vm6, %v11282_v58 }
 0x457   : > { %v11289_v60 = vpop.f32.mrf.mxu0  ;;  %v8900_v63 = vpop.f32.mrf.mxu1 }
 0x459   : > { %v11291_v0 = vpop.f32.mrf.mxu0  ;;  %v11293_v1 = vpop.f32.mrf.mxu1 }
 0x45a   : > { %8923 = vmatprep.subr.msk.mxu1 %vm1543_vm4, %v11293_v1 }
 0x45b   : > { %v11297_v2 = vpop.f32.mrf.mxu0  ;;  %v8901_v3 = vpop.f32.mrf.mxu1  ;;  %8924 = vmatpush3.msk.msra.mxu1 %vm1543_vm4, %v11293_v1 }
 0x45c   : > { %8902 = vmatprep.subr.mxu0 %v11297_v2  ;;  %8925 = vmatprep.subr.mxu1 %v11284_v59 }
 0x45d   : > { %8903 = vmatpush3.xpose.msra.mxu0 %v11297_v2  ;;  %8926 = vmatpush3.msra.mxu1 %v11284_v59 }
 0x45e   : > { %8904 = vmatprep.subr.mxu0 %v11289_v60  ;;  %8951 = vmatprep.subr.msk.mxu1 %vm1543_vm4, %v11293_v1 }
 0x461   : > { %8905 = vmatpush3.xpose.msra.mxu0 %v11289_v60 }
 0x462   : > { %8909 = vmatprep.subr.msk.mxu0 %vm1543_vm4, %v11293_v1 }
 0x464   : > { %8907 = vmatmul.mubr.msk.f32.vlgmr.msra.gmra.mxu0 %vm1832_vm6, %v11291_v0 }
 0x465   : > { %8910 = vmatpush3.msk.msra.mxu0 %vm1543_vm4, %v11293_v1 }
 0x466   : > { %8911 = vmatprep.subr.mxu0 %v11284_v59 }
 0x467   : > { %8912 = vmatpush3.msra.mxu0 %v11284_v59 }
 0x468   : > { %8916 = vmatprep.subr.mxu0 %v11297_v2 }
 0x524   : > { %v8908_v19 = vpop.f32.mrf.mxu0 }
 0x525   : > { %v1912_v21 = vmul.f32 0.1, %v8908_v19 }
 0x526   : > { %v1902_v22 = vpop.f32.mrf.mxu0 }
 0x527   : > { %v1911_v24 = vmul.f32 0.1, %v1902_v22  ;;  %v1914_v25 = vsel %vm11324_vm7, %v1912_v21, -1e+30 }
 0x528   : > { %v1920_v26 = vsel %vm1919_vm8, %v1914_v25, -inf }
 0x529   : > { %1921 = vmax.xlane.f32.xlu1 %v1920_v26  ;;  %v1913_v27 = vsel %vm11328_vm9, %v1911_v24, -1e+30 }
 0x52a   : > { %v1916_v28 = vsel %vm1915_vm10, %v1913_v27, -inf }
 0x52b   : > { %1917 = vmax.xlane.f32.xlu0 %v1916_v28 }
 0x5b2   : > { %v1922_v29 = vpop.xlane.xlu1 %1921 }
 0x5b3   : > { %v1924_v30 = vsub.f32 %v1914_v25, %v1922_v29 }
 0x5b4   : > { %v1918_v31 = vpop.xlane.xlu0 %1917 }
 0x5b5   : > { %v1927_v32 = vmul.f32 1.442695, %v1924_v30  ;;  %v1923_v33 = vsub.f32 %v1913_v27, %v1918_v31 }
 0x5b7   : > { %9363 = vpow2.f32 %v1927_v32  ;;  %v1925_v34 = vmul.f32 1.442695, %v1923_v33 }
 0x5b9   : > { %9365 = vpow2.f32 %v1925_v34 }
 0x5c4   : > { %v9364_v35 = vpop.eup %9363 }
 0x5c5   : > { %v1932_v36 = vsel %vm1919_vm8, %v9364_v35, 0.0 }
 0x5c6   : > { %v9366_v37 = vpop.eup %9365  ;;  %1933 = vadd.xlane.f32.xlu1 %v1932_v36 }
 0x5c7   : > { %v1929_v38 = vsel %vm1915_vm10, %v9366_v37, 0.0 }
 0x5c8   : > { %1930 = vadd.xlane.f32.xlu0 %v1929_v38 }
 0x64f   : > { %v1934_v39 = vpop.xlane.xlu1 %1933 }
 0x650   : > { %9367 = vrcp.f32 %v1934_v39 }
 0x651   : > { %v1931_v40 = vpop.xlane.xlu0 %1930 }
 0x652   : > { %9369 = vrcp.f32 %v1931_v40 }
 0x65d   : > { %v9368_v41 = vpop.eup %9367 }
 0x65e   : > { %v1938_v44 = vmul.f32 %v9368_v41, %v9364_v35 }
 0x65f   : > { %v9370_v42 = vpop.eup %9369 }
 0x660   : > { %v1937_v43 = vmul.f32 %v9370_v42, %v9366_v37 }
 0x662   : > { %8913 = vmatprep.mubr.msk.f32.mxu0 %vm1915_vm10, %v1937_v43 }
 0x663   : > { %8914 = vmatmul.mubr.msk.f32.vlgmr.msra.gmra.mxu0 %vm1915_vm10, %v1938_v44 }
 0x664   : > { %8917 = vmatpush3.xpose.msra.mxu0 %v11297_v2  ;;  %8920 = vmatprep.mubr.msk.f32.mxu0 %vm11342_vm13, %v11282_v58 }
 0x665   : > { %8918 = vmatprep.subr.mxu0 %v11289_v60 }
 0x668   : > { %8919 = vmatpush3.xpose.msra.mxu0 %v11289_v60 }
 0x669   : > { %8930 = vmatprep.subr.mxu0 %v11297_v2 }
 0x66b   : > { %8921 = vmatmul.mubr.msk.f32.vlgmr.msra.gmra.mxu0 %vm11342_vm13, %v11291_v0 }
 0x66c   : > { %8931 = vmatpush3.xpose.msra.mxu0 %v11297_v2  ;;  %8934 = vmatprep.mubr.msk.f32.mxu0 %vm11357_vm0, %v11282_v58 }
 0x66d   : > { %8932 = vmatprep.subr.mxu0 %v11289_v60 }
 0x670   : > { %8933 = vmatpush3.xpose.msra.mxu0 %v11289_v60 }
 0x671   : > { %8937 = vmatprep.subr.msk.mxu0 %vm1543_vm4, %v11293_v1 }
 0x673   : > { %8935 = vmatmul.mubr.msk.f32.vlgmr.msra.gmra.mxu0 %vm11357_vm0, %v11291_v0 }
 0x674   : > { %8938 = vmatpush3.msk.msra.mxu0 %vm1543_vm4, %v11293_v1 }
 0x675   : > { %8939 = vmatprep.subr.mxu0 %v11284_v59 }
 0x676   : > { %8940 = vmatpush3.msra.mxu0 %v11284_v59 }
 0x677   : > { %8944 = vmatprep.subr.mxu0 %v11297_v2 }
 0x723   : > { %v11380_v47 = vpop.f32.mrf.mxu0 }
 0x725   : > { %v11382_v48 = vpop.f32.mrf.mxu0 }
 0x72b   : > { %v8922_v49 = vpop.f32.mrf.mxu0 }
 0x72c   : > { %v2108_v12 = vmul.f32 0.1, %v8922_v49 }
 0x72d   : > { %v2098_v50 = vpop.f32.mrf.mxu0 }
 0x72e   : > { %v2107_v14 = vmul.f32 0.1, %v2098_v50  ;;  %v2110_v17 = vsel %vm11324_vm7, %v2108_v12, -1e+30 }
 0x72f   : > { %v2114_v21 = vsel %vm1919_vm8, %v2110_v17, -inf }
 0x730   : > { %v2109_v19 = vsel %vm11328_vm9, %v2107_v14, -1e+30 }
 0x731   : > { %v2111_v22 = vsel %vm1915_vm10, %v2109_v19, -inf }
 0x733   : > { %v8936_v51 = vpop.f32.mrf.mxu0 }
 0x734   : > { %v2299_v52 = vmul.f32 0.1, %v8936_v51 }
 0x735   : > { %v2289_v53 = vpop.f32.mrf.mxu0 }
 0x736   : > { %v2298_v54 = vmul.f32 0.1, %v2289_v53  ;;  %v2301_v55 = vsel %vm11324_vm7, %v2299_v52, -1e+30 }
 0x737   : > { %v2305_v56 = vsel %vm1919_vm8, %v2301_v55, -inf }
 0x738   : > { %2306 = vmax.xlane.f32.xlu1 %v2305_v56  ;;  %v2300_v63 = vsel %vm11328_vm9, %v2298_v54, -1e+30 }
 0x739   : > { %v2302_v3 = vsel %vm1915_vm10, %v2300_v63, -inf }
 0x73a   : > { %2303 = vmax.xlane.f32.xlu0 %v2302_v3 }
 0x7c1   : > { %v2307_v5 = vpop.xlane.xlu1 %2306 }
 0x7c2   : > { %v2309_v7 = vsub.f32 %v2301_v55, %v2307_v5 }
 0x7c3   : > { %v2304_v8 = vpop.xlane.xlu0 %2303 }
 0x7c4   : > { %v2312_v9 = vmul.f32 1.442695, %v2309_v7  ;;  %v2308_v10 = vsub.f32 %v2300_v63, %v2304_v8 }
 0x7c6   : > { %9371 = vpow2.f32 %v2312_v9  ;;  %v2310_v11 = vmul.f32 1.442695, %v2308_v10 }
 0x7c8   : > { %9373 = vpow2.f32 %v2310_v11 }
 0x7d3   : > { %v9372_v13 = vpop.eup %9371 }
 0x7d4   : > { %v2317_v15 = vsel %vm1919_vm8, %v9372_v13, 0.0 }
 0x7d5   : > { %v9374_v16 = vpop.eup %9373  ;;  %2318 = vadd.xlane.f32.xlu1 %v2317_v15 }
 0x7d6   : > { %v2314_v18 = vsel %vm1915_vm10, %v9374_v16, 0.0 }
 0x7d7   : > { %2315 = vadd.xlane.f32.xlu0 %v2314_v18  ;;  %v9338_v18 = vld [vmem:[%s11186_s18 + $0x20] sm:$0xff]  }
 0x7d9   : > { %2115 = vmax.xlane.f32.xlu1 %v2114_v21  ;;  %v9340_v21 = vld [vmem:[%s11186_s18 + $0x10] sm:$0xff]  }
 0x7db   : > { %2112 = vmax.xlane.f32.xlu0 %v2111_v22 }
 0x85e   : > { %v2319_v24 = vpop.xlane.xlu1 %2318 }
 0x85f   : > { %9375 = vrcp.f32 %v2319_v24  ;;  %v2024_v24 = vsel %vm1832_vm6, %v11380_v47, 0.0 }
 0x860   : > { %v2316_v25 = vpop.xlane.xlu0 %2315 }
 0x861   : > { %9377 = vrcp.f32 %v2316_v25 }
 0x862   : > { %v2116_v30 = vpop.xlane.xlu1 %2115 }
 0x864   : > { %v2113_v31 = vpop.xlane.xlu0 %2112 }
 0x865   : > { %v2117_v32 = vsub.f32 %v2109_v19, %v2113_v31  ;;  %v9339_v19 = vld [vmem:[%s11186_s18 + $0x18] sm:$0xff]  }
 0x867   : > { %v2119_v34 = vmul.f32 1.442695, %v2117_v32 }
 0x86c   : > { %v9376_v26 = vpop.eup %9375 }
 0x86d   : > { %v2323_v29 = vmul.f32 %v9376_v26, %v9372_v13 }
 0x86e   : > { %v9378_v27 = vpop.eup %9377 }
 0x86f   : > { %v2322_v28 = vmul.f32 %v9378_v27, %v9374_v16  ;;  %v9335_v16 = vld [vmem:[%s11186_s18 + $0x38] sm:$0xff]  }
 0x871   : > { %8941 = vmatprep.mubr.msk.f32.mxu0 %vm1915_vm10, %v2322_v28  ;;  %v2023_v28 = vsel %vm1832_vm6, %v11382_v48, 0.0  ;;  %v9342_v48 = vld [vmem:[%s11186_s18] sm:$0xff]  }
 0x872   : > { %8942 = vmatmul.mubr.msk.f32.vlgmr.msra.gmra.mxu0 %vm1915_vm10, %v2323_v29 }
 0x873   : > { %8945 = vmatpush3.xpose.msra.mxu0 %v11297_v2  ;;  %8948 = vmatprep.mubr.msk.f32.mxu0 %vm2409_vm1, %v11282_v58  ;;  %v2118_v2 = vsub.f32 %v2110_v17, %v2116_v30 }
 0x874   : > { %8946 = vmatprep.subr.mxu0 %v11289_v60 }
 0x875   : > { %v2121_v33 = vmul.f32 1.442695, %v2118_v2 }
 0x877   : > { %8947 = vmatpush3.xpose.msra.mxu0 %v11289_v60  ;;  %9379 = vpow2.f32 %v2121_v33  ;;  %v9341_v33 = vld [vmem:[%s11186_s18 + $0x8] sm:$0xff]  }
 0x878   : > { %8978 = vmatprep.subr.bf16.mxu0 %v10543_v6  ;;  %9381 = vpow2.f32 %v2119_v34 }
 0x87a   : > { %8949 = vmatmul.mubr.msk.f32.vlgmr.msra.gmra.mxu0 %vm2409_vm1, %v11291_v0 }
 0x87b   : > { %8994 = vmatprep.mubr.msk.bf16.mxu0 %vm10545_vm5, %v10543_v6 }
 0x884   : > { %v9380_v40 = vpop.eup %9379 }
 0x885   : > { %v9382_v43 = vpop.eup %9381  ;;  %v2126_v44 = vsel %vm1919_vm8, %v9380_v40, 0.0 }
 0x886   : > { %v2123_v49 = vsel %vm1915_vm10, %v9382_v43, 0.0 }
 0x932   : > { %v11413_v58 = vpop.f32.mrf.mxu0 }
 0x933   : > { %v2406_v29 = vsel %vm11357_vm0, %v11413_v58, 0.0 }
 0x934   : > { %v11415_v60 = vpop.f32.mrf.mxu0 }
 0x935   : > { %v2405_v47 = vsel %vm11357_vm0, %v11415_v60, 0.0 }
 0x93a   : > { %v8950_v35 = vpop.f32.mrf.mxu0 }
 0x93b   : > { %v2490_v36 = vmul.f32 0.1, %v8950_v35 }
 0x93c   : > { %v2480_v37 = vpop.f32.mrf.mxu0 }
 0x93d   : > { %v2489_v38 = vmul.f32 0.1, %v2480_v37  ;;  %v2492_v0 = vsel %vm11324_vm7, %v2490_v36, -1e+30 }
 0x93e   : > { %v2496_v39 = vsel %vm1919_vm8, %v2492_v0, -inf }
 0x93f   : > { %2497 = vmax.xlane.f32.xlu1 %v2496_v39  ;;  %v2491_v41 = vsel %vm11328_vm9, %v2489_v38, -1e+30  ;;  %v8423_v38 = vld [vmem:[%s1058_s0] ss:$0 sm:$0xff] }
 0x940   : > { %v2493_v42 = vsel %vm1915_vm10, %v2491_v41, -inf }
 0x941   : > { %2494 = vmax.xlane.f32.xlu0 %v2493_v42 }
 0x943   : > { %2127 = vadd.xlane.f32.xlu1 %v2126_v44 }
 0x945   : > { %2124 = vadd.xlane.f32.xlu0 %v2123_v49 }
 0x9c8   : > { %v2498_v50 = vpop.xlane.xlu1 %2497 }
 0x9c9   : > { %v2500_v20 = vsub.f32 %v2492_v0, %v2498_v50 }
 0x9ca   : > { %v2495_v51 = vpop.xlane.xlu0 %2494 }
 0x9cb   : > { %v2503_v52 = vmul.f32 1.442695, %v2500_v20  ;;  %v2499_v53 = vsub.f32 %v2491_v41, %v2495_v51  ;;  %v9343_v20 = vld [vmem:[%s11201_s3 + $0x38] sm:$0xff]   ;;  %v9344_v51 = vld [vmem:[%s11201_s3 + $0x30] sm:$0xff]  }
 0x9cc   : > { %v2128_v54 = vpop.xlane.xlu1 %2127  ;;  %8979 = vmatpush3.bf16.msra.mxu0 %v9343_v20 }
 0x9cd   : > { %9383 = vpow2.f32 %v2503_v52  ;;  %v2501_v55 = vmul.f32 1.442695, %v2499_v53  ;;  %8980 = vmatprep.subr.bf16.mxu0 %v10543_v6  ;;  %v9345_v52 = vld [vmem:[%s11201_s3 + $0x28] sm:$0xff]   ;;  %v9346_v53 = vld [vmem:[%s11201_s3 + $0x20] sm:$0xff]  }
 0x9ce   : > { %9385 = vrcp.f32 %v2128_v54  ;;  %v2125_v23 = vpop.xlane.xlu0 %2124  ;;  %v9347_v54 = vld [vmem:[%s11201_s3 + $0x18] sm:$0xff]  }
 0x9cf   : > { %9387 = vpow2.f32 %v2501_v55  ;;  %v9348_v55 = vld [vmem:[%s11201_s3 + $0x10] sm:$0xff]  }
 0x9d0   : > { %9389 = vrcp.f32 %v2125_v23  ;;  %8981 = vmatpush3.bf16.msra.mxu0 %v9344_v51  ;;  %v9349_v23 = vld [vmem:[%s11201_s3 + $0x8] sm:$0xff]  }
 0x9d1   : > { %8982 = vmatprep.subr.bf16.mxu0 %v10543_v6 }
 0x9d4   : > { %8983 = vmatpush3.bf16.msra.mxu0 %v9345_v52  ;;  %v8443_v52 = vld [vmem:[%s1108_s8] ss:$0 sm:$0xff] }
 0x9d5   : > { %8984 = vmatprep.subr.bf16.mxu0 %v10543_v6 }
 0x9d8   : > { %8985 = vmatpush3.bf16.msra.mxu0 %v9346_v53 }
 0x9d9   : > { %8986 = vmatprep.subr.bf16.mxu0 %v10543_v6 }
 0x9da   : > { %v9384_v56 = vpop.eup %9383 }
 0x9db   : > { %v9386_v63 = vpop.eup %9385  ;;  %v2508_v3 = vsel %vm1919_vm8, %v9384_v56, 0.0 }
 0x9dc   : > { %v9388_v5 = vpop.eup %9387  ;;  %2509 = vadd.xlane.f32.xlu1 %v2508_v3  ;;  %v2132_v10 = vmul.f32 %v9386_v63, %v9380_v40  ;;  %8987 = vmatpush3.bf16.msra.mxu0 %v9347_v54  ;;  %v9351_v63 = vld [vmem:[%s11209_s24 + $0x38] sm:$0xff]  }
 0x9dd   : > { %v9390_v7 = vpop.eup %9389  ;;  %v2505_v8 = vsel %vm1915_vm10, %v9388_v5, 0.0  ;;  %8988 = vmatprep.subr.bf16.mxu0 %v10543_v6 }
 0x9de   : > { %2506 = vadd.xlane.f32.xlu0 %v2505_v8  ;;  %v2131_v9 = vmul.f32 %v9390_v7, %v9382_v43 }
 0x9e0   : > { %8927 = vmatprep.mubr.msk.f32.mxu1 %vm1915_vm10, %v2131_v9  ;;  %8989 = vmatpush3.bf16.msra.mxu0 %v9348_v55 }
 0x9e1   : > { %8928 = vmatmul.mubr.msk.f32.vlgmr.msra.gmra.mxu1 %vm1915_vm10, %v2132_v10  ;;  %8990 = vmatprep.subr.bf16.mxu0 %v10543_v6 }
 0x9e2   : > { %8952 = vmatpush3.msk.msra.mxu1 %vm1543_vm4, %v11293_v1  ;;  %v9337_v1 = vld [vmem:[%s11186_s18 + $0x28] sm:$0xff]  }
 0x9e3   : > { %8953 = vmatprep.subr.mxu1 %v11284_v59 }
 0x9e4   : > { %8954 = vmatpush3.msra.mxu1 %v11284_v59  ;;  %v9336_v59 = vld [vmem:[%s11186_s18 + $0x30] sm:$0xff]   ;;  %8991 = vmatpush3.bf16.msra.mxu0 %v9349_v23 }
 0x9e5   : > { %8958 = vmatprep.subr.bf16.mxu1 %v10543_v6  ;;  %8992 = vmatprep.subr.bf16.mxu0 %v10543_v6 }
 0xa65   : > { %v2510_v11 = vpop.xlane.xlu1 %2509 }
 0xa66   : > { %9391 = vrcp.f32 %v2510_v11 }
 0xa67   : > { %v2507_v12 = vpop.xlane.xlu0 %2506 }
 0xa68   : > { %9393 = vrcp.f32 %v2507_v12 }
 0xa73   : > { %v9392_v13 = vpop.eup %9391 }
 0xa74   : > { %v2514_v17 = vmul.f32 %v9392_v13, %v9384_v56  ;;  %v9350_v56 = vld [vmem:[%s11201_s3] sm:$0xff]  }
 0xa75   : > { %v9394_v14 = vpop.eup %9393  ;;  %8993 = vmatpush3.bf16.msra.mxu0 %v9350_v56 }
 0xa76   : > { %v2513_v15 = vmul.f32 %v9394_v14, %v9388_v5 }
 0xa78   : > { %8955 = vmatprep.mubr.msk.f32.mxu1 %vm1915_vm10, %v2513_v15 }
 0xa79   : > { %8956 = vmatmul.mubr.msk.f32.vlgmr.msra.gmra.mxu1 %vm1915_vm10, %v2514_v17 }
 0xa7a   : > { %8959 = vmatpush3.bf16.msra.mxu1 %v9335_v16  ;;  %8974 = vmatprep.mubr.msk.bf16.mxu1 %vm10545_vm5, %v10543_v6 }
 0xa7b   : > { %8960 = vmatprep.subr.bf16.mxu1 %v10543_v6 }
 0xa7e   : > { %8961 = vmatpush3.bf16.msra.mxu1 %v9336_v59 }
 0xa7f   : > { %8962 = vmatprep.subr.bf16.mxu1 %v10543_v6 }
 0xa82   : > { %8963 = vmatpush3.bf16.msra.mxu1 %v9337_v1 }
 0xa83   : > { %8964 = vmatprep.subr.bf16.mxu1 %v10543_v6 }
 0xa86   : > { %8965 = vmatpush3.bf16.msra.mxu1 %v9338_v18 }
 0xa87   : > { %8966 = vmatprep.subr.bf16.mxu1 %v10543_v6 }
 0xa8a   : > { %8967 = vmatpush3.bf16.msra.mxu1 %v9339_v19 }
 0xa8b   : > { %8968 = vmatprep.subr.bf16.mxu1 %v10543_v6 }
 0xa8e   : > { %8969 = vmatpush3.bf16.msra.mxu1 %v9340_v21  ;;  %v8424_v21 = vld [vmem:[%s1066_s28] ss:$0 sm:$0xff] }
 0xa8f   : > { %8970 = vmatprep.subr.bf16.mxu1 %v10543_v6 }
 0xa92   : > { %8971 = vmatpush3.bf16.msra.mxu1 %v9341_v33  ;;  %v9355_v33 = vld [vmem:[%s11209_s24 + $0x18] sm:$0xff]  }
 0xa93   : > { %8972 = vmatprep.subr.bf16.mxu1 %v10543_v6 }
 0xa96   : > { %8973 = vmatpush3.bf16.msra.mxu1 %v9342_v48  ;;  %v9356_v48 = vld [vmem:[%s11209_s24 + $0x10] sm:$0xff]  }
 0xa97   : > { %8998 = vmatprep.subr.bf16.mxu1 %v10543_v6 }
 0xaa1   : > { %v8929_v22 = vpop.f32.mrf.mxu1 }
 0xaa2   : > { %v2215_v25 = vsel %vm11342_vm13, %v8929_v22, 0.0 }
 0xaa3   : > { %v2217_v26 = vadd.f32 %v2215_v25, %v2024_v24  ;;  %v2205_v27 = vpop.f32.mrf.mxu1 }
 0xaa4   : > { %v2214_v30 = vsel %vm11342_vm13, %v2205_v27, 0.0  ;;  %v8425_v27 = vld [vmem:[%s1074_s25] ss:$0 sm:$0xff] }
 0xaa5   : > { %v2216_v31 = vadd.f32 %v2214_v30, %v2023_v28  ;;  %v2408_v2 = vadd.f32 %v2406_v29, %v2217_v26 }
 0xaa7   : > { %v2407_v32 = vadd.f32 %v2405_v47, %v2216_v31  ;;  %v9353_v47 = vld [vmem:[%s11209_s24 + $0x28] sm:$0xff]  }
 0xb39   : > { %v8957_v34 = vpop.f32.mrf.mxu1 }
 0xb3a   : > { %v2597_v45 = vsel %vm2409_vm1, %v8957_v34, 0.0  ;;  %v9357_v34 = vld [vmem:[%s11209_s24 + $0x8] sm:$0xff]  }
 0xb3b   : > { %v2587_v58 = vpop.f32.mrf.mxu1  ;;  %v2599_v46 = vadd.f32 %v2597_v45, %v2408_v2  ;;  %v9352_v2 = vld [vmem:[%s11209_s24 + $0x30] sm:$0xff]   ;;  %v9358_v45 = vld [vmem:[%s11209_s24] sm:$0xff]  }
 0xb3c   : > { %v2596_v35 = vsel %vm2409_vm1, %v2587_v58, 0.0  ;;  %v8426_v58 = vld [vmem:[%s1091_s9] ss:$0 sm:$0xff] }
 0xb3d   : > { %v2598_v60 = vadd.f32 %v2596_v35, %v2407_v32  ;;  %v9354_v32 = vld [vmem:[%s11209_s24 + $0x20] sm:$0xff]  }
 0xb3f   : > { %v2616_v36 = vpack.c.bf16 %v2599_v46, %v2598_v60 }
 0xb41   : > { %8975 = vmatmul.mubr.bf16.vlgmr.msra.gmra.mxu1 %v2616_v36 }
 0xb42   : > { %9014 = vmatprep.mubr.msk.bf16.mxu1 %vm10545_vm5, %v10543_v6  ;;  %8999 = vmatpush3.bf16.msra.mxu1 %v9351_v63 }
 0xb43   : > { %9000 = vmatprep.subr.bf16.mxu1 %v10543_v6 }
 0xb46   : > { %9001 = vmatpush3.bf16.msra.mxu1 %v9352_v2 }
 0xb47   : > { %9002 = vmatprep.subr.bf16.mxu1 %v10543_v6 }
 0xb4a   : > { %9003 = vmatpush3.bf16.msra.mxu1 %v9353_v47 }
 0xb4b   : > { %9004 = vmatprep.subr.bf16.mxu1 %v10543_v6 }
 0xb4e   : > { %9005 = vmatpush3.bf16.msra.mxu1 %v9354_v32 }
 0xb4f   : > { %9006 = vmatprep.subr.bf16.mxu1 %v10543_v6 }
 0xb52   : > { %9007 = vmatpush3.bf16.msra.mxu1 %v9355_v33 }
 0xb53   : > { %9008 = vmatprep.subr.bf16.mxu1 %v10543_v6 }
 0xb56   : > { %9009 = vmatpush3.bf16.msra.mxu1 %v9356_v48 }
 0xb57   : > { %9010 = vmatprep.subr.bf16.mxu1 %v10543_v6 }
 0xb5a   : > { %9011 = vmatpush3.bf16.msra.mxu1 %v9357_v34 }
 0xb5b   : > { %9012 = vmatprep.subr.bf16.mxu1 %v10543_v6 }
 0xb5e   : > { %9013 = vmatpush3.bf16.msra.mxu1 %v9358_v45 }
 0xc01   : > { %v2699_v37 = vpop.f32.mrf.mxu1 }
 0xc02   : > { %v2706_v0 = vadd.f32 %v2699_v37, %v11227_v61 }
 0xc03   : > { %v8976_v39 = vpop.f32.mrf.mxu1 }
 0xc04   : > { %v11479_v40 = vadd.f32 %v8423_v38, %v2706_v0 }
 0xc05   : > { %v2702_v41 = vpop.f32.mrf.mxu1 }
 0xc06   : > { %v2707_v42 = vadd.f32 %v2702_v41, %v11229_v62  ;;  %2719 = vadd.xlane.f32.xlu0 %v11479_v40  ;;  %v2726_v49 = vmul.f32 %v11479_v40, %v11479_v40 }
 0xc07   : > { %v8977_v43 = vpop.f32.mrf.mxu1 }
 0xc08   : > { %v11483_v44 = vadd.f32 %v8423_v38, %v2707_v42 }
 0xc0a   : > { %2728 = vadd.xlane.f32.xlu0 %v2726_v49  ;;  %v2721_v61 = vsel %vm1543_vm4, %v11483_v44, 0.0  ;;  %v2727_v50 = vmul.f32 %v11483_v44, %v11483_v44 }
 0xc0b   : > { %2722 = vadd.xlane.f32.xlu1 %v2721_v61 }
 0xc0c   : > { %v2730_v62 = vsel %vm1543_vm4, %v2727_v50, 0.0 }
 0xc0f   : > { %2731 = vadd.xlane.f32.xlu1 %v2730_v62 }
 0xc8f   : > { %v2720_v3 = vpop.xlane.xlu0 %2719 }
 0xc90   : > { %v2724_v5 = vmul.f32 0.01, %v2720_v3 }
 0xc92   : > { %v2735_v8 = vmul.f32 %v2724_v5, %v2724_v5  ;;  %v2739_v18 = vsub.f32 %v11479_v40, %v2724_v5 }
 0xc93   : > { %v2729_v7 = vpop.xlane.xlu0 %2728 }
 0xc94   : > { %v2733_v9 = vmul.f32 0.01, %v2729_v7  ;;  %v2723_v10 = vpop.xlane.xlu1 %2722 }
 0xc95   : > { %v2725_v11 = vmul.f32 0.01, %v2723_v10 }
 0xc96   : > { %v2737_v12 = vsub.f32 %v2733_v9, %v2735_v8 }
 0xc97   : > { %v2736_v15 = vmul.f32 %v2725_v11, %v2725_v11  ;;  %v2740_v22 = vsub.f32 %v11483_v44, %v2725_v11 }
 0xc98   : > { %v2741_v13 = vadd.f32 1e-05, %v2737_v12  ;;  %v2732_v14 = vpop.xlane.xlu1 %2731 }
 0xc99   : > { %v2734_v16 = vmul.f32 0.01, %v2732_v14 }
 0xc9a   : > { %9395 = vrsqrt.f32 %v2741_v13 }
 0xc9b   : > { %v2738_v17 = vsub.f32 %v2734_v16, %v2736_v15 }
 0xc9d   : > { %v2742_v59 = vadd.f32 1e-05, %v2738_v17 }
 0xc9f   : > { %9397 = vrsqrt.f32 %v2742_v59 }
 0xca7   : > { %v9396_v1 = vpop.eup %9395 }
 0xca8   : > { %v2745_v19 = vmul.f32 %v9396_v1, %v2739_v18 }
 0xcaa   : > { %v2753_v26 = vmul.f32 %v8424_v21, %v2745_v19 }
 0xcac   : > { %v9398_v24 = vpop.eup %9397  ;;  %v2761_v29 = vadd.f32 %v8425_v27, %v2753_v26 }
 0xcad   : > { %v2746_v25 = vmul.f32 %v9398_v24, %v2740_v22 }
 0xcaf   : > { %v2754_v28 = vmul.f32 %v8424_v21, %v2746_v25 }
 0xcb1   : > { %v2762_v30 = vadd.f32 %v8425_v27, %v2754_v28 }
 0xcb3   : > { %v2779_v31 = vpack.c.bf16 %v2762_v30, %v2761_v29 }
 0xcb5   : > { %8995 = vmatmul.mubr.bf16.vlgmr.msra.gmra.mxu0 %v2779_v31 }
 0xd75   : > { %v2869_v35 = vpop.f32.mrf.mxu0 }
 0xd76   : > { %v2870_v46 = vadd.f32 %v8426_v58, %v2869_v35 }
 0xd77   : > { %v8996_v60 = vpop.f32.mrf.mxu0 }
 0xd78   : > { %v2878_v36 = vmul.f32 0.70710677, %v2870_v46  ;;  %v2876_v49 = vmul.f32 0.5, %v2870_v46 }
 0xd79   : > { %v2872_v37 = vpop.f32.mrf.mxu0 }
 0xd7a   : > { %9399 = verf.f32 %v2878_v36  ;;  %v2873_v38 = vadd.f32 %v8426_v58, %v2872_v37 }
 0xd7b   : > { %v8997_v0 = vpop.f32.mrf.mxu0 }
 0xd7c   : > { %v2879_v39 = vmul.f32 0.70710677, %v2873_v38  ;;  %v2877_v6 = vmul.f32 0.5, %v2873_v38 }
 0xd7e   : > { %9401 = verf.f32 %v2879_v39 }
 0xd87   : > { %v9400_v41 = vpop.eup %9399 }
 0xd88   : > { %v2882_v42 = vadd.f32 1.0, %v9400_v41 }
 0xd8a   : > { %v2884_v50 = vmul.f32 %v2882_v42, %v2876_v49 }
 0xd8b   : > { %v9402_v43 = vpop.eup %9401 }
 0xd8c   : > { %v2883_v61 = vadd.f32 1.0, %v9402_v43 }
 0xd8e   : > { %v2885_v62 = vmul.f32 %v2883_v61, %v2877_v6 }
 0xd90   : > { %v2902_v20 = vpack.c.bf16 %v2885_v62, %v2884_v50 }
 0xd92   : > { %9015 = vmatmul.mubr.bf16.vlgmr.msra.gmra.mxu1 %v2902_v20 }
 0xe52   : > { %v2985_v51 = vpop.f32.mrf.mxu1 }
 0xe53   : > { %v2992_v53 = vadd.f32 %v2985_v51, %v11479_v40 }
 0xe54   : > { %v9016_v54 = vpop.f32.mrf.mxu1 }
 0xe55   : > { %v3001_v55 = vadd.f32 %v8443_v52, %v2992_v53 }
 0xe56   : > { %v2988_v23 = vpop.f32.mrf.mxu1 }
 0xe57   : > { %3003 = vst [vmem:[#allocation2] sm:$0xff] %v3001_v55  ;;  %v2993_v56 = vadd.f32 %v2988_v23, %v11483_v44  ;;  %3008 = sbr.rel (%p8444_p3) target bundleno = 4836 (0x12e4), region = 200 }
 0xe58   : > { %v9017_v63 = vpop.f32.mrf.mxu1 }
 0xe59   : > { %v3002_v3 = vadd.f32 %v8443_v52, %v2993_v56 }
 0xe5b   : > { %3004 = vst [vmem:[#allocation2 + $0x8] sm:$0x3] %v3002_v3 }
 0xe5c   : > { %v3011_v8 = vmul.u32 5, %v11319_v4  ;;  %v10546_v9 = vmov 0.0   ;;  %vm10547_vm2 = vmmov 0   ;;  %v9403_v40 = vld [vmem:[#allocation29 + $0x694] ss:$120 sps:$4 sm:$0xff]   ;;  %v10548_v60 = vmov 0  }
 0xe5d   : > { %9018 = vmatprep.subr.mxu0 %v10546_v9  ;;  %9022 = vmatprep.mubr.msk.f32.mxu0 %vm10547_vm2, %v10546_v9  ;;  %v9405_v44 = vld [vmem:[#allocation29 + $0x698] ss:$120 sps:$4 sm:$0xff]   ;;  %v9407_v11 = vld [vmem:[#allocation29 + $0x69c] ss:$120 sps:$4 sm:$0xff]   ;;  %v9411_v14 = vld [vmem:[#allocation29 + $0x5a8] ss:$120 sps:$4 sm:$0xff]  }
 0xe5e   : > { %v3009_v7 = vld [vmem:[#allocation2] sm:$0xff]  ;;  %vm3012_vm3 = vcmp.eq.s32.totalorder %v11279_v57, %v3011_v8  ;;  %4690 = vmatprep.subr.bf16.mxu1 %v9403_v40  ;;  %v9409_v13 = vld [vmem:[#allocation29 + $0x5a4] ss:$120 sps:$4 sm:$0xff]   ;;  %v9423_v21 = vld [vmem:[#allocation29 + $0x3c8] ss:$120 sps:$4 sm:$0xff]   ;;  %4722 = vmatprep.mubr.bf16.mxu1 %v10548_v60  ;;  %vm5466_vm5 = vcmask 9216  }
 0xe5f   : > { %v8445_v10 = vsel %vm3012_vm3, 1.0, %v10546_v9  ;;  %v9408_v12 = vld [vmem:[#allocation29 + $0x690] ss:$120 sps:$4 sm:$0xff]   ;;  %v9413_v15 = vld [vmem:[#allocation29 + $0x5ac] ss:$120 sps:$4 sm:$0xff]  }
 0xe60   : > { %4691 = vmatpush1.bf16.msra.mxu1 %v9408_v12  ;;  %v9414_v16 = vld [vmem:[#allocation29 + $0x5a0] ss:$120 sps:$4 sm:$0xff]   ;;  %v9415_v57 = vld [vmem:[#allocation29 + $0x4b4] ss:$120 sps:$4 sm:$0xff]   ;;  %v9420_v1 = vld [vmem:[#allocation29 + $0x4b0] ss:$120 sps:$4 sm:$0xff]  }
 0xe61   : > { %4692 = vmatprep.subr.bf16.mxu1 %v9409_v13  ;;  %v9419_v17 = vld [vmem:[#allocation29 + $0x4bc] ss:$120 sps:$4 sm:$0xff]   ;;  %v9417_v59 = vld [vmem:[#allocation29 + $0x4b8] ss:$120 sps:$4 sm:$0xff]   ;;  %v9425_v19 = vld [vmem:[#allocation29 + $0x3cc] ss:$120 sps:$4 sm:$0xff]  }
 0xe62   : > { %v3010_v5 = vld [vmem:[#allocation2 + $0x8] sm:$0x3]  ;;  %v9421_v18 = vld [vmem:[#allocation29 + $0x3c4] ss:$120 sps:$4 sm:$0xff]   ;;  %v9427_v24 = vld [vmem:[#allocation29 + $0x2d4] ss:$120 sps:$4 sm:$0xff]  }
 0xe63   : > { %9019 = vmatpush3.msk.msra.mxu0 %vm1543_vm4, %v3010_v5  ;;  %v9426_v22 = vld [vmem:[#allocation29 + $0x3c0] ss:$120 sps:$4 sm:$0xff]   ;;  %v9431_v25 = vld [vmem:[#allocation29 + $0x2dc] ss:$120 sps:$4 sm:$0xff]   ;;  %v9432_v27 = vld [vmem:[#allocation29 + $0x2d0] ss:$120 sps:$4 sm:$0xff]  }
 0xe64   : > { %9020 = vmatprep.subr.mxu0 %v10546_v9  ;;  %4693 = vmatpush1.bf16.msra.mxu1 %v9414_v16  ;;  %v9429_v26 = vld [vmem:[#allocation29 + $0x2d8] ss:$120 sps:$4 sm:$0xff]   ;;  %v9433_v28 = vld [vmem:[#allocation29 + $0x1e4] ss:$120 sps:$4 sm:$0xff]   ;;  %v9435_v30 = vld [vmem:[#allocation29 + $0x1e8] ss:$120 sps:$4 sm:$0xff]  }
 0xe65   : > { %9021 = vmatpush3.msra.mxu0 %v3009_v7  ;;  %4694 = vmatprep.subr.bf16.mxu1 %v9415_v57  ;;  %v9437_v29 = vld [vmem:[#allocation29 + $0x1ec] ss:$120 sps:$4 sm:$0xff]   ;;  %v9438_v31 = vld [vmem:[#allocation29 + $0x1e0] ss:$120 sps:$4 sm:$0xff]   ;;  %v9443_v47 = vld [vmem:[#allocation29 + $0xfc] ss:$120 sps:$4 sm:$0xff]  }
 0xe66   : > { %9023 = vmatmul.mubr.msk.f32.vlgmr.msra.gmra.mxu0 %vm1915_vm10, %v8445_v10  ;;  %4731 = vmatprep.subr.bf16.mxu0 %v9407_v11  ;;  %v9439_v2 = vld [vmem:[#allocation29 + $0xf4] ss:$120 sps:$4 sm:$0xff]   ;;  %v9441_v32 = vld [vmem:[#allocation29 + $0xf8] ss:$120 sps:$4 sm:$0xff]   ;;  %v9445_v48 = vld [vmem:[#allocation29 + $0x4] ss:$120 sps:$4 sm:$0xff]  }
 0xe67   : > { %4732 = vmatpush1.bf16.msra.mxu0 %v9405_v44  ;;  %v9444_v33 = vld [vmem:[#allocation29 + $0xf0] ss:$120 sps:$4 sm:$0xff]   ;;  %v9449_v34 = vld [vmem:[#allocation29 + $0xc] ss:$120 sps:$4 sm:$0xff]   ;;  %v9450_v58 = vld [vmem:[#allocation29] ss:$120 sps:$4 sm:$0xff]   ;;  %4763 = vmatprep.mubr.bf16.mxu0 %v10548_v60 }
 0xe68   : > { %4733 = vmatprep.subr.bf16.mxu0 %v9413_v15  ;;  %4695 = vmatpush1.bf16.msra.mxu1 %v9420_v1  ;;  %v9447_v45 = vld [vmem:[#allocation29 + $0x8] ss:$120 sps:$4 sm:$0xff]   ;;  %v9453_v35 = vld [vmem:[#allocation29 + $0x6a4] ss:$120 sps:$4 sm:$0xff]   ;;  %v9459_v39 = vld [vmem:[#allocation29 + $0x5b4] ss:$120 sps:$4 sm:$0xff]  }
 0xe69   : > { %4696 = vmatprep.subr.bf16.mxu1 %v9421_v18  ;;  %v9456_v46 = vld [vmem:[#allocation29 + $0x6ac] ss:$120 sps:$4 sm:$0xff]   ;;  %v9451_v37 = vld [vmem:[#allocation29 + $0x6a0] ss:$120 sps:$4 sm:$0xff]   ;;  %v9462_v41 = vld [vmem:[#allocation29 + $0x5bc] ss:$120 sps:$4 sm:$0xff]  }
 0xe6a   : > { %v9454_v38 = vld [vmem:[#allocation29 + $0x6a8] ss:$120 sps:$4 sm:$0xff]   ;;  %v9460_v49 = vld [vmem:[#allocation29 + $0x5b8] ss:$120 sps:$4 sm:$0xff]   ;;  %v9465_v6 = vld [vmem:[#allocation29 + $0x4c4] ss:$120 sps:$4 sm:$0xff]  }
 0xe6b   : > { %4734 = vmatpush1.bf16.msra.mxu0 %v9411_v14  ;;  %v9457_v43 = vld [vmem:[#allocation29 + $0x5b0] ss:$120 sps:$4 sm:$0xff]   ;;  %v9468_v61 = vld [vmem:[#allocation29 + $0x4cc] ss:$120 sps:$4 sm:$0xff]   ;;  %v9463_v50 = vld [vmem:[#allocation29 + $0x4c0] ss:$120 sps:$4 sm:$0xff]  }
 0xe6c   : > { %4735 = vmatprep.subr.bf16.mxu0 %v9419_v17  ;;  %4697 = vmatpush1.bf16.msra.mxu1 %v9426_v22  ;;  %v9466_v62 = vld [vmem:[#allocation29 + $0x4c8] ss:$120 sps:$4 sm:$0xff]   ;;  %v9471_v20 = vld [vmem:[#allocation29 + $0x3d4] ss:$120 sps:$4 sm:$0xff]   ;;  %v9472_v53 = vld [vmem:[#allocation29 + $0x3d8] ss:$120 sps:$4 sm:$0xff]  }
 0xe6d   : > { %4698 = vmatprep.subr.bf16.mxu1 %v9427_v24  ;;  %v9474_v51 = vld [vmem:[#allocation29 + $0x3dc] ss:$120 sps:$4 sm:$0xff]   ;;  %v9469_v52 = vld [vmem:[#allocation29 + $0x3d0] ss:$120 sps:$4 sm:$0xff]   ;;  %v9480_v55 = vld [vmem:[#allocation29 + $0x2ec] ss:$120 sps:$4 sm:$0xff]  }
 0xe6e   : > { %v9477_v54 = vld [vmem:[#allocation29 + $0x2e4] ss:$120 sps:$4 sm:$0xff]   ;;  %v9475_v23 = vld [vmem:[#allocation29 + $0x2e0] ss:$120 sps:$4 sm:$0xff]   ;;  %v9483_v63 = vld [vmem:[#allocation29 + $0x1f4] ss:$120 sps:$4 sm:$0xff]  }
 0xe6f   : > { %4736 = vmatpush1.bf16.msra.mxu0 %v9417_v59  ;;  %v9478_v56 = vld [vmem:[#allocation29 + $0x2e8] ss:$120 sps:$4 sm:$0xff]   ;;  %v9486_v3 = vld [vmem:[#allocation29 + $0x1fc] ss:$120 sps:$4 sm:$0xff]   ;;  %v9484_v7 = vld [vmem:[#allocation29 + $0x1f8] ss:$120 sps:$4 sm:$0xff]  }
 0xe70   : > { %4737 = vmatprep.subr.bf16.mxu0 %v9425_v19  ;;  %4699 = vmatpush1.bf16.msra.mxu1 %v9432_v27  ;;  %v9481_v5 = vld [vmem:[#allocation29 + $0x1f0] ss:$120 sps:$4 sm:$0xff]   ;;  %v9489_v8 = vld [vmem:[#allocation29 + $0x104] ss:$120 sps:$4 sm:$0xff]   ;;  %v9487_v44 = vld [vmem:[#allocation29 + $0x100] ss:$120 sps:$4 sm:$0xff]  }
 0xe71   : > { %4700 = vmatprep.subr.bf16.mxu1 %v9433_v28  ;;  %v9492_v40 = vld [vmem:[#allocation29 + $0x10c] ss:$120 sps:$4 sm:$0xff]   ;;  %v9490_v10 = vld [vmem:[#allocation29 + $0x108] ss:$120 sps:$4 sm:$0xff]   ;;  %v9498_v12 = vld [vmem:[#allocation29 + $0x1c] ss:$120 sps:$4 sm:$0xff]  }
 0xe72   : > { %v9495_v11 = vld [vmem:[#allocation29 + $0x14] ss:$120 sps:$4 sm:$0xff]   ;;  %v9493_v13 = vld [vmem:[#allocation29 + $0x10] ss:$120 sps:$4 sm:$0xff]   ;;  %v9507_v59 = vld [vmem:[#allocation29 + $0x5c4] ss:$120 sps:$4 sm:$0xff]  }
 0xe73   : > { %4738 = vmatpush1.bf16.msra.mxu0 %v9423_v21  ;;  %v9496_v14 = vld [vmem:[#allocation29 + $0x18] ss:$120 sps:$4 sm:$0xff]   ;;  %v9501_v15 = vld [vmem:[#allocation29 + $0x6b4] ss:$120 sps:$4 sm:$0xff]   ;;  %v9508_v19 = vld [vmem:[#allocation29 + $0x5c8] ss:$120 sps:$4 sm:$0xff]  }
 0xe74   : > { %4739 = vmatprep.subr.bf16.mxu0 %v9431_v25  ;;  %4701 = vmatpush1.bf16.msra.mxu1 %v9438_v31  ;;  %v9504_v16 = vld [vmem:[#allocation29 + $0x6bc] ss:$120 sps:$4 sm:$0xff]   ;;  %v9499_v57 = vld [vmem:[#allocation29 + $0x6b0] ss:$120 sps:$4 sm:$0xff]   ;;  %v9510_v1 = vld [vmem:[#allocation29 + $0x5cc] ss:$120 sps:$4 sm:$0xff]  }
 0xe75   : > { %4702 = vmatprep.subr.bf16.mxu1 %v9439_v2  ;;  %v9502_v17 = vld [vmem:[#allocation29 + $0x6b8] ss:$120 sps:$4 sm:$0xff]   ;;  %v9513_v21 = vld [vmem:[#allocation29 + $0x4d4] ss:$120 sps:$4 sm:$0xff]  }
 0xe76   : > { %v9505_v18 = vld [vmem:[#allocation29 + $0x5c0] ss:$120 sps:$4 sm:$0xff]   ;;  %v9516_v22 = vld [vmem:[#allocation29 + $0x4dc] ss:$120 sps:$4 sm:$0xff]   ;;  %v9511_v24 = vld [vmem:[#allocation29 + $0x4d0] ss:$120 sps:$4 sm:$0xff]  }
 0xe77   : > { %4740 = vmatpush1.bf16.msra.mxu0 %v9429_v26  ;;  %v9514_v25 = vld [vmem:[#allocation29 + $0x4d8] ss:$120 sps:$4 sm:$0xff]   ;;  %v9519_v26 = vld [vmem:[#allocation29 + $0x3e4] ss:$120 sps:$4 sm:$0xff]  }
 0xe78   : > { %4741 = vmatprep.subr.bf16.mxu0 %v9437_v29  ;;  %4703 = vmatpush1.bf16.msra.mxu1 %v9444_v33  ;;  %v9522_v27 = vld [vmem:[#allocation29 + $0x3ec] ss:$120 sps:$4 sm:$0xff]   ;;  %v9517_v28 = vld [vmem:[#allocation29 + $0x3e0] ss:$120 sps:$4 sm:$0xff]   ;;  %v9528_v31 = vld [vmem:[#allocation29 + $0x2fc] ss:$120 sps:$4 sm:$0xff]  }
 0xe79   : > { %4704 = vmatprep.subr.bf16.mxu1 %v9445_v48  ;;  %v9520_v29 = vld [vmem:[#allocation29 + $0x3e8] ss:$120 sps:$4 sm:$0xff]   ;;  %v9534_v33 = vld [vmem:[#allocation29 + $0x20c] ss:$120 sps:$4 sm:$0xff]  }
 0xe7a   : > { %v9523_v2 = vld [vmem:[#allocation29 + $0x2f0] ss:$120 sps:$4 sm:$0xff]   ;;  %v9529_v48 = vld [vmem:[#allocation29 + $0x200] ss:$120 sps:$4 sm:$0xff]  }
 0xe7b   : > { %4742 = vmatpush1.bf16.msra.mxu0 %v9435_v30  ;;  %v9525_v30 = vld [vmem:[#allocation29 + $0x2f4] ss:$120 sps:$4 sm:$0xff]  }
 0xe7c   : > { %4743 = vmatprep.subr.bf16.mxu0 %v9443_v47  ;;  %4705 = vmatpush1.bf16.msra.mxu1 %v9450_v58  ;;  %v9526_v47 = vld [vmem:[#allocation29 + $0x2f8] ss:$120 sps:$4 sm:$0xff]   ;;  %v9540_v58 = vld [vmem:[#allocation29 + $0x11c] ss:$120 sps:$4 sm:$0xff]  }
 0xe7d   : > { %4772 = vmatprep.subr.bf16.mxu1 %v9453_v35  ;;  %v9535_v35 = vld [vmem:[#allocation29 + $0x110] ss:$120 sps:$4 sm:$0xff]  }
 0xe7f   : > { %4744 = vmatpush1.bf16.msra.mxu0 %v9441_v32  ;;  %v9531_v32 = vld [vmem:[#allocation29 + $0x204] ss:$120 sps:$4 sm:$0xff]  }
 0xe80   : > { %4745 = vmatprep.subr.bf16.mxu0 %v9449_v34  ;;  %v9532_v34 = vld [vmem:[#allocation29 + $0x208] ss:$120 sps:$4 sm:$0xff]  }
 0xe83   : > { %4746 = vmatpush1.bf16.msra.mxu0 %v9447_v45  ;;  %v9537_v45 = vld [vmem:[#allocation29 + $0x114] ss:$120 sps:$4 sm:$0xff]  }
 0xe84   : > { %4813 = vmatprep.subr.bf16.mxu0 %v9456_v46  ;;  %v9538_v46 = vld [vmem:[#allocation29 + $0x118] ss:$120 sps:$4 sm:$0xff]  }
 0xf26   : > { %v3087_v36 = vpop.f32.mrf.mxu0 }
 0xf27   : > { %v11546_v0 = vpack.c.bf16 %v3087_v36, %v3087_v36  ;;  %v9543_v36 = vld [vmem:[#allocation29 + $0x24] ss:$120 sps:$4 sm:$0xff]  }
 0xf28   : > { %v9024_v42 = vpop.f32.mrf.mxu0 }
 0xf29   : > { %4723 = vmatmul.mubr.bf16.vlgmr.msra.gmra.mxu1 %v11546_v0  ;;  %4764 = vmatmul.mubr.bf16.vlgmr.msra.gmra.mxu0 %v11546_v0  ;;  %v9552_v42 = vld [vmem:[#allocation29 + $0x6cc] ss:$120 sps:$4 sm:$0xff]  }
 0xf2a   : > { %4773 = vmatpush1.bf16.msra.mxu1 %v9451_v37  ;;  %4814 = vmatpush1.bf16.msra.mxu0 %v9454_v38  ;;  %v9546_v37 = vld [vmem:[#allocation29 + $0x2c] ss:$120 sps:$4 sm:$0xff]   ;;  %v9541_v38 = vld [vmem:[#allocation29 + $0x20] ss:$120 sps:$4 sm:$0xff]  }
 0xf2b   : > { %4774 = vmatprep.subr.bf16.mxu1 %v9459_v39  ;;  %4815 = vmatprep.subr.bf16.mxu0 %v9462_v41  ;;  %v9544_v39 = vld [vmem:[#allocation29 + $0x28] ss:$120 sps:$4 sm:$0xff]   ;;  %v9549_v41 = vld [vmem:[#allocation29 + $0x6c4] ss:$120 sps:$4 sm:$0xff]  }
 0xf2c   : > { %4804 = vmatprep.mubr.bf16.mxu1 %v10548_v60  ;;  %4845 = vmatprep.mubr.bf16.mxu0 %v10548_v60 }
 0xf2e   : > { %4775 = vmatpush1.bf16.msra.mxu1 %v9457_v43  ;;  %4816 = vmatpush1.bf16.msra.mxu0 %v9460_v49  ;;  %v9547_v43 = vld [vmem:[#allocation29 + $0x6c0] ss:$120 sps:$4 sm:$0xff]  }
 0xf2f   : > { %4776 = vmatprep.subr.bf16.mxu1 %v9465_v6  ;;  %4817 = vmatprep.subr.bf16.mxu0 %v9468_v61  ;;  %v9550_v49 = vld [vmem:[#allocation29 + $0x6c8] ss:$120 sps:$4 sm:$0xff]   ;;  %v9555_v6 = vld [vmem:[#allocation29 + $0x5d4] ss:$120 sps:$4 sm:$0xff]  }
 0xf30   : > { %v9558_v61 = vld [vmem:[#allocation29 + $0x5dc] ss:$120 sps:$4 sm:$0xff]  }
 0xf32   : > { %4777 = vmatpush1.bf16.msra.mxu1 %v9463_v50  ;;  %4818 = vmatpush1.bf16.msra.mxu0 %v9466_v62  ;;  %v9553_v50 = vld [vmem:[#allocation29 + $0x5d0] ss:$120 sps:$4 sm:$0xff]  }
 0xf33   : > { %4778 = vmatprep.subr.bf16.mxu1 %v9471_v20  ;;  %4819 = vmatprep.subr.bf16.mxu0 %v9474_v51  ;;  %v9556_v62 = vld [vmem:[#allocation29 + $0x5d8] ss:$120 sps:$4 sm:$0xff]   ;;  %v9561_v20 = vld [vmem:[#allocation29 + $0x4e4] ss:$120 sps:$4 sm:$0xff]  }
 0xf34   : > { %v9564_v51 = vld [vmem:[#allocation29 + $0x4ec] ss:$120 sps:$4 sm:$0xff]  }
 0xf36   : > { %4779 = vmatpush1.bf16.msra.mxu1 %v9469_v52  ;;  %4820 = vmatpush1.bf16.msra.mxu0 %v9472_v53  ;;  %v9559_v52 = vld [vmem:[#allocation29 + $0x4e0] ss:$120 sps:$4 sm:$0xff]  }
 0xf37   : > { %4780 = vmatprep.subr.bf16.mxu1 %v9477_v54  ;;  %4821 = vmatprep.subr.bf16.mxu0 %v9480_v55  ;;  %v9562_v53 = vld [vmem:[#allocation29 + $0x4e8] ss:$120 sps:$4 sm:$0xff]   ;;  %v9567_v54 = vld [vmem:[#allocation29 + $0x3f4] ss:$120 sps:$4 sm:$0xff]  }
 0xf38   : > { %v9570_v55 = vld [vmem:[#allocation29 + $0x3fc] ss:$120 sps:$4 sm:$0xff]  }
 0xf3a   : > { %4781 = vmatpush1.bf16.msra.mxu1 %v9475_v23  ;;  %4822 = vmatpush1.bf16.msra.mxu0 %v9478_v56  ;;  %v9565_v23 = vld [vmem:[#allocation29 + $0x3f0] ss:$120 sps:$4 sm:$0xff]  }
 0xf3b   : > { %4782 = vmatprep.subr.bf16.mxu1 %v9483_v63  ;;  %4823 = vmatprep.subr.bf16.mxu0 %v9486_v3  ;;  %v9568_v56 = vld [vmem:[#allocation29 + $0x3f8] ss:$120 sps:$4 sm:$0xff]   ;;  %v9573_v63 = vld [vmem:[#allocation29 + $0x304] ss:$120 sps:$4 sm:$0xff]  }
 0xf3c   : > { %v9576_v3 = vld [vmem:[#allocation29 + $0x30c] ss:$120 sps:$4 sm:$0xff]  }
 0xf3e   : > { %4783 = vmatpush1.bf16.msra.mxu1 %v9481_v5  ;;  %4824 = vmatpush1.bf16.msra.mxu0 %v9484_v7  ;;  %v9571_v5 = vld [vmem:[#allocation29 + $0x300] ss:$120 sps:$4 sm:$0xff]  }
 0xf3f   : > { %4784 = vmatprep.subr.bf16.mxu1 %v9489_v8  ;;  %4825 = vmatprep.subr.bf16.mxu0 %v9492_v40  ;;  %v9574_v7 = vld [vmem:[#allocation29 + $0x308] ss:$120 sps:$4 sm:$0xff]   ;;  %v9579_v8 = vld [vmem:[#allocation29 + $0x214] ss:$120 sps:$4 sm:$0xff]  }
 0xf40   : > { %v9582_v40 = vld [vmem:[#allocation29 + $0x21c] ss:$120 sps:$4 sm:$0xff]  }
 0xf42   : > { %4785 = vmatpush1.bf16.msra.mxu1 %v9487_v44  ;;  %4826 = vmatpush1.bf16.msra.mxu0 %v9490_v10  ;;  %v9577_v44 = vld [vmem:[#allocation29 + $0x210] ss:$120 sps:$4 sm:$0xff]  }
 0xf43   : > { %4786 = vmatprep.subr.bf16.mxu1 %v9495_v11  ;;  %4827 = vmatprep.subr.bf16.mxu0 %v9498_v12  ;;  %v9580_v10 = vld [vmem:[#allocation29 + $0x218] ss:$120 sps:$4 sm:$0xff]   ;;  %v9585_v11 = vld [vmem:[#allocation29 + $0x124] ss:$120 sps:$4 sm:$0xff]  }
 0xf44   : > { %v9588_v12 = vld [vmem:[#allocation29 + $0x12c] ss:$120 sps:$4 sm:$0xff]  }
 0xf46   : > { %4787 = vmatpush1.bf16.msra.mxu1 %v9493_v13  ;;  %4828 = vmatpush1.bf16.msra.mxu0 %v9496_v14  ;;  %v9583_v13 = vld [vmem:[#allocation29 + $0x120] ss:$120 sps:$4 sm:$0xff]  }
 0xf47   : > { %4854 = vmatprep.subr.bf16.mxu1 %v9501_v15  ;;  %4895 = vmatprep.subr.bf16.mxu0 %v9504_v16  ;;  %v9586_v14 = vld [vmem:[#allocation29 + $0x128] ss:$120 sps:$4 sm:$0xff]   ;;  %v9591_v15 = vld [vmem:[#allocation29 + $0x34] ss:$120 sps:$4 sm:$0xff]  }
 0xf48   : > { %v9594_v16 = vld [vmem:[#allocation29 + $0x3c] ss:$120 sps:$4 sm:$0xff]  }
 0xf49   : > { %4805 = vmatmul.mubr.bf16.vlgmr.msra.gmra.mxu1 %v11546_v0  ;;  %4846 = vmatmul.mubr.bf16.vlgmr.msra.gmra.mxu0 %v11546_v0 }
 0xf4a   : > { %4855 = vmatpush1.bf16.msra.mxu1 %v9499_v57  ;;  %4896 = vmatpush1.bf16.msra.mxu0 %v9502_v17  ;;  %v9589_v57 = vld [vmem:[#allocation29 + $0x30] ss:$120 sps:$4 sm:$0xff]  }
 0xf4b   : > { %4856 = vmatprep.subr.bf16.mxu1 %v9507_v59  ;;  %4897 = vmatprep.subr.bf16.mxu0 %v9510_v1  ;;  %v9592_v17 = vld [vmem:[#allocation29 + $0x38] ss:$120 sps:$4 sm:$0xff]   ;;  %v9597_v59 = vld [vmem:[#allocation29 + $0x6d4] ss:$120 sps:$4 sm:$0xff]  }
 0xf4c   : > { %4886 = vmatprep.mubr.bf16.mxu1 %v10548_v60  ;;  %4927 = vmatprep.mubr.bf16.mxu0 %v10548_v60  ;;  %v9600_v1 = vld [vmem:[#allocation29 + $0x6dc] ss:$120 sps:$4 sm:$0xff]  }
 0xf4e   : > { %4857 = vmatpush1.bf16.msra.mxu1 %v9505_v18  ;;  %4898 = vmatpush1.bf16.msra.mxu0 %v9508_v19  ;;  %v9595_v18 = vld [vmem:[#allocation29 + $0x6d0] ss:$120 sps:$4 sm:$0xff]  }
 0xf4f   : > { %4858 = vmatprep.subr.bf16.mxu1 %v9513_v21  ;;  %4899 = vmatprep.subr.bf16.mxu0 %v9516_v22  ;;  %v9598_v19 = vld [vmem:[#allocation29 + $0x6d8] ss:$120 sps:$4 sm:$0xff]   ;;  %v9603_v21 = vld [vmem:[#allocation29 + $0x5e4] ss:$120 sps:$4 sm:$0xff]  }
 0xf50   : > { %v9606_v22 = vld [vmem:[#allocation29 + $0x5ec] ss:$120 sps:$4 sm:$0xff]  }
 0xf52   : > { %4859 = vmatpush1.bf16.msra.mxu1 %v9511_v24  ;;  %4900 = vmatpush1.bf16.msra.mxu0 %v9514_v25  ;;  %v9601_v24 = vld [vmem:[#allocation29 + $0x5e0] ss:$120 sps:$4 sm:$0xff]  }
 0xf53   : > { %4860 = vmatprep.subr.bf16.mxu1 %v9519_v26  ;;  %4901 = vmatprep.subr.bf16.mxu0 %v9522_v27  ;;  %v9604_v25 = vld [vmem:[#allocation29 + $0x5e8] ss:$120 sps:$4 sm:$0xff]   ;;  %v9609_v26 = vld [vmem:[#allocation29 + $0x4f4] ss:$120 sps:$4 sm:$0xff]  }
 0xf54   : > { %v9612_v27 = vld [vmem:[#allocation29 + $0x4fc] ss:$120 sps:$4 sm:$0xff]  }
 0xf56   : > { %4861 = vmatpush1.bf16.msra.mxu1 %v9517_v28  ;;  %4902 = vmatpush1.bf16.msra.mxu0 %v9520_v29  ;;  %v9607_v28 = vld [vmem:[#allocation29 + $0x4f0] ss:$120 sps:$4 sm:$0xff]  }
 0xf57   : > { %4862 = vmatprep.subr.bf16.mxu1 %v9525_v30  ;;  %4903 = vmatprep.subr.bf16.mxu0 %v9528_v31  ;;  %v9610_v29 = vld [vmem:[#allocation29 + $0x4f8] ss:$120 sps:$4 sm:$0xff]   ;;  %v9615_v30 = vld [vmem:[#allocation29 + $0x404] ss:$120 sps:$4 sm:$0xff]  }
 0xf58   : > { %v9618_v31 = vld [vmem:[#allocation29 + $0x40c] ss:$120 sps:$4 sm:$0xff]  }
 0xf5a   : > { %4863 = vmatpush1.bf16.msra.mxu1 %v9523_v2  ;;  %4904 = vmatpush1.bf16.msra.mxu0 %v9526_v47  ;;  %v9613_v2 = vld [vmem:[#allocation29 + $0x400] ss:$120 sps:$4 sm:$0xff]  }
 0xf5b   : > { %4864 = vmatprep.subr.bf16.mxu1 %v9531_v32  ;;  %4905 = vmatprep.subr.bf16.mxu0 %v9534_v33  ;;  %v9616_v47 = vld [vmem:[#allocation29 + $0x408] ss:$120 sps:$4 sm:$0xff]   ;;  %v9621_v32 = vld [vmem:[#allocation29 + $0x314] ss:$120 sps:$4 sm:$0xff]  }
 0xf5c   : > { %v9624_v33 = vld [vmem:[#allocation29 + $0x31c] ss:$120 sps:$4 sm:$0xff]  }
 0xf5e   : > { %4865 = vmatpush1.bf16.msra.mxu1 %v9529_v48  ;;  %4906 = vmatpush1.bf16.msra.mxu0 %v9532_v34  ;;  %v9619_v48 = vld [vmem:[#allocation29 + $0x310] ss:$120 sps:$4 sm:$0xff]  }
 0xf5f   : > { %4866 = vmatprep.subr.bf16.mxu1 %v9537_v45  ;;  %4907 = vmatprep.subr.bf16.mxu0 %v9540_v58  ;;  %v9622_v34 = vld [vmem:[#allocation29 + $0x318] ss:$120 sps:$4 sm:$0xff]   ;;  %v9627_v45 = vld [vmem:[#allocation29 + $0x224] ss:$120 sps:$4 sm:$0xff]  }
 0xf60   : > { %v9630_v58 = vld [vmem:[#allocation29 + $0x22c] ss:$120 sps:$4 sm:$0xff]  }
 0xf62   : > { %4867 = vmatpush1.bf16.msra.mxu1 %v9535_v35  ;;  %4908 = vmatpush1.bf16.msra.mxu0 %v9538_v46  ;;  %v9625_v35 = vld [vmem:[#allocation29 + $0x220] ss:$120 sps:$4 sm:$0xff]  }
 0xf63   : > { %4868 = vmatprep.subr.bf16.mxu1 %v9543_v36  ;;  %4909 = vmatprep.subr.bf16.mxu0 %v9546_v37  ;;  %v9628_v46 = vld [vmem:[#allocation29 + $0x228] ss:$120 sps:$4 sm:$0xff]   ;;  %v9633_v36 = vld [vmem:[#allocation29 + $0x134] ss:$120 sps:$4 sm:$0xff]  }
 0xf64   : > { %v9636_v37 = vld [vmem:[#allocation29 + $0x13c] ss:$120 sps:$4 sm:$0xff]  }
 0xf66   : > { %4869 = vmatpush1.bf16.msra.mxu1 %v9541_v38  ;;  %4910 = vmatpush1.bf16.msra.mxu0 %v9544_v39  ;;  %v9631_v38 = vld [vmem:[#allocation29 + $0x130] ss:$120 sps:$4 sm:$0xff]  }
 0xf67   : > { %4936 = vmatprep.subr.bf16.mxu1 %v9549_v41  ;;  %4977 = vmatprep.subr.bf16.mxu0 %v9552_v42  ;;  %v9634_v39 = vld [vmem:[#allocation29 + $0x138] ss:$120 sps:$4 sm:$0xff]   ;;  %v9639_v41 = vld [vmem:[#allocation29 + $0x44] ss:$120 sps:$4 sm:$0xff]  }
 0xf68   : > { %v9642_v42 = vld [vmem:[#allocation29 + $0x4c] ss:$120 sps:$4 sm:$0xff]  }
 0xf69   : > { %4887 = vmatmul.mubr.bf16.vlgmr.msra.gmra.mxu1 %v11546_v0  ;;  %4928 = vmatmul.mubr.bf16.vlgmr.msra.gmra.mxu0 %v11546_v0 }
 0xf6a   : > { %4937 = vmatpush1.bf16.msra.mxu1 %v9547_v43  ;;  %4978 = vmatpush1.bf16.msra.mxu0 %v9550_v49  ;;  %v9637_v43 = vld [vmem:[#allocation29 + $0x40] ss:$120 sps:$4 sm:$0xff]  }
 0xf6b   : > { %4938 = vmatprep.subr.bf16.mxu1 %v9555_v6  ;;  %4979 = vmatprep.subr.bf16.mxu0 %v9558_v61  ;;  %v9640_v49 = vld [vmem:[#allocation29 + $0x48] ss:$120 sps:$4 sm:$0xff]   ;;  %v9645_v6 = vld [vmem:[#allocation29 + $0x6e4] ss:$120 sps:$4 sm:$0xff]  }
 0xf6c   : > { %4968 = vmatprep.mubr.bf16.mxu1 %v10548_v60  ;;  %5009 = vmatprep.mubr.bf16.mxu0 %v10548_v60  ;;  %v9648_v61 = vld [vmem:[#allocation29 + $0x6ec] ss:$120 sps:$4 sm:$0xff]  }
 0xf6e   : > { %4939 = vmatpush1.bf16.msra.mxu1 %v9553_v50  ;;  %4980 = vmatpush1.bf16.msra.mxu0 %v9556_v62  ;;  %v9643_v50 = vld [vmem:[#allocation29 + $0x6e0] ss:$120 sps:$4 sm:$0xff]  }
 0xf6f   : > { %4940 = vmatprep.subr.bf16.mxu1 %v9561_v20  ;;  %4981 = vmatprep.subr.bf16.mxu0 %v9564_v51  ;;  %v9646_v62 = vld [vmem:[#allocation29 + $0x6e8] ss:$120 sps:$4 sm:$0xff]   ;;  %v9651_v20 = vld [vmem:[#allocation29 + $0x5f4] ss:$120 sps:$4 sm:$0xff]  }
 0xf70   : > { %v9654_v51 = vld [vmem:[#allocation29 + $0x5fc] ss:$120 sps:$4 sm:$0xff]  }
 0xf72   : > { %4941 = vmatpush1.bf16.msra.mxu1 %v9559_v52  ;;  %4982 = vmatpush1.bf16.msra.mxu0 %v9562_v53  ;;  %v9649_v52 = vld [vmem:[#allocation29 + $0x5f0] ss:$120 sps:$4 sm:$0xff]  }
 0xf73   : > { %4942 = vmatprep.subr.bf16.mxu1 %v9567_v54  ;;  %4983 = vmatprep.subr.bf16.mxu0 %v9570_v55  ;;  %v9652_v53 = vld [vmem:[#allocation29 + $0x5f8] ss:$120 sps:$4 sm:$0xff]   ;;  %v9657_v54 = vld [vmem:[#allocation29 + $0x504] ss:$120 sps:$4 sm:$0xff]  }
 0xf74   : > { %v9660_v55 = vld [vmem:[#allocation29 + $0x50c] ss:$120 sps:$4 sm:$0xff]  }
 0xf76   : > { %4943 = vmatpush1.bf16.msra.mxu1 %v9565_v23  ;;  %4984 = vmatpush1.bf16.msra.mxu0 %v9568_v56  ;;  %v9655_v23 = vld [vmem:[#allocation29 + $0x500] ss:$120 sps:$4 sm:$0xff]  }
 0xf77   : > { %4944 = vmatprep.subr.bf16.mxu1 %v9573_v63  ;;  %4985 = vmatprep.subr.bf16.mxu0 %v9576_v3  ;;  %v9658_v56 = vld [vmem:[#allocation29 + $0x508] ss:$120 sps:$4 sm:$0xff]   ;;  %v9663_v63 = vld [vmem:[#allocation29 + $0x414] ss:$120 sps:$4 sm:$0xff]  }
 0xf78   : > { %v9666_v3 = vld [vmem:[#allocation29 + $0x41c] ss:$120 sps:$4 sm:$0xff]  }
 0xf7a   : > { %4945 = vmatpush1.bf16.msra.mxu1 %v9571_v5  ;;  %4986 = vmatpush1.bf16.msra.mxu0 %v9574_v7  ;;  %v9661_v5 = vld [vmem:[#allocation29 + $0x410] ss:$120 sps:$4 sm:$0xff]  }
 0xf7b   : > { %4946 = vmatprep.subr.bf16.mxu1 %v9579_v8  ;;  %4987 = vmatprep.subr.bf16.mxu0 %v9582_v40  ;;  %v9664_v7 = vld [vmem:[#allocation29 + $0x418] ss:$120 sps:$4 sm:$0xff]   ;;  %v9669_v8 = vld [vmem:[#allocation29 + $0x324] ss:$120 sps:$4 sm:$0xff]  }
 0xf7c   : > { %v9672_v40 = vld [vmem:[#allocation29 + $0x32c] ss:$120 sps:$4 sm:$0xff]  }
 0xf7e   : > { %4947 = vmatpush1.bf16.msra.mxu1 %v9577_v44  ;;  %4988 = vmatpush1.bf16.msra.mxu0 %v9580_v10  ;;  %v9667_v44 = vld [vmem:[#allocation29 + $0x320] ss:$120 sps:$4 sm:$0xff]  }
 0xf7f   : > { %4948 = vmatprep.subr.bf16.mxu1 %v9585_v11  ;;  %4989 = vmatprep.subr.bf16.mxu0 %v9588_v12  ;;  %v9670_v10 = vld [vmem:[#allocation29 + $0x328] ss:$120 sps:$4 sm:$0xff]   ;;  %v9675_v11 = vld [vmem:[#allocation29 + $0x234] ss:$120 sps:$4 sm:$0xff]  }
 0xf80   : > { %v9678_v12 = vld [vmem:[#allocation29 + $0x23c] ss:$120 sps:$4 sm:$0xff]  }
 0xf82   : > { %4949 = vmatpush1.bf16.msra.mxu1 %v9583_v13  ;;  %4990 = vmatpush1.bf16.msra.mxu0 %v9586_v14  ;;  %v9673_v13 = vld [vmem:[#allocation29 + $0x230] ss:$120 sps:$4 sm:$0xff]  }
 0xf83   : > { %4950 = vmatprep.subr.bf16.mxu1 %v9591_v15  ;;  %4991 = vmatprep.subr.bf16.mxu0 %v9594_v16  ;;  %v9676_v14 = vld [vmem:[#allocation29 + $0x238] ss:$120 sps:$4 sm:$0xff]   ;;  %v9681_v15 = vld [vmem:[#allocation29 + $0x144] ss:$120 sps:$4 sm:$0xff]  }
 0xf84   : > { %v9684_v16 = vld [vmem:[#allocation29 + $0x14c] ss:$120 sps:$4 sm:$0xff]  }
 0xf86   : > { %4951 = vmatpush1.bf16.msra.mxu1 %v9589_v57  ;;  %4992 = vmatpush1.bf16.msra.mxu0 %v9592_v17  ;;  %v9679_v57 = vld [vmem:[#allocation29 + $0x140] ss:$120 sps:$4 sm:$0xff]  }
 0xf87   : > { %5018 = vmatprep.subr.bf16.mxu1 %v9597_v59  ;;  %5059 = vmatprep.subr.bf16.mxu0 %v9600_v1  ;;  %v9682_v17 = vld [vmem:[#allocation29 + $0x148] ss:$120 sps:$4 sm:$0xff]   ;;  %v9687_v59 = vld [vmem:[#allocation29 + $0x54] ss:$120 sps:$4 sm:$0xff]  }
 0xf88   : > { %v9690_v1 = vld [vmem:[#allocation29 + $0x5c] ss:$120 sps:$4 sm:$0xff]  }
 0xf89   : > { %4969 = vmatmul.mubr.bf16.vlgmr.msra.gmra.mxu1 %v11546_v0  ;;  %5010 = vmatmul.mubr.bf16.vlgmr.msra.gmra.mxu0 %v11546_v0 }
 0xf8a   : > { %5019 = vmatpush1.bf16.msra.mxu1 %v9595_v18  ;;  %5060 = vmatpush1.bf16.msra.mxu0 %v9598_v19  ;;  %v9685_v18 = vld [vmem:[#allocation29 + $0x50] ss:$120 sps:$4 sm:$0xff]  }
 0xf8b   : > { %5020 = vmatprep.subr.bf16.mxu1 %v9603_v21  ;;  %5061 = vmatprep.subr.bf16.mxu0 %v9606_v22  ;;  %v9688_v19 = vld [vmem:[#allocation29 + $0x58] ss:$120 sps:$4 sm:$0xff]   ;;  %v9693_v21 = vld [vmem:[#allocation29 + $0x6f4] ss:$120 sps:$4 sm:$0xff]  }
 0xf8c   : > { %5050 = vmatprep.mubr.bf16.mxu1 %v10548_v60  ;;  %5091 = vmatprep.mubr.bf16.mxu0 %v10548_v60  ;;  %v9696_v22 = vld [vmem:[#allocation29 + $0x6fc] ss:$120 sps:$4 sm:$0xff]  }
 0xf8e   : > { %5021 = vmatpush1.bf16.msra.mxu1 %v9601_v24  ;;  %5062 = vmatpush1.bf16.msra.mxu0 %v9604_v25  ;;  %v9691_v24 = vld [vmem:[#allocation29 + $0x6f0] ss:$120 sps:$4 sm:$0xff]  }
 0xf8f   : > { %5022 = vmatprep.subr.bf16.mxu1 %v9609_v26  ;;  %5063 = vmatprep.subr.bf16.mxu0 %v9612_v27  ;;  %v9694_v25 = vld [vmem:[#allocation29 + $0x6f8] ss:$120 sps:$4 sm:$0xff]   ;;  %v9699_v26 = vld [vmem:[#allocation29 + $0x604] ss:$120 sps:$4 sm:$0xff]  }
 0xf90   : > { %v9702_v27 = vld [vmem:[#allocation29 + $0x60c] ss:$120 sps:$4 sm:$0xff]  }
 0xf92   : > { %5023 = vmatpush1.bf16.msra.mxu1 %v9607_v28  ;;  %5064 = vmatpush1.bf16.msra.mxu0 %v9610_v29  ;;  %v9697_v28 = vld [vmem:[#allocation29 + $0x600] ss:$120 sps:$4 sm:$0xff]  }
 0xf93   : > { %5024 = vmatprep.subr.bf16.mxu1 %v9615_v30  ;;  %5065 = vmatprep.subr.bf16.mxu0 %v9618_v31  ;;  %v9700_v29 = vld [vmem:[#allocation29 + $0x608] ss:$120 sps:$4 sm:$0xff]   ;;  %v9705_v30 = vld [vmem:[#allocation29 + $0x514] ss:$120 sps:$4 sm:$0xff]  }
 0xf94   : > { %v9708_v31 = vld [vmem:[#allocation29 + $0x51c] ss:$120 sps:$4 sm:$0xff]  }
 0xf96   : > { %5025 = vmatpush1.bf16.msra.mxu1 %v9613_v2  ;;  %5066 = vmatpush1.bf16.msra.mxu0 %v9616_v47  ;;  %v9703_v2 = vld [vmem:[#allocation29 + $0x510] ss:$120 sps:$4 sm:$0xff]  }
 0xf97   : > { %5026 = vmatprep.subr.bf16.mxu1 %v9621_v32  ;;  %5067 = vmatprep.subr.bf16.mxu0 %v9624_v33  ;;  %v9706_v47 = vld [vmem:[#allocation29 + $0x518] ss:$120 sps:$4 sm:$0xff]   ;;  %v9711_v32 = vld [vmem:[#allocation29 + $0x424] ss:$120 sps:$4 sm:$0xff]  }
 0xf98   : > { %v9714_v33 = vld [vmem:[#allocation29 + $0x42c] ss:$120 sps:$4 sm:$0xff]  }
 0xf9a   : > { %5027 = vmatpush1.bf16.msra.mxu1 %v9619_v48  ;;  %5068 = vmatpush1.bf16.msra.mxu0 %v9622_v34  ;;  %v9709_v48 = vld [vmem:[#allocation29 + $0x420] ss:$120 sps:$4 sm:$0xff]  }
 0xf9b   : > { %5028 = vmatprep.subr.bf16.mxu1 %v9627_v45  ;;  %5069 = vmatprep.subr.bf16.mxu0 %v9630_v58  ;;  %v9712_v34 = vld [vmem:[#allocation29 + $0x428] ss:$120 sps:$4 sm:$0xff]   ;;  %v9717_v45 = vld [vmem:[#allocation29 + $0x334] ss:$120 sps:$4 sm:$0xff]  }
 0xf9c   : > { %v9720_v58 = vld [vmem:[#allocation29 + $0x33c] ss:$120 sps:$4 sm:$0xff]  }
 0xf9e   : > { %5029 = vmatpush1.bf16.msra.mxu1 %v9625_v35  ;;  %5070 = vmatpush1.bf16.msra.mxu0 %v9628_v46  ;;  %v9715_v35 = vld [vmem:[#allocation29 + $0x330] ss:$120 sps:$4 sm:$0xff]  }
 0xf9f   : > { %5030 = vmatprep.subr.bf16.mxu1 %v9633_v36  ;;  %5071 = vmatprep.subr.bf16.mxu0 %v9636_v37  ;;  %v9718_v46 = vld [vmem:[#allocation29 + $0x338] ss:$120 sps:$4 sm:$0xff]   ;;  %v9723_v36 = vld [vmem:[#allocation29 + $0x244] ss:$120 sps:$4 sm:$0xff]  }
 0xfa0   : > { %v9726_v37 = vld [vmem:[#allocation29 + $0x24c] ss:$120 sps:$4 sm:$0xff]  }
 0xfa2   : > { %5031 = vmatpush1.bf16.msra.mxu1 %v9631_v38  ;;  %5072 = vmatpush1.bf16.msra.mxu0 %v9634_v39  ;;  %v10549_v38 = vmov 1983009808  }
 0xfa3   : > { %5032 = vmatprep.subr.bf16.mxu1 %v9639_v41  ;;  %5073 = vmatprep.subr.bf16.mxu0 %v9642_v42  ;;  %v5309_v39 = vunpack.c.l.s4 %v10549_v38  ;;  %v9721_v41 = vld [vmem:[#allocation29 + $0x240] ss:$120 sps:$4 sm:$0xff]   ;;  %v11620_v38 = vsub.s32 3, %v11319_v4 }
 0xfa4   : > { %v9724_v42 = vld [vmem:[#allocation29 + $0x248] ss:$120 sps:$4 sm:$0xff]  }
 0xfa6   : > { %5033 = vmatpush1.bf16.msra.mxu1 %v9637_v43  ;;  %5074 = vmatpush1.bf16.msra.mxu0 %v9640_v49  ;;  %v9729_v43 = vld [vmem:[#allocation29 + $0x154] ss:$120 sps:$4 sm:$0xff]  }
 0xfa7   : > { %5100 = vmatprep.subr.bf16.mxu1 %v9645_v6  ;;  %5141 = vmatprep.subr.bf16.mxu0 %v9648_v61  ;;  %v9732_v49 = vld [vmem:[#allocation29 + $0x15c] ss:$120 sps:$4 sm:$0xff]   ;;  %v5310_v6 = vunpack.c.0.s8 %v5309_v39  ;;  %v9727_v61 = vld [vmem:[#allocation29 + $0x150] ss:$120 sps:$4 sm:$0xff]  }
 0xfa8   : > { %v9760_v39 = vld [vmem:[#allocation29 + $0x70] ss:$120 sps:$4 sm:$0xff]  }
 0xfa9   : > { %5051 = vmatmul.mubr.bf16.vlgmr.msra.gmra.mxu1 %v11546_v0  ;;  %5092 = vmatmul.mubr.bf16.vlgmr.msra.gmra.mxu0 %v11546_v0 }
 0xfaa   : > { %5101 = vmatpush1.bf16.msra.mxu1 %v9643_v50  ;;  %5142 = vmatpush1.bf16.msra.mxu0 %v9646_v62  ;;  %v9730_v50 = vld [vmem:[#allocation29 + $0x158] ss:$120 sps:$4 sm:$0xff]   ;;  %v9735_v62 = vld [vmem:[#allocation29 + $0x64] ss:$120 sps:$4 sm:$0xff]  }
 0xfab   : > { %5102 = vmatprep.subr.bf16.mxu1 %v9651_v20  ;;  %5143 = vmatprep.subr.bf16.mxu0 %v9654_v51  ;;  %v9738_v20 = vld [vmem:[#allocation29 + $0x6c] ss:$120 sps:$4 sm:$0xff]   ;;  %v5305_v51 = vld [vmem:[#allocation6] sm:$0x3f] }
 0xfac   : > { %5132 = vmatprep.mubr.bf16.mxu1 %v10548_v60  ;;  %5173 = vmatprep.mubr.bf16.mxu0 %v10548_v60 }
 0xfae   : > { %5103 = vmatpush1.bf16.msra.mxu1 %v9649_v52  ;;  %5144 = vmatpush1.bf16.msra.mxu0 %v9652_v53  ;;  %v11573_v52 = vsub.s32 %v5310_v6, %v11319_v4  ;;  %v9733_v53 = vld [vmem:[#allocation29 + $0x60] ss:$120 sps:$4 sm:$0xff]   ;;  %v11636_v6 = vsub.s32 7, %v11319_v4 }
 0xfaf   : > { %5104 = vmatprep.subr.bf16.mxu1 %v9657_v54  ;;  %5145 = vmatprep.subr.bf16.mxu0 %v9660_v55  ;;  %v9736_v54 = vld [vmem:[#allocation29 + $0x68] ss:$120 sps:$4 sm:$0xff]  }
 0xfb0   : > { %v5314_v55 = vrot.slane %v5305_v51, %v11573_v52 }
 0xfb2   : > { %5105 = vmatpush1.bf16.msra.mxu1 %v9655_v23  ;;  %5146 = vmatpush1.bf16.msra.mxu0 %v9658_v56  ;;  %v9741_v23 = vld [vmem:[#allocation29 + $0x704] ss:$120 sps:$4 sm:$0xff]   ;;  %v11577_v56 = vsub.s32 0, %v11319_v4 }
 0xfb3   : > { %5106 = vmatprep.subr.bf16.mxu1 %v9663_v63  ;;  %5147 = vmatprep.subr.bf16.mxu0 %v9666_v3  ;;  %v11580_v63 = vsub.s32 2, %v11319_v4  ;;  %v11583_v3 = vsub.s32 1, %v11319_v4 }
 0xfb6   : > { %5107 = vmatpush1.bf16.msra.mxu1 %v9661_v5  ;;  %5148 = vmatpush1.bf16.msra.mxu0 %v9664_v7  ;;  %v11588_v5 = vld [vmem:[%s12187_s30] sm:$0xff] }
 0xfb7   : > { %5108 = vmatprep.subr.bf16.mxu1 %v9669_v8  ;;  %5149 = vmatprep.subr.bf16.mxu0 %v9672_v40  ;;  %v9739_v7 = vld [vmem:[#allocation29 + $0x700] ss:$120 sps:$4 sm:$0xff]   ;;  %v5322_v8 = vcombine.high %v5314_v55, %v5314_v55  ;;  %v9744_v40 = vld [vmem:[#allocation29 + $0x614] ss:$120 sps:$4 sm:$0xff]  }
 0xfba   : > { %5109 = vmatpush1.bf16.msra.mxu1 %v9667_v44  ;;  %5150 = vmatpush1.bf16.msra.mxu0 %v9670_v10  ;;  %v3343_v44 = vrot.slane %v11588_v5, %v11577_v56  ;;  %v3351_v10 = vrot.slane %v11588_v5, %v11580_v63 }
 0xfbb   : > { %5110 = vmatprep.subr.bf16.mxu1 %v9675_v11  ;;  %5151 = vmatprep.subr.bf16.mxu0 %v9678_v12  ;;  %v3347_v11 = vrot.slane %v11588_v5, %v11583_v3 }
 0xfbe   : > { %5111 = vmatpush1.bf16.msra.mxu1 %v9673_v13  ;;  %5152 = vmatpush1.bf16.msra.mxu0 %v9676_v14  ;;  %v9742_v14 = vld [vmem:[#allocation29 + $0x610] ss:$120 sps:$4 sm:$0xff]  }
 0xfbf   : > { %5112 = vmatprep.subr.bf16.mxu1 %v9681_v15  ;;  %5153 = vmatprep.subr.bf16.mxu0 %v9684_v16 }
 0xfc2   : > { %5113 = vmatpush1.bf16.msra.mxu1 %v9679_v57  ;;  %5154 = vmatpush1.bf16.msra.mxu0 %v9682_v17  ;;  %v9747_v57 = vld [vmem:[#allocation29 + $0x524] ss:$120 sps:$4 sm:$0xff]  }
 0xfc3   : > { %5114 = vmatprep.subr.bf16.mxu1 %v9687_v59  ;;  %5155 = vmatprep.subr.bf16.mxu0 %v9690_v1 }
 0xfc6   : > { %5115 = vmatpush1.bf16.msra.mxu1 %v9685_v18  ;;  %5156 = vmatpush1.bf16.msra.mxu0 %v9688_v19  ;;  %v11601_v18 = vld [vmem:[#allocation6 + $0x6] sm:$0x3f] }
 0xfc7   : > { %5182 = vmatprep.subr.bf16.mxu1 %v9693_v21  ;;  %5223 = vmatprep.subr.bf16.mxu0 %v9696_v22 }
 0xfc9   : > { %5133 = vmatmul.mubr.bf16.vlgmr.msra.gmra.mxu1 %v11546_v0  ;;  %5174 = vmatmul.mubr.bf16.vlgmr.msra.gmra.mxu0 %v11546_v0 }
 0xfca   : > { %5183 = vmatpush1.bf16.msra.mxu1 %v9691_v24  ;;  %5224 = vmatpush1.bf16.msra.mxu0 %v9694_v25  ;;  %v9745_v24 = vld [vmem:[#allocation29 + $0x520] ss:$120 sps:$4 sm:$0xff]   ;;  %v5307_v25 = vcombine.high %v5305_v51, %v5305_v51 }
 0xfcb   : > { %5184 = vmatprep.subr.bf16.mxu1 %v9699_v26  ;;  %5225 = vmatprep.subr.bf16.mxu0 %v9702_v27 }
 0xfcc   : > { %5214 = vmatprep.mubr.bf16.mxu1 %v10548_v60  ;;  %5255 = vmatprep.mubr.bf16.mxu0 %v10548_v60 }
 0xfce   : > { %5185 = vmatpush1.bf16.msra.mxu1 %v9697_v28  ;;  %5226 = vmatpush1.bf16.msra.mxu0 %v9700_v29  ;;  %v9750_v28 = vld [vmem:[#allocation29 + $0x434] ss:$120 sps:$4 sm:$0xff]   ;;  %v11605_v29 = vrot.slane %v11601_v18, %v11573_v52 }
 0xfcf   : > { %5186 = vmatprep.subr.bf16.mxu1 %v9705_v30  ;;  %5227 = vmatprep.subr.bf16.mxu0 %v9708_v31 }
 0xfd2   : > { %5187 = vmatpush1.bf16.msra.mxu1 %v9703_v2  ;;  %5228 = vmatpush1.bf16.msra.mxu0 %v9706_v47  ;;  %v9748_v47 = vld [vmem:[#allocation29 + $0x430] ss:$120 sps:$4 sm:$0xff]  }
 0xfd3   : > { %5188 = vmatprep.subr.bf16.mxu1 %v9711_v32  ;;  %5229 = vmatprep.subr.bf16.mxu0 %v9714_v33  ;;  %v5321_v32 = vrot.slane %v5307_v25, %v11573_v52  ;;  %v9753_v33 = vld [vmem:[#allocation29 + $0x344] ss:$120 sps:$4 sm:$0xff]  }
 0xfd6   : > { %5189 = vmatpush1.bf16.msra.mxu1 %v9709_v48  ;;  %5230 = vmatpush1.bf16.msra.mxu0 %v9712_v34  ;;  %v5547_v48 = vcombine.high %v11605_v29, %v11605_v29  ;;  %v9751_v34 = vld [vmem:[#allocation29 + $0x340] ss:$120 sps:$4 sm:$0xff]  }
 0xfd7   : > { %5190 = vmatprep.subr.bf16.mxu1 %v9717_v45  ;;  %5231 = vmatprep.subr.bf16.mxu0 %v9720_v58  ;;  %v9756_v45 = vld [vmem:[#allocation29 + $0x254] ss:$120 sps:$4 sm:$0xff]   ;;  %v9754_v58 = vld [vmem:[#allocation29 + $0x250] ss:$120 sps:$4 sm:$0xff]  }
 0xfda   : > { %5191 = vmatpush1.bf16.msra.mxu1 %v9715_v35  ;;  %5232 = vmatpush1.bf16.msra.mxu0 %v9718_v46  ;;  %v9759_v35 = vld [vmem:[#allocation29 + $0x164] ss:$120 sps:$4 sm:$0xff]   ;;  %v9757_v46 = vld [vmem:[#allocation29 + $0x160] ss:$120 sps:$4 sm:$0xff]  }
 0xfdb   : > { %5192 = vmatprep.subr.bf16.mxu1 %v9723_v36  ;;  %5233 = vmatprep.subr.bf16.mxu0 %v9726_v37  ;;  %v9762_v36 = vld [vmem:[#allocation29 + $0x74] ss:$120 sps:$4 sm:$0xff]  }
 0xfdc   : > { %v11617_v37 = vld [vmem:[#allocation6 + $0x18] sm:$0x3f] }
 0xfde   : > { %5193 = vmatpush1.bf16.msra.mxu1 %v9721_v41  ;;  %5234 = vmatpush1.bf16.msra.mxu0 %v9724_v42  ;;  %v11623_v41 = vsub.s32 4, %v11319_v4  ;;  %v11627_v42 = vrot.slane %v11617_v37, %v11573_v52 }
 0xfdf   : > { %5194 = vmatprep.subr.bf16.mxu1 %v9729_v43  ;;  %5235 = vmatprep.subr.bf16.mxu0 %v9732_v49  ;;  %v11630_v43 = vsub.s32 6, %v11319_v4  ;;  %v11633_v49 = vsub.s32 5, %v11319_v4  ;;  %v3371_v4 = vrot.slane %v11588_v5, %v11636_v6 }
 0xfe1   : > { %v3363_v51 = vrot.slane %v11588_v5, %v11633_v49 }
 0xfe2   : > { %5195 = vmatpush1.bf16.msra.mxu1 %v9727_v61  ;;  %5236 = vmatpush1.bf16.msra.mxu0 %v9730_v50  ;;  %v3355_v61 = vrot.slane %v11588_v5, %v11620_v38  ;;  %v3359_v50 = vrot.slane %v11588_v5, %v11623_v41 }
 0xfe3   : > { %5196 = vmatprep.subr.bf16.mxu1 %v9735_v62  ;;  %5237 = vmatprep.subr.bf16.mxu0 %v9738_v20  ;;  %v6219_v62 = vcombine.high %v11627_v42, %v11627_v42  ;;  %v3367_v20 = vrot.slane %v11588_v5, %v11630_v43 }
 0xfe6   : > { %5197 = vmatpush1.bf16.msra.mxu1 %v9733_v53  ;;  %5238 = vmatpush1.bf16.msra.mxu0 %v9736_v54 }
 0xfe7   : > { %5264 = vmatprep.subr.bf16.mxu1 %v9741_v23 }
 0xfe9   : > { %5215 = vmatmul.mubr.bf16.vlgmr.msra.gmra.mxu1 %v11546_v0  ;;  %5256 = vmatmul.mubr.bf16.vlgmr.msra.gmra.mxu0 %v11546_v0  ;;  %v4724_v12 = vpop.f32.mrf.mxu1  ;;  %v4765_v13 = vpop.f32.mrf.mxu0 }
 0xfea   : > { %5265 = vmatpush1.bf16.msra.mxu1 %v9739_v7  ;;  %5390 = vmatprep.mubr.f32.mxu0 %v5322_v8  ;;  %v4725_v17 = vadd.f32 %v4724_v12, %v3343_v44  ;;  %v4766_v59 = vadd.f32 %v4765_v13, %v3351_v10  ;;  %v5754_v7 = vld [vmem:[#allocation6 + $0xc] sm:$0x3f]  ;;  %v5532_v44 = vcombine.high %v11601_v18, %v11601_v18 }
 0xfeb   : > { %v4726_v15 = vpop.f32.mrf.mxu1  ;;  %v11598_v16 = vpop.f32.mrf.mxu0  ;;  %5266 = vmatprep.subr.bf16.mxu1 %v9744_v40  ;;  %5296 = vmatprep.mubr.bf16.mxu1 %v10548_v60 }
 0xfec   : > { %v4727_v1 = vadd.f32 %v4726_v15, %v3347_v11  ;;  %v5496_v30 = vrot.slane %v4766_v59, %v11573_v52  ;;  %v5763_v15 = vrot.slane %v5754_v7, %v11573_v52 }
 0xfed   : > { %v4728_v19 = vpop.f32.mrf.mxu1  ;;  %v4769_v21 = vpop.f32.mrf.mxu0 }
 0xfee   : > { %v5482_v22 = vcombine.low %v4725_v17, %v4727_v1  ;;  %5267 = vmatpush1.bf16.msra.mxu1 %v9742_v14  ;;  %5356 = vmatprep.subr.mxu0 %v4727_v1  ;;  %v5546_v19 = vrot.slane %v5532_v44, %v11573_v52  ;;  %v5771_v21 = vcombine.high %v5763_v15, %v5763_v15 }
 0xfef   : > { %v4729_v26 = vpop.f32.mrf.mxu1  ;;  %v4770_v27 = vpop.f32.mrf.mxu0  ;;  %5357 = vmatpush1.xpose.msra.mxu0 %v4725_v17  ;;  %5268 = vmatprep.subr.bf16.mxu1 %v9747_v57 }
 0xff0   : > { %v5489_v31 = vrot.slane %v5482_v22, %v11573_v52  ;;  %9025 = vmatprep.subr.mxu0 %v10546_v9  ;;  %v11670_v22 = vld [vmem:[%s12188_s26 + $0x8] sm:$0xff]  ;;  %v5756_v27 = vcombine.high %v5754_v7, %v5754_v7 }
 0xff1   : > { %v3375_v25 = vrot.slane %v11670_v22, %v11577_v56  ;;  %v3383_v26 = vrot.slane %v11670_v22, %v11580_v63  ;;  %v3391_v44 = vrot.slane %v11670_v22, %v11623_v41 }
 0xff2   : > { %v11610_v2 = vcombine.low %v5489_v31, %v5496_v30  ;;  %5269 = vmatpush1.bf16.msra.mxu1 %v9745_v24  ;;  %5391 = vmatmul.mubr.f32.vlgmr.msra.gmra.mxu0 %v5314_v55  ;;  %v4768_v55 = vadd.f32 %v11598_v16, %v3355_v61  ;;  %v5978_v24 = vld [vmem:[#allocation6 + $0x12] sm:$0x3f]  ;;  %v3387_v30 = vrot.slane %v11670_v22, %v11620_v38 }
 0xff3   : > { %9026 = vmatpush3.xpose.msra.mxu0 %v4766_v59  ;;  %5270 = vmatprep.subr.bf16.mxu1 %v9750_v28  ;;  %v5987_v28 = vrot.slane %v5978_v24, %v11573_v52 }
 0xff4   : > { %9027 = vmatprep.mubr.msk.f32.mxu0 %vm10547_vm2, %v10546_v9 }
 0xff6   : > { %5271 = vmatpush1.bf16.msra.mxu1 %v9748_v47  ;;  %9028 = vmatmul.mubr.f32.vlgmr.msra.gmra.mxu0 %v5321_v32 }
 0xff7   : > { %5272 = vmatprep.subr.bf16.mxu1 %v9753_v33  ;;  %5615 = vmatprep.mubr.f32.mxu0 %v5547_v48 }
 0xffa   : > { %5273 = vmatpush1.bf16.msra.mxu1 %v9751_v34 }
 0xffb   : > { %5274 = vmatprep.subr.bf16.mxu1 %v9756_v45  ;;  %v5770_v45 = vrot.slane %v5756_v27, %v11573_v52 }
 0xffe   : > { %5275 = vmatpush1.bf16.msra.mxu1 %v9754_v58  ;;  %v5995_v58 = vcombine.high %v5987_v28, %v5987_v28 }
 0xfff   : > { %5276 = vmatprep.subr.bf16.mxu1 %v9759_v35 }
0x1002   : > { %5277 = vmatpush1.bf16.msra.mxu1 %v9757_v46 }
0x1003   : > { %5278 = vmatprep.subr.bf16.mxu1 %v9762_v36 }
0x1006   : > { %5279 = vmatpush1.bf16.msra.mxu1 %v9760_v39 }
0x1009   : > { %v4806_v53 = vpop.f32.mrf.mxu1  ;;  %v4847_v54 = vpop.f32.mrf.mxu0  ;;  %5297 = vmatmul.mubr.bf16.vlgmr.msra.gmra.mxu1 %v11546_v0 }
0x100a   : > { %v4807_v23 = vadd.f32 %v4806_v53, %v3359_v50  ;;  %6287 = vmatprep.mubr.f32.mxu1 %v6219_v62  ;;  %v4848_v11 = vadd.f32 %v4847_v54, %v3367_v20  ;;  %v5980_v53 = vcombine.high %v5978_v24, %v5978_v24 }
0x100b   : > { %v4808_v8 = vpop.f32.mrf.mxu1  ;;  %v4849_v40 = vpop.f32.mrf.mxu0 }
0x100c   : > { %v5706_v10 = vcombine.low %v4768_v55, %v4807_v23  ;;  %v4809_v12 = vadd.f32 %v4808_v8, %v3363_v51  ;;  %v4850_v13 = vadd.f32 %v4849_v40, %v3371_v4  ;;  %5581 = vmatprep.subr.mxu0 %v4807_v23  ;;  %v5994_v7 = vrot.slane %v5980_v53, %v11573_v52 }
0x100d   : > { %v4810_v5 = vpop.f32.mrf.mxu1  ;;  %v4851_v14 = vpop.f32.mrf.mxu0  ;;  %5582 = vmatpush1.xpose.msra.mxu0 %v4768_v55  ;;  %v3399_v8 = vrot.slane %v11670_v22, %v11630_v43  ;;  %v6204_v40 = vcombine.high %v11617_v37, %v11617_v37 }
0x100e   : > { %v5713_v16 = vrot.slane %v5706_v10, %v11573_v52  ;;  %v5720_v57 = vrot.slane %v4809_v12, %v11573_v52  ;;  %v5930_v17 = vcombine.low %v4848_v11, %v4850_v13  ;;  %9030 = vmatprep.subr.mxu0 %v10546_v9  ;;  %v3395_v10 = vrot.slane %v11670_v22, %v11633_v49 }
0x100f   : > { %v4811_v59 = vpop.f32.mrf.mxu1  ;;  %v4852_v1 = vpop.f32.mrf.mxu0 }
0x1010   : > { %v11658_v18 = vcombine.low %v5713_v16, %v5720_v57  ;;  %5616 = vmatmul.mubr.f32.vlgmr.msra.gmra.mxu0 %v11605_v29  ;;  %v3379_v29 = vrot.slane %v11670_v22, %v11583_v3  ;;  %v5937_v35 = vrot.slane %v5930_v17, %v11573_v52  ;;  %v6218_v16 = vrot.slane %v6204_v40, %v11573_v52 }
0x1011   : > { %9031 = vmatpush3.xpose.msra.mxu0 %v4809_v12  ;;  %9032 = vmatprep.mubr.msk.f32.mxu0 %vm10547_vm2, %v10546_v9 }
0x1012   : > { %5805 = vmatprep.subr.mxu0 %v4850_v13 }
0x1014   : > { %9033 = vmatmul.mubr.f32.vlgmr.msra.gmra.mxu0 %v5546_v19 }
0x1015   : > { %5806 = vmatpush1.xpose.msra.mxu0 %v4848_v11  ;;  %5839 = vmatprep.mubr.f32.mxu0 %v5771_v21  ;;  %v11705_v11 = vld [vmem:[#allocation6 + $0x1e] sm:$0x3f] }
0x1016   : > { %9035 = vmatprep.subr.mxu0 %v10546_v9  ;;  %v6435_v57 = vrot.slane %v11705_v11, %v11573_v52 }
0x1018   : > { %5840 = vmatmul.mubr.f32.vlgmr.msra.gmra.mxu0 %v5763_v15 }
0x1019   : > { %9037 = vmatprep.mubr.msk.f32.mxu0 %vm10547_vm2, %v10546_v9 }
0x1029   : > { %v4888_v31 = vpop.f32.mrf.mxu1  ;;  %v4929_v47 = vpop.f32.mrf.mxu0 }
0x102a   : > { %v4889_v32 = vadd.f32 %v4888_v31, %v3375_v25  ;;  %v4930_v33 = vadd.f32 %v4929_v47, %v3383_v26  ;;  %v6443_v25 = vcombine.high %v6435_v57, %v6435_v57  ;;  %v11727_v47 = vld [vmem:[#allocation6 + $0x24] sm:$0x3f] }
0x102b   : > { %v4890_v48 = vpop.f32.mrf.mxu1  ;;  %v4931_v34 = vpop.f32.mrf.mxu0 }
0x102c   : > { %v5944_v46 = vrot.slane %v4889_v32, %v11573_v52  ;;  %v4891_v36 = vadd.f32 %v4890_v48, %v3379_v29  ;;  %v4932_v39 = vadd.f32 %v4931_v34, %v3387_v30  ;;  %9036 = vmatpush3.xpose.msra.mxu0 %v4889_v32  ;;  %v11721_v29 = vld [vmem:[%s12188_s26 + $0x10] sm:$0xff]  ;;  %v3403_v30 = vrot.slane %v11670_v22, %v11636_v6 }
0x102d   : > { %v4892_v61 = vpop.f32.mrf.mxu1  ;;  %v4933_v50 = vpop.f32.mrf.mxu0  ;;  %6029 = vmatprep.subr.mxu0 %v4930_v33  ;;  %v3407_v31 = vrot.slane %v11721_v29, %v11577_v56  ;;  %v3415_v32 = vrot.slane %v11721_v29, %v11580_v63  ;;  %v6659_v22 = vrot.slane %v11727_v47, %v11573_v52 }
0x102e   : > { %v11684_v62 = vcombine.low %v5937_v35, %v5944_v46  ;;  %v6154_v20 = vcombine.low %v4891_v36, %v4930_v33  ;;  %v6168_v55 = vrot.slane %v4932_v39, %v11573_v52  ;;  %v3419_v33 = vrot.slane %v11721_v29, %v11620_v38  ;;  %v11739_v46 = vld [vmem:[#allocation6 + $0x2a] sm:$0x3f] }
0x102f   : > { %v4893_v51 = vpop.f32.mrf.mxu1  ;;  %v4934_v4 = vpop.f32.mrf.mxu0  ;;  %9038 = vmatmul.mubr.f32.vlgmr.msra.gmra.mxu0 %v5770_v45  ;;  %v6428_v45 = vcombine.high %v11705_v11, %v11705_v11 }
0x1030   : > { %v6161_v54 = vrot.slane %v6154_v20, %v11573_v52  ;;  %6030 = vmatpush1.xpose.msra.mxu0 %v4891_v36  ;;  %6063 = vmatprep.mubr.f32.mxu0 %v5995_v58 }
0x1031   : > { %9040 = vmatprep.subr.mxu0 %v10546_v9 }
0x1032   : > { %v11689_v23 = vcombine.low %v6161_v54, %v6168_v55  ;;  %v6442_v54 = vrot.slane %v6428_v45, %v11573_v52  ;;  %v6667_v55 = vcombine.high %v6659_v22, %v6659_v22 }
0x1033   : > { %6064 = vmatmul.mubr.f32.vlgmr.msra.gmra.mxu0 %v5987_v28 }
0x1034   : > { %9041 = vmatpush3.xpose.msra.mxu0 %v4932_v39  ;;  %9042 = vmatprep.mubr.msk.f32.mxu0 %vm10547_vm2, %v10546_v9 }
0x1035   : > { %9045 = vmatprep.subr.mxu0 %v10546_v9 }
0x1037   : > { %9043 = vmatmul.mubr.f32.vlgmr.msra.gmra.mxu0 %v5994_v7  ;;  %v6883_v7 = vrot.slane %v11739_v46, %v11573_v52 }
0x1038   : > { %9047 = vmatprep.mubr.msk.f32.mxu0 %vm10547_vm2, %v10546_v9 }
0x1049   : > { %v4970_v12 = vpop.f32.mrf.mxu1  ;;  %v5011_v13 = vpop.f32.mrf.mxu0 }
0x104a   : > { %v5012_v5 = vadd.f32 %v5011_v13, %v3399_v8  ;;  %v4971_v17 = vadd.f32 %v4970_v12, %v3391_v44 }
0x104b   : > { %v4972_v14 = vpop.f32.mrf.mxu1  ;;  %v5013_v15 = vpop.f32.mrf.mxu0 }
0x104c   : > { %v4973_v37 = vadd.f32 %v4972_v14, %v3395_v10  ;;  %9046 = vmatpush3.xpose.msra.mxu0 %v5012_v5  ;;  %v6392_v26 = vrot.slane %v5012_v5, %v11573_v52  ;;  %v5014_v58 = vadd.f32 %v5013_v15, %v3403_v30  ;;  %v6891_v5 = vcombine.high %v6883_v7, %v6883_v7 }
0x104d   : > { %v4974_v59 = vpop.f32.mrf.mxu1  ;;  %v5015_v1 = vpop.f32.mrf.mxu0  ;;  %9050 = vmatprep.subr.mxu0 %v10546_v9  ;;  %v3423_v14 = vrot.slane %v11721_v29, %v11623_v41  ;;  %v3431_v15 = vrot.slane %v11721_v29, %v11630_v43  ;;  %v6876_v30 = vcombine.high %v11739_v46, %v11739_v46 }
0x104e   : > { %v6378_v19 = vcombine.low %v4971_v17, %v4973_v37  ;;  %6253 = vmatprep.subr.mxu1 %v4973_v37  ;;  %v3435_v37 = vrot.slane %v11721_v29, %v11636_v6 }
0x104f   : > { %v4975_v21 = vpop.f32.mrf.mxu1  ;;  %v5016_v24 = vpop.f32.mrf.mxu0  ;;  %6254 = vmatpush1.xpose.msra.mxu1 %v4971_v17  ;;  %9048 = vmatmul.mubr.f32.vlgmr.msra.gmra.mxu0 %v6218_v16  ;;  %v6652_v16 = vcombine.high %v11727_v47, %v11727_v47  ;;  %v11757_v17 = vld [vmem:[#allocation6 + $0x30] sm:$0x3f] }
0x1050   : > { %v6385_v27 = vrot.slane %v6378_v19, %v11573_v52  ;;  %9052 = vmatprep.mubr.msk.f32.mxu0 %vm10547_vm2, %v10546_v9  ;;  %v7107_v24 = vrot.slane %v11757_v17, %v11573_v52 }
0x1052   : > { %v11715_v28 = vcombine.low %v6385_v27, %v6392_v26  ;;  %6288 = vmatmul.mubr.f32.vlgmr.msra.gmra.mxu1 %v11627_v42  ;;  %v3411_v42 = vrot.slane %v11721_v29, %v11583_v3  ;;  %v6666_v27 = vrot.slane %v6652_v16, %v11573_v52 }
0x1053   : > { %6511 = vmatprep.mubr.f32.mxu1 %v6443_v25 }
0x1069   : > { %v5052_v48 = vpop.f32.mrf.mxu1  ;;  %v5093_v34 = vpop.f32.mrf.mxu0 }
0x106a   : > { %v5053_v35 = vadd.f32 %v5052_v48, %v3407_v31  ;;  %v5094_v50 = vadd.f32 %v5093_v34, %v3415_v32  ;;  %v7115_v34 = vcombine.high %v7107_v24, %v7107_v24 }
0x106b   : > { %v5054_v36 = vpop.f32.mrf.mxu1  ;;  %v5095_v39 = vpop.f32.mrf.mxu0 }
0x106c   : > { %v6602_v61 = vcombine.low %v5014_v58, %v5053_v35  ;;  %v5055_v20 = vadd.f32 %v5054_v36, %v3411_v42  ;;  %v5096_v51 = vadd.f32 %v5095_v39, %v3419_v33  ;;  %6477 = vmatprep.subr.mxu1 %v5053_v35 }
0x106d   : > { %v5056_v4 = vpop.f32.mrf.mxu1  ;;  %v5097_v53 = vpop.f32.mrf.mxu0  ;;  %6478 = vmatpush1.xpose.msra.mxu1 %v5014_v58  ;;  %v6890_v58 = vrot.slane %v6876_v30, %v11573_v52 }
0x106e   : > { %v6609_v8 = vrot.slane %v6602_v61, %v11573_v52  ;;  %v6616_v40 = vrot.slane %v5055_v20, %v11573_v52  ;;  %v6826_v44 = vcombine.low %v5094_v50, %v5096_v51  ;;  %9051 = vmatpush3.xpose.msra.mxu0 %v5055_v20  ;;  %6701 = vmatprep.subr.mxu1 %v5096_v51  ;;  %v3335_v61 = vld [vmem:[%s12188_s26 + $0x18] sm:$0x3f] }
0x106f   : > { %v5057_v10 = vpop.f32.mrf.mxu1  ;;  %v5098_v12 = vpop.f32.mrf.mxu0  ;;  %9055 = vmatprep.subr.mxu0 %v10546_v9  ;;  %v7100_v20 = vcombine.high %v11757_v17, %v11757_v17  ;;  %v3439_v51 = vrot.slane %v3335_v61, %v11577_v56  ;;  %v3443_v4 = vrot.slane %v3335_v61, %v11583_v3  ;;  %v11791_v53 = vld [vmem:[#allocation6 + $0x36] sm:$0x3f] }
0x1070   : > { %v11747_v13 = vcombine.low %v6609_v8, %v6616_v40  ;;  %6512 = vmatmul.mubr.f32.vlgmr.msra.gmra.mxu1 %v6435_v57  ;;  %v3427_v57 = vrot.slane %v11721_v29, %v11633_v49  ;;  %v6833_v43 = vrot.slane %v6826_v44, %v11573_v52  ;;  %v7331_v10 = vrot.slane %v11791_v53, %v11573_v52 }
0x1071   : > { %9053 = vmatmul.mubr.f32.vlgmr.msra.gmra.mxu0 %v6442_v54  ;;  %6702 = vmatpush1.xpose.msra.mxu1 %v5094_v50  ;;  %v3447_v50 = vrot.slane %v3335_v61, %v11580_v63  ;;  %v7114_v44 = vrot.slane %v7100_v20, %v11573_v52 }
0x1072   : > { %6735 = vmatprep.mubr.f32.mxu1 %v6667_v55  ;;  %9057 = vmatprep.mubr.msk.f32.mxu0 %vm10547_vm2, %v10546_v9 }
0x1074   : > { %6736 = vmatmul.mubr.f32.vlgmr.msra.gmra.mxu1 %v6659_v22 }
0x1075   : > { %6959 = vmatprep.mubr.f32.mxu1 %v6891_v5 }
0x1089   : > { %v5134_v59 = vpop.f32.mrf.mxu1  ;;  %v5175_v1 = vpop.f32.mrf.mxu0 }
0x108a   : > { %v5135_v19 = vadd.f32 %v5134_v59, %v3423_v14  ;;  %v5176_v21 = vadd.f32 %v5175_v1, %v3431_v15 }
0x108b   : > { %v5136_v25 = vpop.f32.mrf.mxu1  ;;  %v5177_v26 = vpop.f32.mrf.mxu0 }
0x108c   : > { %v6840_v31 = vrot.slane %v5135_v19, %v11573_v52  ;;  %v5137_v32 = vadd.f32 %v5136_v25, %v3427_v57  ;;  %v5178_v6 = vadd.f32 %v5177_v26, %v3435_v37  ;;  %9056 = vmatpush3.xpose.msra.mxu0 %v5135_v19  ;;  %6925 = vmatprep.subr.mxu1 %v5176_v21 }
0x108d   : > { %v5138_v29 = vpop.f32.mrf.mxu1  ;;  %v5179_v42 = vpop.f32.mrf.mxu0  ;;  %9060 = vmatprep.subr.mxu0 %v10546_v9  ;;  %v7339_v37 = vcombine.high %v7331_v10, %v7331_v10 }
0x108e   : > { %v11771_v33 = vcombine.low %v6833_v43, %v6840_v31  ;;  %v7050_v48 = vcombine.low %v5137_v32, %v5176_v21  ;;  %6926 = vmatpush1.xpose.msra.mxu1 %v5137_v32  ;;  %v7064_v36 = vrot.slane %v5178_v6, %v11573_v52  ;;  %v3451_v31 = vrot.slane %v3335_v61, %v11620_v38 }
0x108f   : > { %v5139_v45 = vpop.f32.mrf.mxu1  ;;  %v5180_v22 = vpop.f32.mrf.mxu0  ;;  %9058 = vmatmul.mubr.f32.vlgmr.msra.gmra.mxu0 %v6666_v27  ;;  %v3455_v32 = vrot.slane %v3335_v61, %v11623_v41 }
0x1090   : > { %v7057_v35 = vrot.slane %v7050_v48, %v11573_v52  ;;  %9061 = vmatpush3.xpose.msra.mxu0 %v5178_v6  ;;  %9062 = vmatprep.mubr.msk.f32.mxu0 %vm10547_vm2, %v10546_v9  ;;  %v9774_v48 = vld [vmem:[#allocation30 + $0x74] ss:$8 sps:$4 sm:$0xff]  }
0x1091   : > { %6960 = vmatmul.mubr.f32.vlgmr.msra.gmra.mxu1 %v6883_v7  ;;  %9065 = vmatprep.subr.mxu0 %v10546_v9 }
0x1092   : > { %v11779_v39 = vcombine.low %v7057_v35, %v7064_v36  ;;  %7183 = vmatprep.mubr.f32.mxu1 %v7115_v34  ;;  %v9772_v35 = vld [vmem:[#allocation30 + $0x70] ss:$8 sps:$4 sm:$0xff]   ;;  %v9778_v36 = vld [vmem:[#allocation30 + $0x64] ss:$8 sps:$4 sm:$0xff]  }
0x1093   : > { %9063 = vmatmul.mubr.f32.vlgmr.msra.gmra.mxu0 %v6890_v58 }
0x1094   : > { %9067 = vmatprep.mubr.msk.f32.mxu0 %vm10547_vm2, %v10546_v9 }
0x10a9   : > { %v5216_v54 = vpop.f32.mrf.mxu1  ;;  %v5257_v55 = vpop.f32.mrf.mxu0 }
0x10aa   : > { %v5258_v7 = vadd.f32 %v5257_v55, %v3447_v50  ;;  %v5217_v63 = vadd.f32 %v5216_v54, %v3439_v51  ;;  %v9776_v51 = vld [vmem:[#allocation30 + $0x60] ss:$8 sps:$4 sm:$0xff]  }
0x10ab   : > { %v5218_v8 = vpop.f32.mrf.mxu1  ;;  %v5259_v40 = vpop.f32.mrf.mxu0 }
0x10ac   : > { %v5219_v12 = vadd.f32 %v5218_v8, %v3443_v4  ;;  %9066 = vmatpush3.xpose.msra.mxu0 %v5258_v7  ;;  %v7288_v59 = vrot.slane %v5258_v7, %v11573_v52  ;;  %v5260_v29 = vadd.f32 %v5259_v40, %v3451_v31  ;;  %v9781_v4 = vld [vmem:[#allocation30 + $0x54] ss:$8 sps:$4 sm:$0xff]   ;;  %v9779_v7 = vld [vmem:[#allocation30 + $0x50] ss:$8 sps:$4 sm:$0xff]   ;;  %v9784_v40 = vld [vmem:[#allocation30 + $0x44] ss:$8 sps:$4 sm:$0xff]  }
0x10ad   : > { %v5220_v5 = vpop.f32.mrf.mxu1  ;;  %v5261_v14 = vpop.f32.mrf.mxu0  ;;  %9070 = vmatprep.subr.mxu0 %v10546_v9 }
0x10ae   : > { %v7274_v15 = vcombine.low %v5217_v63, %v5219_v12  ;;  %7149 = vmatprep.subr.mxu1 %v5219_v12  ;;  %v9782_v12 = vld [vmem:[#allocation30 + $0x40] ss:$8 sps:$4 sm:$0xff]   ;;  %v9787_v5 = vld [vmem:[#allocation30 + $0x34] ss:$8 sps:$4 sm:$0xff]  }
0x10af   : > { %v5221_v16 = vpop.f32.mrf.mxu1  ;;  %v5262_v57 = vpop.f32.mrf.mxu0  ;;  %7150 = vmatpush1.xpose.msra.mxu1 %v5217_v63  ;;  %9068 = vmatmul.mubr.f32.vlgmr.msra.gmra.mxu0 %v7114_v44 }
0x10b0   : > { %v7281_v1 = vrot.slane %v7274_v15, %v11573_v52  ;;  %9072 = vmatprep.mubr.msk.f32.mxu0 %vm10547_vm2, %v10546_v9  ;;  %v3459_v9 = vrot.slane %v3335_v61, %v11633_v49  ;;  %v9790_v15 = vld [vmem:[#allocation30 + $0x24] ss:$8 sps:$4 sm:$0xff]   ;;  %v9788_v16 = vld [vmem:[#allocation30 + $0x20] ss:$8 sps:$4 sm:$0xff]   ;;  %v9793_v57 = vld [vmem:[#allocation30 + $0x14] ss:$8 sps:$4 sm:$0xff]  }
0x10b2   : > { %v11801_v19 = vcombine.low %v7281_v1, %v7288_v59  ;;  %7184 = vmatmul.mubr.f32.vlgmr.msra.gmra.mxu1 %v7107_v24  ;;  %v5392_v21 = vpop.f32.mrf.mxu0  ;;  %v7324_v24 = vcombine.high %v11791_v53, %v11791_v53  ;;  %v9796_v59 = vld [vmem:[#allocation30 + $0x4] ss:$8 sps:$4 sm:$0xff]   ;;  %v9794_v1 = vld [vmem:[#allocation30] ss:$8 sps:$4 sm:$0xff]  }
0x10b3   : > { %7407 = vmatprep.mubr.f32.mxu1 %v7339_v37  ;;  %v9791_v37 = vld [vmem:[#allocation30 + $0x10] ss:$8 sps:$4 sm:$0xff]  }
0x10b4   : > { %v5394_v43 = vpop.f32.mrf.mxu0  ;;  %v7338_v38 = vrot.slane %v7324_v24, %v11573_v52 }
0x10b6   : > { %v5462_v25 = vpop.f32.mrf.mxu0 }
0x10b7   : > { %v11803_v26 = vadd.f32 %v5462_v25, %v5392_v21 }
0x10b8   : > { %v9029_v27 = vpop.f32.mrf.mxu0 }
0x10b9   : > { %v5467_v30 = vsel %vm5466_vm5, %v11803_v26, -inf }
0x10ba   : > { %5468 = vmax.xlane.f32.xlu0 %v5467_v30 }
0x10c9   : > { %v5298_v6 = vpop.f32.mrf.mxu1 }
0x10ca   : > { %v5299_v42 = vadd.f32 %v5298_v6, %v3455_v32 }
0x10cb   : > { %v5300_v34 = vpop.f32.mrf.mxu1 }
0x10cc   : > { %v7498_v45 = vcombine.low %v5260_v29, %v5299_v42  ;;  %v5301_v22 = vadd.f32 %v5300_v34, %v3459_v9  ;;  %7373 = vmatprep.subr.mxu1 %v5299_v42 }
0x10cd   : > { %v5302_v58 = vpop.f32.mrf.mxu1  ;;  %7374 = vmatpush1.xpose.msra.mxu1 %v5260_v29 }
0x10ce   : > { %v7505_v41 = vrot.slane %v7498_v45, %v11573_v52  ;;  %v7512_v49 = vrot.slane %v5301_v22, %v11573_v52  ;;  %9071 = vmatpush3.xpose.msra.mxu0 %v5301_v22  ;;  %7662 = vmatprep.subr.bf16.mxu1 %v9774_v48 }
0x10cf   : > { %v5303_v61 = vpop.f32.mrf.mxu1 }
0x10d0   : > { %v11815_v50 = vcombine.low %v7505_v41, %v7512_v49  ;;  %7408 = vmatmul.mubr.f32.vlgmr.msra.gmra.mxu1 %v7331_v10  ;;  %v5617_v20 = vpop.f32.mrf.mxu0 }
0x10d1   : > { %9073 = vmatmul.mubr.f32.vlgmr.msra.gmra.mxu0 %v7338_v38  ;;  %7663 = vmatpush1.bf16.msra.mxu1 %v9772_v35 }
0x10d2   : > { %7664 = vmatprep.subr.bf16.mxu1 %v9778_v36  ;;  %v5619_v54 = vpop.f32.mrf.mxu0  ;;  %7694 = vmatprep.mubr.bf16.mxu1 %v10548_v60  ;;  %v9785_v60 = vld [vmem:[#allocation30 + $0x30] ss:$8 sps:$4 sm:$0xff]  }
0x10d4   : > { %v5687_v55 = vpop.f32.mrf.mxu0 }
0x10d5   : > { %7665 = vmatpush1.bf16.msra.mxu1 %v9776_v51  ;;  %v11818_v8 = vadd.f32 %v5687_v55, %v5617_v20 }
0x10d6   : > { %7666 = vmatprep.subr.bf16.mxu1 %v9781_v4  ;;  %v9034_v44 = vpop.f32.mrf.mxu0  ;;  %v9797_v4 = vld [vmem:[#allocation32 + $0x78] sm:$0xff]  }
0x10d7   : > { %v5691_v10 = vsel %vm5466_vm5, %v11818_v8, -inf  ;;  %8848 = vmatprep.subr.bf16.mxu0 %v9797_v4 }
0x10d8   : > { %5692 = vmax.xlane.f32.xlu0 %v5691_v10  ;;  %v5841_v63 = vpop.f32.mrf.mxu0 }
0x10d9   : > { %7667 = vmatpush1.bf16.msra.mxu1 %v9779_v7  ;;  %v9798_v7 = vld [vmem:[#allocation32 + $0x38] sm:$0xff]  }
0x10da   : > { %7668 = vmatprep.subr.bf16.mxu1 %v9784_v40  ;;  %v5843_v14 = vpop.f32.mrf.mxu0  ;;  %8849 = vmatpush3.bf16.msra.mxu0 %v9798_v7 }
0x10db   : > { %v9800_v14 = vld [vmem:[#allocation32 + $0x30] sm:$0xff]  }
0x10dd   : > { %7669 = vmatpush1.bf16.msra.mxu1 %v9782_v12  ;;  %v9799_v12 = vld [vmem:[#allocation32 + $0x70] sm:$0xff]  }
0x10de   : > { %7670 = vmatprep.subr.bf16.mxu1 %v9787_v5  ;;  %8850 = vmatprep.subr.bf16.mxu0 %v9799_v12 }
0x10df   : > { %8851 = vmatpush3.bf16.msra.mxu0 %v9800_v14 }
0x10e1   : > { %7671 = vmatpush1.bf16.msra.mxu1 %v9785_v60 }
0x10e2   : > { %7672 = vmatprep.subr.bf16.mxu1 %v9790_v15  ;;  %v9801_v15 = vld [vmem:[#allocation32 + $0x68] sm:$0xff]  }
0x10e3   : > { %8852 = vmatprep.subr.bf16.mxu0 %v9801_v15 }
0x10e5   : > { %7673 = vmatpush1.bf16.msra.mxu1 %v9788_v16  ;;  %v9802_v16 = vld [vmem:[#allocation32 + $0x28] sm:$0xff]  }
0x10e6   : > { %7674 = vmatprep.subr.bf16.mxu1 %v9793_v57  ;;  %8853 = vmatpush3.bf16.msra.mxu0 %v9802_v16  ;;  %v9803_v57 = vld [vmem:[#allocation32 + $0x60] sm:$0xff]  }
0x10e7   : > { %8854 = vmatprep.subr.bf16.mxu0 %v9803_v57 }
0x10e9   : > { %7675 = vmatpush1.bf16.msra.mxu1 %v9791_v37  ;;  %v9804_v37 = vld [vmem:[#allocation32 + $0x20] sm:$0xff]  }
0x10ea   : > { %7676 = vmatprep.subr.bf16.mxu1 %v9796_v59  ;;  %8855 = vmatpush3.bf16.msra.mxu0 %v9804_v37 }
0x10ed   : > { %7677 = vmatpush1.bf16.msra.mxu1 %v9794_v1  ;;  %v9805_v1 = vld [vmem:[#allocation32 + $0x58] sm:$0xff]  }
0x10ee   : > { %8856 = vmatprep.subr.bf16.mxu0 %v9805_v1 }
0x10ef   : > { %v5911_v21 = vpop.f32.mrf.mxu0 }
0x10f0   : > { %v11822_v43 = vadd.f32 %v5911_v21, %v5841_v63  ;;  %7695 = vmatmul.mubr.bf16.vlgmr.msra.gmra.mxu1 %v11546_v0 }
0x10f1   : > { %v9039_v25 = vpop.f32.mrf.mxu0 }
0x10f2   : > { %v5915_v27 = vsel %vm5466_vm5, %v11822_v43, -inf  ;;  %v9806_v25 = vld [vmem:[#allocation32 + $0x18] sm:$0xff]  }
0x10f3   : > { %5916 = vmax.xlane.f32.xlu1 %v5915_v27  ;;  %v6065_v30 = vpop.f32.mrf.mxu0  ;;  %8857 = vmatpush3.bf16.msra.mxu0 %v9806_v25  ;;  %v9807_v27 = vld [vmem:[#allocation32 + $0x50] sm:$0xff]  }
0x10f4   : > { %8858 = vmatprep.subr.bf16.mxu0 %v9807_v27 }
0x10f5   : > { %v6067_v31 = vpop.f32.mrf.mxu0 }
0x10f6   : > { %v9808_v31 = vld [vmem:[#allocation32 + $0x10] sm:$0xff]  }
0x10f7   : > { %v6135_v32 = vpop.f32.mrf.mxu0  ;;  %8859 = vmatpush3.bf16.msra.mxu0 %v9808_v31 }
0x10f8   : > { %v11827_v9 = vadd.f32 %v6135_v32, %v6065_v30  ;;  %v9809_v32 = vld [vmem:[#allocation32 + $0x48] sm:$0xff]  }
0x10f9   : > { %v9044_v6 = vpop.f32.mrf.mxu0  ;;  %8860 = vmatprep.subr.bf16.mxu0 %v9809_v32 }
0x10fa   : > { %v6139_v24 = vsel %vm5466_vm5, %v11827_v9, -inf  ;;  %v9810_v6 = vld [vmem:[#allocation32 + $0x8] sm:$0xff]  }
0x10fb   : > { %6140 = vmax.xlane.f32.xlu1 %v6139_v24  ;;  %v9811_v24 = vld [vmem:[#allocation32 + $0x40] sm:$0xff]   ;;  %8861 = vmatpush3.bf16.msra.mxu0 %v9810_v6 }
0x10fc   : > { %8862 = vmatprep.subr.bf16.mxu0 %v9811_v24 }
0x110f   : > { %v6359_v29 = vpop.f32.mrf.mxu0 }
0x1111   : > { %v9049_v42 = vpop.f32.mrf.mxu0 }
0x1112   : > { %v6289_v48 = vpop.f32.mrf.mxu1 }
0x1113   : > { %v11831_v34 = vadd.f32 %v6359_v29, %v6289_v48  ;;  %v9812_v29 = vld [vmem:[#allocation32] sm:$0xff]  }
0x1114   : > { %v6291_v0 = vpop.f32.mrf.mxu1  ;;  %8863 = vmatpush3.bf16.msra.mxu0 %v9812_v29 }
0x1115   : > { %v6363_v45 = vsel %vm5466_vm5, %v11831_v34, -inf }
0x1116   : > { %6364 = vmax.xlane.f32.xlu0 %v6363_v45 }
0x1130   : > { %v6513_v22 = vpop.f32.mrf.mxu1 }
0x1131   : > { %v6583_v58 = vpop.f32.mrf.mxu0 }
0x1132   : > { %v11835_v35 = vadd.f32 %v6583_v58, %v6513_v22  ;;  %v6515_v38 = vpop.f32.mrf.mxu1 }
0x1133   : > { %v9054_v41 = vpop.f32.mrf.mxu0 }
0x1134   : > { %v6587_v49 = vsel %vm5466_vm5, %v11835_v35, -inf  ;;  %v6737_v36 = vpop.f32.mrf.mxu1 }
0x1135   : > { %6588 = vmax.xlane.f32.xlu1 %v6587_v49 }
0x1136   : > { %v6739_v61 = vpop.f32.mrf.mxu1 }
0x1143   : > { %v11847_v59 = vpop.xlane.xlu0 %5468 }
0x1144   : > { %v5470_v21 = vsub.f32 %v11803_v26, %v11847_v59 }
0x1146   : > { %v5471_v30 = vmul.f32 1.442695, %v5470_v21  ;;  %v7570_v21 = vld [vmem:[%s12189_s19] sm:$0x3] }
0x1147   : > { %v7575_v25 = vrot.slane %v7570_v21, %v11577_v56  ;;  %v7579_v27 = vrot.slane %v7570_v21, %v11583_v3 }
0x1148   : > { %9813 = vpow2.f32 %v5471_v30 }
0x114f   : > { %v6807_v20 = vpop.f32.mrf.mxu0 }
0x1150   : > { %v11839_v51 = vadd.f32 %v6807_v20, %v6737_v36 }
0x1151   : > { %v9059_v54 = vpop.f32.mrf.mxu0  ;;  %v6961_v55 = vpop.f32.mrf.mxu1 }
0x1152   : > { %v6811_v40 = vsel %vm5466_vm5, %v11839_v51, -inf }
0x1153   : > { %6812 = vmax.xlane.f32.xlu0 %v6811_v40  ;;  %v7031_v44 = vpop.f32.mrf.mxu0  ;;  %v6963_v10 = vpop.f32.mrf.mxu1 }
0x1154   : > { %v11843_v63 = vadd.f32 %v7031_v44, %v6961_v55 }
0x1155   : > { %v9064_v5 = vpop.f32.mrf.mxu0  ;;  %v9814_v58 = vpop.eup %9813 }
0x1156   : > { %v7035_v60 = vsel %vm5466_vm5, %v11843_v63, -inf  ;;  %v5473_v38 = vsel %vm5466_vm5, %v9814_v58, 0.0 }
0x1157   : > { %7036 = vmax.xlane.f32.xlu1 %v7035_v60 }
0x1161   : > { %v11858_v49 = vpop.xlane.xlu0 %5692 }
0x1162   : > { %v5694_v20 = vsub.f32 %v11818_v8, %v11858_v49 }
0x1164   : > { %v5695_v4 = vmul.f32 1.442695, %v5694_v20 }
0x116f   : > { %v7255_v42 = vpop.f32.mrf.mxu0 }
0x1171   : > { %v9069_v48 = vpop.f32.mrf.mxu0 }
0x1172   : > { %v7185_v26 = vpop.f32.mrf.mxu1 }
0x1173   : > { %v11851_v0 = vadd.f32 %v7255_v42, %v7185_v26 }
0x1174   : > { %v7187_v45 = vpop.f32.mrf.mxu1 }
0x1175   : > { %v7259_v22 = vsel %vm5466_vm5, %v11851_v0, -inf }
0x1176   : > { %7260 = vmax.xlane.f32.xlu0 %v7259_v22 }
0x117a   : > { %5474 = vadd.xlane.f32.xlu0 %v5473_v38 }
0x117c   : > { %v11856_v41 = vpop.xlane.xlu1 %5916 }
0x117d   : > { %v5918_v36 = vsub.f32 %v11822_v43, %v11856_v41 }
0x117f   : > { %v5919_v61 = vmul.f32 1.442695, %v5918_v36 }
0x1181   : > { %9815 = vpow2.f32 %v5919_v61 }
0x1182   : > { %9817 = vpow2.f32 %v5695_v4 }
0x1184   : > { %v11864_v54 = vpop.xlane.xlu1 %6140 }
0x1185   : > { %v6142_v55 = vsub.f32 %v11827_v9, %v11864_v54 }
0x1187   : > { %v6143_v7 = vmul.f32 1.442695, %v6142_v55 }
0x1189   : > { %9819 = vpow2.f32 %v6143_v7 }
0x118e   : > { %v9816_v40 = vpop.eup %9815 }
0x118f   : > { %v5921_v44 = vsel %vm5466_vm5, %v9816_v40, 0.0  ;;  %v9818_v60 = vpop.eup %9817 }
0x1190   : > { %v7409_v10 = vpop.f32.mrf.mxu1  ;;  %5922 = vadd.xlane.f32.xlu0 %v5921_v44  ;;  %v5697_v9 = vsel %vm5466_vm5, %v9818_v60, 0.0 }
0x1191   : > { %v7479_v43 = vpop.f32.mrf.mxu0 }
0x1192   : > { %v11869_v12 = vadd.f32 %v7479_v43, %v7409_v10  ;;  %v7411_v5 = vpop.f32.mrf.mxu1 }
0x1193   : > { %v9074_v8 = vpop.f32.mrf.mxu0 }
0x1194   : > { %v7483_v14 = vsel %vm5466_vm5, %v11869_v12, -inf }
0x1195   : > { %7484 = vmax.xlane.f32.xlu1 %v7483_v14 }
0x1196   : > { %v9820_v15 = vpop.eup %9819 }
0x1197   : > { %v6145_v16 = vsel %vm5466_vm5, %v9820_v15, 0.0 }
0x1199   : > { %5698 = vadd.xlane.f32.xlu1 %v5697_v9 }
0x119d   : > { %6146 = vadd.xlane.f32.xlu1 %v6145_v16 }
0x119f   : > { %v11875_v57 = vpop.xlane.xlu0 %6364 }
0x11a0   : > { %v6366_v37 = vsub.f32 %v11831_v34, %v11875_v57 }
0x11a2   : > { %v6367_v1 = vmul.f32 1.442695, %v6366_v37 }
0x11a4   : > { %9821 = vpow2.f32 %v6367_v1 }
0x11b0   : > { %v7696_v30 = vpop.f32.mrf.mxu1 }
0x11b1   : > { %v9822_v31 = vpop.eup %9821  ;;  %v7697_v32 = vadd.f32 %v7696_v30, %v7575_v25 }
0x11b2   : > { %v7698_v6 = vpop.f32.mrf.mxu1  ;;  %v6369_v24 = vsel %vm5466_vm5, %v9822_v31, 0.0 }
0x11b3   : > { %v7703_v29 = vsel %vm1543_vm4, %v7697_v32, 0.0  ;;  %v7699_v42 = vadd.f32 %v7698_v6, %v7579_v27  ;;  %6370 = vadd.xlane.f32.xlu0 %v6369_v24 }
0x11b4   : > { %v7704_v34 = vrot.slane %v7703_v29, 4  ;;  %v7700_v48 = vpop.f32.mrf.mxu1 }
0x11b5   : > { %v7710_v26 = vsel %vm1543_vm4, %v7699_v42, 0.0 }
0x11b6   : > { %v7705_v45 = vadd.f32 %v7704_v34, %v7703_v29  ;;  %v7711_v22 = vrot.slane %v7710_v26, 4  ;;  %v7701_v58 = vpop.f32.mrf.mxu1 }
0x11b8   : > { %v7706_v38 = vrot.slane %v7705_v45, 2  ;;  %v7712_v36 = vadd.f32 %v7711_v22, %v7710_v26 }
0x11ba   : > { %v7707_v61 = vadd.f32 %v7706_v38, %v7705_v45  ;;  %v7713_v20 = vrot.slane %v7712_v36, 2 }
0x11bc   : > { %v7708_v4 = vrot.slane %v7707_v61, 1  ;;  %v7714_v55 = vadd.f32 %v7713_v20, %v7712_v36 }
0x11be   : > { %v7709_v7 = vadd.f32 %v7708_v4, %v7707_v61  ;;  %v7715_v40 = vrot.slane %v7714_v55, 1  ;;  %v11887_v44 = vpop.xlane.xlu1 %6588  ;;  %v7746_v4 = vld [vmem:[%s12190_s17] sm:$0x3] }
0x11bf   : > { %v6590_v10 = vsub.f32 %v11835_v35, %v11887_v44 }
0x11c0   : > { %v7718_v43 = vmul.f32 0.5, %v7709_v7  ;;  %v7716_v5 = vadd.f32 %v7715_v40, %v7714_v55  ;;  %v7760_v40 = vld [vmem:[%s12191_s20] sm:$0x3] }
0x11c1   : > { %v6591_v8 = vmul.f32 1.442695, %v6590_v10  ;;  %v7751_v10 = vrot.slane %v7746_v4, %v11577_v56 }
0x11c2   : > { %v7720_v14 = vsub.f32 %v7697_v32, %v7718_v43  ;;  %v7719_v60 = vmul.f32 0.5, %v7716_v5 }
0x11c3   : > { %9823 = vpow2.f32 %v6591_v8  ;;  %v7755_v8 = vrot.slane %v7746_v4, %v11583_v3 }
0x11c4   : > { %v7722_v9 = vmul.f32 %v7720_v14, %v7720_v14  ;;  %v7721_v15 = vsub.f32 %v7699_v42, %v7719_v60  ;;  %v7765_v60 = vrot.slane %v7760_v40, %v11577_v56 }
0x11c6   : > { %v7724_v16 = vsel %vm1543_vm4, %v7722_v9, 0.0  ;;  %v7723_v37 = vmul.f32 %v7721_v15, %v7721_v15 }
0x11c7   : > { %v7725_v1 = vrot.slane %v7724_v16, 4 }
0x11c8   : > { %v7731_v21 = vsel %vm1543_vm4, %v7723_v37, 0.0 }
0x11c9   : > { %v7726_v25 = vadd.f32 %v7725_v1, %v7724_v16  ;;  %v7732_v27 = vrot.slane %v7731_v21, 4  ;;  %v7769_v1 = vrot.slane %v7760_v40, %v11583_v3 }
0x11cb   : > { %v7727_v30 = vrot.slane %v7726_v25, 2  ;;  %v7733_v31 = vadd.f32 %v7732_v27, %v7731_v21 }
0x11cd   : > { %v7728_v6 = vadd.f32 %v7727_v30, %v7726_v25  ;;  %v7734_v35 = vrot.slane %v7733_v31, 2 }
0x11cf   : > { %v7729_v24 = vrot.slane %v7728_v6, 1  ;;  %v7735_v29 = vadd.f32 %v7734_v35, %v7733_v31 }
0x11d0   : > { %v9824_v34 = vpop.eup %9823 }
0x11d1   : > { %v7730_v32 = vadd.f32 %v7729_v24, %v7728_v6  ;;  %v7736_v48 = vrot.slane %v7735_v29, 1  ;;  %v6593_v26 = vsel %vm5466_vm5, %v9824_v34, 0.0  ;;  %v9857_v34 = vld [vmem:[#allocation6] sm:$0x3f] }
0x11d2   : > { %6594 = vadd.xlane.f32.xlu1 %v6593_v26 }
0x11d3   : > { %v7738_v42 = vmul.f32 0.5, %v7730_v32  ;;  %v7737_v45 = vadd.f32 %v7736_v48, %v7735_v29  ;;  %v5499_v32 = vmul.f32 %v9857_v34, %v11610_v2  ;;  %v9858_v48 = vld [vmem:[#allocation6 + $0xc] sm:$0x3f] }
0x11d4   : > { %v5947_v26 = vmul.f32 %v9858_v48, %v11684_v62 }
0x11d5   : > { %v7740_v22 = vadd.f32 1e-05, %v7738_v42  ;;  %v7739_v58 = vmul.f32 0.5, %v7737_v45  ;;  %v5508_v42 = vrot.slane %v5499_v32, %v11573_v52 }
0x11d6   : > { %v5956_v45 = vrot.slane %v5947_v26, %v11573_v52  ;;  %v5949_v40 = vcombine.high %v5947_v26, %v5947_v26 }
0x11d7   : > { %9825 = vrsqrt.f32 %v7740_v22  ;;  %v7741_v38 = vadd.f32 1e-05, %v7739_v58  ;;  %v5516_v22 = vcombine.high %v5508_v42, %v5508_v42  ;;  %v9859_v58 = vld [vmem:[#allocation6 + $0x18] sm:$0x3f]  ;;  %v5520_v62 = vsel %vm1543_vm4, %v5508_v42, 0.0 }
0x11d9   : > { %9827 = vrsqrt.f32 %v7741_v38  ;;  %v6395_v38 = vmul.f32 %v9859_v58, %v11715_v28  ;;  %v5521_v4 = vsel %vm1543_vm4, %v5516_v22, 0.0 }
0x11db   : > { %v6404_v2 = vrot.slane %v6395_v38, %v11573_v52 }
0x11dc   : > { %v11894_v36 = vpop.xlane.xlu0 %6812 }
0x11dd   : > { %v6814_v61 = vsub.f32 %v11839_v51, %v11894_v36 }
0x11df   : > { %v6815_v20 = vmul.f32 1.442695, %v6814_v61  ;;  %v5501_v61 = vcombine.high %v5499_v32, %v5499_v32 }
0x11e0   : > { %v11901_v55 = vpop.xlane.xlu1 %7036 }
0x11e1   : > { %9829 = vpow2.f32 %v6815_v20  ;;  %v7038_v7 = vsub.f32 %v11843_v63, %v11901_v55  ;;  %v5964_v20 = vcombine.high %v5956_v45, %v5956_v45 }
0x11e3   : > { %v7039_v43 = vmul.f32 1.442695, %v7038_v7  ;;  %v5515_v7 = vrot.slane %v5501_v61, %v11573_v52 }
0x11e4   : > { %v9826_v5 = vpop.eup %9825 }
0x11e5   : > { %v7744_v51 = vmul.f32 %v9826_v5, %v7720_v14  ;;  %9831 = vpow2.f32 %v7039_v43  ;;  %v5522_v43 = vadd.f32 %v5521_v4, %v5520_v62  ;;  %v5969_v5 = vsel %vm1543_vm4, %v5964_v20, 0.0 }
0x11e6   : > { %v9828_v9 = vpop.eup %9827 }
0x11e7   : > { %v7758_v16 = vmul.f32 %v7751_v10, %v7744_v51  ;;  %v7745_v37 = vmul.f32 %v9828_v9, %v7721_v15  ;;  %v6412_v51 = vcombine.high %v6404_v2, %v6404_v2  ;;  %v5968_v9 = vsel %vm1543_vm4, %v5956_v45, 0.0 }
0x11e9   : > { %v7759_v63 = vmul.f32 %v7755_v8, %v7745_v37  ;;  %v7772_v21 = vadd.f32 %v7765_v60, %v7758_v16  ;;  %v5963_v60 = vrot.slane %v5949_v40, %v11573_v52  ;;  %v6397_v16 = vcombine.high %v6395_v38, %v6395_v38  ;;  %v9860_v38 = vld [vmem:[#allocation6 + $0x6] sm:$0x3f] }
0x11ea   : > { %v5723_v61 = vmul.f32 %v9860_v38, %v11658_v18 }
0x11eb   : > { %v7773_v25 = vadd.f32 %v7769_v1, %v7759_v63  ;;  %v7774_v27 = vmax.f32 %v7772_v21, 0.0  ;;  %v5970_v1 = vadd.f32 %v5969_v5, %v5968_v9  ;;  %v6417_v63 = vsel %vm1543_vm4, %v6412_v51, 0.0 }
0x11ec   : > { %v5732_v40 = vrot.slane %v5723_v61, %v11573_v52  ;;  %v5725_v5 = vcombine.high %v5723_v61, %v5723_v61  ;;  %v7067_v51 = vmul.f32 %v11779_v39, %v11739_v46 }
0x11ed   : > { %v7775_v30 = vmax.f32 %v7773_v25, 0.0  ;;  %v7808_v14 = vpack.c.bf16 %v7774_v27, %v7774_v27  ;;  %v5971_v27 = vsel %vm1543_vm4, %v5963_v60, 0.0 }
0x11ee   : > { %v9830_v31 = vpop.eup %9829  ;;  %v5740_v18 = vcombine.high %v5732_v40, %v5732_v40  ;;  %v7076_v46 = vrot.slane %v7067_v51, %v11573_v52 }
0x11ef   : > { %v6817_v6 = vsel %vm5466_vm5, %v9830_v31, 0.0  ;;  %v7809_v35 = vpack.c.bf16 %v7775_v30, %v7775_v30  ;;  %v5972_v31 = vadd.f32 %v5971_v27, %v5970_v1 }
0x11f0   : > { %6818 = vadd.xlane.f32.xlu0 %v6817_v6 }
0x11f1   : > { %7945 = vmatprep.mubr.bf16.mxu0 %v7809_v35 }
0x11f2   : > { %v9832_v24 = vpop.eup %9831  ;;  %7946 = vmatmul.mubr.bf16.vlgmr.msra.gmra.mxu0 %v7808_v14 }
0x11f3   : > { %v7041_v56 = vsel %vm5466_vm5, %v9832_v24, 0.0 }
0x11f4   : > { %7042 = vadd.xlane.f32.xlu1 %v7041_v56 }
0x11ff   : > { %v11914_v15 = vpop.xlane.xlu0 %7260 }
0x1200   : > { %v7262_v3 = vsub.f32 %v11851_v0, %v11914_v15  ;;  %v6843_v0 = vmul.f32 %v11771_v33, %v11727_v47  ;;  %v7291_v47 = vmul.f32 %v11801_v19, %v11757_v17  ;;  %v5523_v33 = vsel %vm1543_vm4, %v5515_v7, 0.0 }
0x1201   : > { %v5524_v37 = vadd.f32 %v5523_v33, %v5522_v43  ;;  %v6411_v17 = vrot.slane %v6397_v16, %v11573_v52  ;;  %v6416_v19 = vsel %vm1543_vm4, %v6404_v2, 0.0  ;;  %v9861_v2 = vld [vmem:[#allocation6 + $0x12] sm:$0x3f]  ;;  %v6619_v43 = vmul.f32 %v11747_v13, %v11705_v11 }
0x1202   : > { %v7263_v29 = vmul.f32 1.442695, %v7262_v3  ;;  %v6852_v8 = vrot.slane %v6843_v0, %v11573_v52  ;;  %v7300_v25 = vrot.slane %v7291_v47, %v11573_v52  ;;  %v6845_v30 = vcombine.high %v6843_v0, %v6843_v0 }
0x1203   : > { %v6418_v6 = vadd.f32 %v6417_v63, %v6416_v19  ;;  %v6419_v24 = vsel %vm1543_vm4, %v6411_v17, 0.0  ;;  %v6171_v7 = vmul.f32 %v9861_v2, %v11689_v23  ;;  %v6628_v23 = vrot.slane %v6619_v43, %v11573_v52 }
0x1204   : > { %9833 = vpow2.f32 %v7263_v29  ;;  %v6860_v21 = vcombine.high %v6852_v8, %v6852_v8  ;;  %v7308_v14 = vcombine.high %v7300_v25, %v7300_v25  ;;  %v6859_v56 = vrot.slane %v6845_v30, %v11573_v52 }
0x1205   : > { %v6864_v3 = vsel %vm1543_vm4, %v6852_v8, 0.0  ;;  %v7293_v29 = vcombine.high %v7291_v47, %v7291_v47  ;;  %v6420_v34 = vadd.f32 %v6419_v24, %v6418_v6  ;;  %v7312_v58 = vsel %vm1543_vm4, %v7300_v25, 0.0 }
0x1206   : > { %v6865_v35 = vsel %vm1543_vm4, %v6860_v21, 0.0  ;;  %v7313_v26 = vsel %vm1543_vm4, %v7308_v14, 0.0  ;;  %v6867_v45 = vsel %vm1543_vm4, %v6859_v56, 0.0  ;;  %v5745_v8 = vsel %vm1543_vm4, %v5740_v18, 0.0 }
0x1207   : > { %v6866_v32 = vadd.f32 %v6865_v35, %v6864_v3  ;;  %v7307_v22 = vrot.slane %v7293_v29, %v11573_v52  ;;  %v7314_v4 = vadd.f32 %v7313_v26, %v7312_v58  ;;  %v5739_v47 = vrot.slane %v5725_v5, %v11573_v52 }
0x1208   : > { %v5744_v33 = vsel %vm1543_vm4, %v5732_v40, 0.0  ;;  %v6173_v60 = vcombine.high %v6171_v7, %v6171_v7  ;;  %v7515_v11 = vmul.f32 %v11815_v50, %v11791_v53  ;;  %v6636_v1 = vcombine.high %v6628_v23, %v6628_v23 }
0x1209   : > { %v6868_v0 = vadd.f32 %v6867_v45, %v6866_v32  ;;  %v5746_v16 = vadd.f32 %v5745_v8, %v5744_v33  ;;  %v5747_v39 = vsel %vm1543_vm4, %v5739_v47, 0.0  ;;  %v6621_v25 = vcombine.high %v6619_v43, %v6619_v43  ;;  %v8704_v8 = vld [vmem:[%s12192_s29] ss:$0 sm:$0xff] }
0x120a   : > { %v6187_v63 = vrot.slane %v6173_v60, %v11573_v52  ;;  %v6641_v19 = vsel %vm1543_vm4, %v6636_v1, 0.0  ;;  %v7084_v30 = vcombine.high %v7076_v46, %v7076_v46  ;;  %v7524_v53 = vrot.slane %v7515_v11, %v11573_v52 }
0x120b   : > { %v5748_v27 = vadd.f32 %v5747_v39, %v5746_v16  ;;  %v6640_v6 = vsel %vm1543_vm4, %v6628_v23, 0.0  ;;  %v7069_v35 = vcombine.high %v7067_v51, %v7067_v51  ;;  %v7088_v32 = vsel %vm1543_vm4, %v7076_v46, 0.0 }
0x120c   : > { %v6195_v50 = vsel %vm1543_vm4, %v6187_v63, 0.0  ;;  %v6642_v24 = vadd.f32 %v6641_v19, %v6640_v6  ;;  %v7089_v56 = vsel %vm1543_vm4, %v7084_v30, 0.0  ;;  %v7532_v3 = vcombine.high %v7524_v53, %v7524_v53 }
0x120d   : > { %v7517_v26 = vcombine.high %v7515_v11, %v7515_v11  ;;  %v7090_v45 = vadd.f32 %v7089_v56, %v7088_v32  ;;  %v7536_v61 = vsel %vm1543_vm4, %v7524_v53, 0.0 }
0x120f   : > { %v7531_v38 = vrot.slane %v7517_v26, %v11573_v52 }
0x1211   : > { %v9834_v10 = vpop.eup %9833 }
0x1212   : > { %v7265_v28 = vsel %vm5466_vm5, %v9834_v10, 0.0  ;;  %v6180_v10 = vrot.slane %v6171_v7, %v11573_v52  ;;  %v5475_v7 = vpop.xlane.xlu0 %5474 }
0x1213   : > { %7266 = vadd.xlane.f32.xlu0 %v7265_v28 }
0x1214   : > { %v6188_v28 = vcombine.high %v6180_v10, %v6180_v10  ;;  %v6192_v21 = vsel %vm1543_vm4, %v6180_v10, 0.0 }
0x1217   : > { %5525 = vadd.xlane.f32.xlu0 %v5524_v37  ;;  %v6193_v37 = vsel %vm1543_vm4, %v6188_v28, 0.0 }
0x1218   : > { %v6194_v17 = vadd.f32 %v6193_v37, %v6192_v21 }
0x121a   : > { %v6196_v14 = vadd.f32 %v6195_v50, %v6194_v17 }
0x121b   : > { %5973 = vadd.xlane.f32.xlu0 %v5972_v31  ;;  %v6635_v31 = vrot.slane %v6621_v25, %v11573_v52 }
0x121d   : > { %v6643_v29 = vsel %vm1543_vm4, %v6635_v31, 0.0 }
0x121e   : > { %v11946_v48 = vpop.xlane.xlu1 %7484 }
0x121f   : > { %v7486_v42 = vsub.f32 %v11869_v12, %v11946_v48  ;;  %6421 = vadd.xlane.f32.xlu0 %v6420_v34  ;;  %v7315_v12 = vsel %vm1543_vm4, %v7307_v22, 0.0  ;;  %v7083_v34 = vrot.slane %v7069_v35, %v11573_v52  ;;  %v7537_v22 = vsel %vm1543_vm4, %v7532_v3, 0.0 }
0x1220   : > { %v7316_v62 = vadd.f32 %v7315_v12, %v7314_v4  ;;  %v7539_v4 = vsel %vm1543_vm4, %v7531_v38, 0.0  ;;  %v5923_v12 = vpop.xlane.xlu0 %5922 }
0x1221   : > { %v7487_v20 = vmul.f32 1.442695, %v7486_v42  ;;  %v6644_v42 = vadd.f32 %v6643_v29, %v6642_v24  ;;  %v7091_v58 = vsel %vm1543_vm4, %v7083_v34, 0.0 }
0x1223   : > { %9835 = vpow2.f32 %v7487_v20  ;;  %6869 = vadd.xlane.f32.xlu0 %v6868_v0  ;;  %v7092_v20 = vadd.f32 %v7091_v58, %v7090_v45  ;;  %v7538_v0 = vadd.f32 %v7537_v22, %v7536_v61 }
0x1224   : > { %9837 = vlog2.f32 %v5475_v7 }
0x1225   : > { %v7540_v2 = vadd.f32 %v7539_v4, %v7538_v0 }
0x1227   : > { %7317 = vadd.xlane.f32.xlu0 %v7316_v62  ;;  %v5699_v62 = vpop.xlane.xlu1 %5698 }
0x1228   : > { %9839 = vlog2.f32 %v5699_v62 }
0x1229   : > { %9841 = vlog2.f32 %v5923_v12 }
0x122b   : > { %v6147_v43 = vpop.xlane.xlu1 %6146 }
0x122c   : > { %9843 = vlog2.f32 %v6147_v43 }
0x1230   : > { %v9836_v9 = vpop.eup %9835 }
0x1231   : > { %v7489_v13 = vsel %vm5466_vm5, %v9836_v9, 0.0  ;;  %v9838_v33 = vpop.eup %9837 }
0x1232   : > { %7490 = vadd.xlane.f32.xlu1 %v7489_v13  ;;  %v5477_v1 = vmul.f32 0.6931472, %v9838_v33 }
0x1234   : > { %v5478_v17 = vadd.f32 %v5477_v1, %v11847_v59 }
0x1235   : > { %v9840_v9 = vpop.eup %9839 }
0x1236   : > { %5749 = vadd.xlane.f32.xlu1 %v5748_v27  ;;  %v9842_v11 = vpop.eup %9841  ;;  %v5701_v46 = vmul.f32 0.6931472, %v9840_v9 }
0x1237   : > { %v5925_v21 = vmul.f32 0.6931472, %v9842_v11 }
0x1238   : > { %v5702_v19 = vadd.f32 %v5701_v46, %v11858_v49 }
0x1239   : > { %v9844_v39 = vpop.eup %9843  ;;  %v5926_v35 = vadd.f32 %v5925_v21, %v11856_v41 }
0x123a   : > { %6197 = vadd.xlane.f32.xlu1 %v6196_v14  ;;  %v6149_v27 = vmul.f32 0.6931472, %v9844_v39 }
0x123c   : > { %v6371_v40 = vpop.xlane.xlu0 %6370  ;;  %v6150_v34 = vadd.f32 %v6149_v27, %v11864_v54 }
0x123d   : > { %9845 = vlog2.f32 %v6371_v40 }
0x123e   : > { %6645 = vadd.xlane.f32.xlu1 %v6644_v42 }
0x1242   : > { %7093 = vadd.xlane.f32.xlu1 %v7092_v20 }
0x1246   : > { %7541 = vadd.xlane.f32.xlu1 %v7540_v2 }
0x124a   : > { %v9846_v25 = vpop.eup %9845 }
0x124b   : > { %v6373_v31 = vmul.f32 0.6931472, %v9846_v25 }
0x124d   : > { %v6374_v59 = vadd.f32 %v6373_v31, %v11875_v57 }
0x125b   : > { %v6595_v52 = vpop.xlane.xlu1 %6594 }
0x125c   : > { %9847 = vlog2.f32 %v6595_v52 }
0x1269   : > { %v9848_v30 = vpop.eup %9847 }
0x126a   : > { %v6597_v56 = vmul.f32 0.6931472, %v9848_v30 }
0x126c   : > { %v6598_v41 = vadd.f32 %v6597_v56, %v11887_v44 }
0x1279   : > { %v6819_v10 = vpop.xlane.xlu0 %6818 }
0x127a   : > { %9849 = vlog2.f32 %v6819_v10 }
0x127d   : > { %v7043_v28 = vpop.xlane.xlu1 %7042 }
0x127e   : > { %9851 = vlog2.f32 %v7043_v28 }
0x1287   : > { %v9850_v24 = vpop.eup %9849 }
0x1288   : > { %v6821_v42 = vmul.f32 0.6931472, %v9850_v24 }
0x128a   : > { %v6822_v2 = vadd.f32 %v6821_v42, %v11894_v36 }
0x128b   : > { %v9852_v32 = vpop.eup %9851 }
0x128c   : > { %v7045_v38 = vmul.f32 0.6931472, %v9852_v32 }
0x128e   : > { %v7046_v57 = vadd.f32 %v7045_v38, %v11901_v55 }
0x129c   : > { %v7267_v18 = vpop.xlane.xlu0 %7266 }
0x129d   : > { %9853 = vlog2.f32 %v7267_v18 }
0x12a0   : > { %v5526_v51 = vpop.xlane.xlu0 %5525 }
0x12a1   : > { %v5527_v6 = vsub.f32 %v5526_v51, %v5478_v17 }
0x12a4   : > { %v5974_v13 = vpop.xlane.xlu0 %5973 }
0x12a5   : > { %v5975_v3 = vsub.f32 %v5974_v13, %v5926_v35 }
0x12a8   : > { %v6422_v53 = vpop.xlane.xlu0 %6421 }
0x12a9   : > { %v6423_v61 = vsub.f32 %v6422_v53, %v6374_v59 }
0x12aa   : > { %v9854_v22 = vpop.eup %9853 }
0x12ab   : > { %v7269_v4 = vmul.f32 0.6931472, %v9854_v22 }
0x12ac   : > { %v6870_v58 = vpop.xlane.xlu0 %6869 }
0x12ad   : > { %v6871_v62 = vsub.f32 %v6870_v58, %v6822_v2  ;;  %v7270_v52 = vadd.f32 %v7269_v4, %v11914_v15 }
0x12b0   : > { %v7318_v43 = vpop.xlane.xlu0 %7317 }
0x12b1   : > { %v7319_v51 = vsub.f32 %v7318_v43, %v7270_v52 }
0x12b2   : > { %v8864_v5 = vpop.f32.mrf.mxu0 }
0x12b4   : > { %v8865_v23 = vpop.f32.mrf.mxu0 }
0x12b5   : > { %v8866_v47 = vadd.f32 %v8865_v23, %v8864_v5 }
0x12b6   : > { %v8867_v60 = vpop.f32.mrf.mxu0 }
0x12b7   : > { %v7948_v16 = vadd.f32 %v8866_v47, %v8704_v8 }
0x12b8   : > { %v8868_v37 = vpop.f32.mrf.mxu0 }
0x12b9   : > { %7953 = vst [vmem:[#allocation34] sm:$0x3] %v7948_v16 }
0x12bb   : > { %v7491_v63 = vpop.xlane.xlu1 %7490 }
0x12bc   : > { %9855 = vlog2.f32 %v7491_v63 }
0x12bf   : > { %v5750_v50 = vpop.xlane.xlu1 %5749 }
0x12c0   : > { %v5751_v14 = vsub.f32 %v5750_v50, %v5702_v19 }
0x12c2   : > { %v5752_v29 = vadd.f32 %v5751_v14, %v5527_v6 }
0x12c3   : > { %v6198_v26 = vpop.xlane.xlu1 %6197 }
0x12c4   : > { %v5976_v49 = vadd.f32 %v5975_v3, %v5752_v29  ;;  %v6199_v45 = vsub.f32 %v6198_v26, %v6150_v34 }
0x12c6   : > { %v6200_v20 = vadd.f32 %v6199_v45, %v5976_v49 }
0x12c7   : > { %v6646_v0 = vpop.xlane.xlu1 %6645 }
0x12c8   : > { %v6424_v7 = vadd.f32 %v6423_v61, %v6200_v20  ;;  %v6647_v54 = vsub.f32 %v6646_v0, %v6598_v41 }
0x12c9   : > { %v9856_v12 = vpop.eup %9855 }
0x12ca   : > { %v7493_v40 = vmul.f32 0.6931472, %v9856_v12  ;;  %v6648_v10 = vadd.f32 %v6647_v54, %v6424_v7 }
0x12cb   : > { %v7094_v18 = vpop.xlane.xlu1 %7093 }
0x12cc   : > { %v6872_v5 = vadd.f32 %v6871_v62, %v6648_v10  ;;  %v7095_v28 = vsub.f32 %v7094_v18, %v7046_v57  ;;  %v7494_v8 = vadd.f32 %v7493_v40, %v11946_v48 }
0x12ce   : > { %v7096_v44 = vadd.f32 %v7095_v28, %v6872_v5 }
0x12cf   : > { %v7542_v23 = vpop.xlane.xlu1 %7541 }
0x12d0   : > { %v7320_v36 = vadd.f32 %v7319_v51, %v7096_v44  ;;  %v7543_v47 = vsub.f32 %v7542_v23, %v7494_v8 }
0x12d2   : > { %v7544_v33 = vadd.f32 %v7543_v47, %v7320_v36 }
0x12d4   : > { %v7545_v60 = vsel %vm1543_vm4, %v7544_v33, 0.0 }
0x12d5   : > { %v7546_v9 = vrot.slane %v7545_v60, 4 }
0x12d7   : > { %v7547_v16 = vadd.f32 %v7546_v9, %v7545_v60 }
0x12d9   : > { %v7548_v37 = vrot.slane %v7547_v16, 2 }
0x12db   : > { %v7549_v55 = vadd.f32 %v7548_v37, %v7547_v16 }
0x12dd   : > { %v7550_v11 = vrot.slane %v7549_v55, 1 }
0x12df   : > { %v7551_v13 = vadd.f32 %v7550_v11, %v7549_v55 }
0x12e1   : > { %v7552_v1 = vmul.f32 -0.05, %v7551_v13 }
0x12e3   : > { %7553 = vst [vmem:[#allocation33] sm:$0x1] %v7552_v1 }
0x12e4 PF: > { %s12193_s4 = sld [smem:[#allocation51_spill]]  ;;  %s10550_s30 = smov [#allocation33]  }
0x12e5   : > { %s7961_s6 = sshll.u32 %s10550_s30, 4  ;;  %s10551_s23 = smov [#allocation34]   ;;  %s7962_s6 = int_to_ptr.vmem [resolvable:$true] %s7961_s6 }
0x12e6   : > { %s7972_s2 = sshll.u32 %s10551_s23, 4  ;;  %s10378_s27 = scalar_lea.vmem %s7962_s6, 16  ;;  %s7973_s2 = int_to_ptr.vmem [resolvable:$true] %s7972_s2 }
0x12e7   : > { %p10379_p13 = scmp.ne.s32.totalorder %s7962_s6, %s10378_s27  ;;  %s10384_s18 = scalar_lea.vmem %s7962_s6, 32 }
0x12e8   : > { %p10385_p7 = scmp.lt.s32.totalorder %s7962_s6, %s7962_s6  ;;  %p10386_p12 = scmp.lt.s32.totalorder %s10384_s18, %s10378_s27 }
0x12ea   : > { %p9216_p1 = scmp.eq.s32.totalorder %s12193_s4, 3  ;;  %p10387_p4 = por %p10386_p12, %p10385_p7 }
0x12ec   : > { %p10380_p10 = pnand %p10379_p13, %p9216_p1 }
0x12ee   : > { %p10381_p6 = pneg %p10380_p10 }
0x12f0   : > { %p10388_p5 = pnand %p10387_p4, %p10381_p6 }
0x12f2   : > { %10391 = shalt.err (!%p10388_p5)
}
0x12f3   : > { %s12194_s28 = sld [smem:[#allocation73_spill]]  ;;  %s10402_s19 = scalar_lea.vmem %s7973_s2, 32 }
0x12f4   : > { %p10403_p8 = scmp.ne.s32.totalorder %s7973_s2, %s10402_s19  ;;  %p10409_p2 = scmp.lt.s32.totalorder %s7973_s2, %s7973_s2 }
0x12f5   : > { %p10410_p0 = scmp.lt.s32.totalorder %s10402_s19, %s10402_s19 }
0x12f6   : > { %p10404_p9 = pnand %p10403_p8, %p9216_p1 }
0x12f7   : > { %p10411_p3 = por %p10410_p0, %p10409_p2 }
0x12f8   : > { %p10405_p11 = pneg %p10404_p9 }
0x12f9   : > { %9133 = dma.vmem_to_hbm [thread:$0]  (%p9216_p1), %s7962_s6, 16, %s12194_s28, [#allocation5]  }
0x12fa   : > { %p10412_p13 = pnand %p10411_p3, %p10405_p11 }
0x12fc   : > { %10415 = shalt.err (!%p10412_p13)
}
0x12fd   : > { %s12195_s17 = sld [smem:[#allocation74_spill]] }
0x1303   : > { %9135 = dma.vmem_to_hbm [thread:$0]  (%p9216_p1), %s7973_s2, 32, %s12195_s17, [#allocation35]  }
0x1304   : > { %10487 = dma.done.wait (%p9216_p1), [#allocation5], 16  }
0x1305   : > { %10489 = vsyncadd (%p9216_p1), [#allocation5], 4294967280 }
0x1306   : > { %10491 = dma.done.wait (%p9216_p1), [#allocation35], 32  }
0x1307   : > { %10493 = vsyncadd (%p9216_p1), [#allocation35], 4294967264 }
0x1308 PF: > { %s12196_s30 = sld [smem:[#allocation53_spill]] }
0x1309   : > { %s12197_s29 = sld [smem:[#allocation49_spill]] }
0x130a   : > { %s12198_s2 = sld [smem:[#allocation50_spill]] }
0x130b   : > { %s12199_s6 = sld [smem:[#allocation54_spill]] }
0x130e   : > { %p57_p10 = scmp.ge.s32.totalorder %s12196_s30, 6  }
0x1310   :  { %59 = sbr.rel (!%p57_p10) target bundleno = 39 (0x27), region = 331 }
0x1315   :  { %7989 = vsyncpa [#allocation4], 1 }
0x1316   :  { %7991 = vsyncpa [#allocation4 + $0x1], 1 }
0x1317   :  { %7992 = vsyncpa [#allocation7], 1 }
0x1318   :  { %7993 = vsyncpa [#allocation10], 1 }
0x1319   :  { %7994 = vsyncpa [#allocation13], 1 }
0x131a   :  { %7996 = vsyncpa [#allocation13 + $0x1], 1 }
0x131b   :  { %7997 = vsyncpa [#allocation16], 1 }
0x131c   :  { %7999 = vsyncpa [#allocation16 + $0x1], 1 }
0x131d   :  { %8000 = vsyncpa [#allocation19], 1 }
0x131e   :  { %8002 = vsyncpa [#allocation19 + $0x1], 1 }
0x131f   :  { %8003 = vsyncpa [#allocation22], 1 }
0x1320   :  { %8005 = vsyncpa [#allocation22 + $0x1], 1 }
0x1321   :  { %8006 = vsyncpa [#allocation25], 1 }
0x1322   :  { %8008 = vsyncpa [#allocation25 + $0x1], 1 }
0x1323   :  { %8009 = vsyncpa [#allocation28], 1 }
0x1324   :  { %8011 = vsyncpa [#allocation28 + $0x1], 1 }
0x1325   :  { %8012 = vsyncpa [#allocation31], 1 }
0x1326   :  { %8013 = vsyncpa [#allocation5], 1 }
0x1327   :  { %8015 = vsyncpa [#allocation5 + $0x1], 1 }
0x1328   :  { %8016 = vsyncpa [#allocation35], 1 }

</bundles_post_ra>
